<compile_context>
chip_gen: v6e
topology: v6e:2x2x1
jax: 0.10.0
libtpu: 0.0.40
codegen_flags: <defaults>
</compile_context>

<pallas_src>
import functools

import numpy as np
import jax
import jax.numpy as jnp
from jax.experimental import pallas as pl
from jax.experimental.pallas import tpu as pltpu

LANE = 128
_VMEM = pl.BlockSpec(memory_space=pltpu.MemorySpace.VMEM)


def _round_up(n, m):
    return ((n + m - 1) // m) * m


def _conv_shape(input_size, filter_size, stride, padding=0):
    return 1 + (input_size - filter_size + 2 * padding) // stride


# ---------------------------------------------------------------------------
# The single fused kernel
# ---------------------------------------------------------------------------
def _ddqn_fused_kernel(p1_ref, w1_ref, b1_ref, s2_ref, w2_ref, b2_ref,
                       s3_ref, w3_ref, b3_ref, wl1_ref, bl1_ref,
                       wb1_ref, bb1_ref, wb2_ref, bb2_ref, o_ref,
                       *, batch, out_size):
    """Whole DDQN forward.  bf16 MXU operands, f32 accumulation/elementwise.

    p1  : conv1 im2col patches            [M1P, 8*8*Cin]   (rows padded, zeros)
    s2  : conv2 per-tap selection 0/1     [16,  M2P, M1P]
    s3  : conv3 per-tap selection 0/1     [9,   M3P, M2P]
    wb1 : [action1.W | state1.W]          [512, 512]
    wb2 : block-diag(action2 -> cols 0..out-1, state2 -> col out), 128 lanes
    """
    f32, bf16 = jnp.float32, jnp.bfloat16

    # ---- conv1: one MXU matmul over the pre-gathered patches -------------
    h1 = jnp.dot(p1_ref[...], w1_ref[...], preferred_element_type=f32)
    h1 = jnp.clip(h1 + b1_ref[...], 0.0, 6.0).astype(bf16)          # [M1P, 32]

    # ---- conv2: per-tap selection matmuls, activations stay in VMEM ------
    acc2 = jnp.zeros((s2_ref.shape[1], w2_ref.shape[2]), f32)
    for k in range(s2_ref.shape[0]):                                 # 16 taps
        rows = jnp.dot(s2_ref[k], h1, preferred_element_type=f32).astype(bf16)
        acc2 = acc2 + jnp.dot(rows, w2_ref[k], preferred_element_type=f32)
    h2 = jnp.clip(acc2 + b2_ref[...], 0.0, 6.0).astype(bf16)        # [M2P, 64]

    # ---- conv3 -------------------------------------------------------------
    acc3 = jnp.zeros((s3_ref.shape[1], w3_ref.shape[2]), f32)
    for k in range(s3_ref.shape[0]):                                 # 9 taps
        rows = jnp.dot(s3_ref[k], h2, preferred_element_type=f32).astype(bf16)
        acc3 = acc3 + jnp.dot(rows, w3_ref[k], preferred_element_type=f32)
    h3 = jnp.clip(acc3 + b3_ref[...], 0.0, 6.0).astype(bf16)        # [M3P, 64]

    # ---- dense tail: linear1 + fused dueling head --------------------------
    h4 = jnp.dot(h3, wl1_ref[...], preferred_element_type=f32)
    h4 = jnp.clip(h4 + bl1_ref[...], 0.0, 6.0).astype(bf16)         # [M3P, 512]

    z = jnp.dot(h4, wb1_ref[...], preferred_element_type=f32)
    z = jnp.clip(z + bb1_ref[...], 0.0, 6.0).astype(bf16)           # [M3P, 512]

    q = jnp.dot(z, wb2_ref[...], preferred_element_type=f32) + bb2_ref[...]  # [M3P,128]

    row = jax.lax.broadcasted_iota(jnp.int32, q.shape, 0)
    col = jax.lax.broadcasted_iota(jnp.int32, q.shape, 1)
    valid = (row < batch) & (col < out_size)
    # torch.mean(x_action): GLOBAL mean over the real batch*out_size entries.
    a_mean = jnp.sum(jnp.where(valid, q, 0.0)) / (batch * out_size)
    s_val = q[:, out_size:out_size + 1]            # state value: static lane slice
    # Fully lane/sublane-dense store; padding sliced off in the jitted wrapper.
    o_ref[...] = jnp.where(valid, q - a_mean + s_val, 0.0)


# ---------------------------------------------------------------------------
# Host-side (jit-fused) conv1 im2col directly from the NCHW input
# ---------------------------------------------------------------------------
def _im2col_nchw(x, kh, kw, stride):
    # x: [B, C, H, W] -> patches: [B*oh*ow, kh*kw*C]  (kh,kw,C column order,
    # matching w.reshape(kh*kw*C, Cout) of an HWIO weight).
    B, C, H, W = x.shape
    oh = _conv_shape(H, kh, stride)
    ow = _conv_shape(W, kw, stride)
    cols = []
    for i in range(kh):
        for j in range(kw):
            sl = x[:, :, i:i + stride * oh:stride, j:j + stride * ow:stride]  # [B,C,oh,ow]
            cols.append(jnp.transpose(sl, (0, 2, 3, 1)))                      # [B,oh,ow,C]
    col = jnp.stack(cols, axis=3)                        # [B, oh, ow, kh*kw, C]
    return col.reshape(B * oh * ow, kh * kw * C)


def _selection_matrices(batch, h_in, w_in, kh, kw, stride, m_in_pad):
    """Per-tap 0/1 row-selection matrices implementing im2col as matmuls."""
    oh = _conv_shape(h_in, kh, stride)
    ow = _conv_shape(w_in, kw, stride)
    m_out = batch * oh * ow
    m_out_pad = _round_up(max(m_out, 8), 8)
    sel = np.zeros((kh * kw, m_out_pad, m_in_pad), np.float32)
    for b in range(batch):
        for oy in range(oh):
            for ox in range(ow):
                m = (b * oh + oy) * ow + ox
                for ky in range(kh):
                    for kx in range(kw):
                        src = (b * h_in + stride * oy + ky) * w_in + stride * ox + kx
                        sel[ky * kw + kx, m, src] = 1.0
    return jnp.asarray(sel, jnp.bfloat16), oh, m_out_pad


# ---------------------------------------------------------------------------
# Parameter init (xavier-normal weights, zero biases — matches the module)
# ---------------------------------------------------------------------------
def _xavier_normal(key, shape, fan_in, fan_out):
    std = (2.0 / (fan_in + fan_out)) ** 0.5
    return std * jax.random.normal(key, shape, dtype=jnp.float32)


def init_params(key, state_dim, input_size, output_size):
    conv_length = _conv_shape(_conv_shape(_conv_shape(input_size, 8, 3), 4, 2), 3, 1)
    conv_shape = conv_length ** 2 * 64

    ks = jax.random.split(key, 8)
    p = {}
    # conv weights in HWIO layout: [kh, kw, in_ch, out_ch]
    p["wc1"] = _xavier_normal(ks[0], (8, 8, state_dim, 32), state_dim * 64, 32 * 64)
    p["bc1"] = jnp.zeros((32,), jnp.float32)
    p["wc2"] = _xavier_normal(ks[1], (4, 4, 32, 64), 32 * 16, 64 * 16)
    p["bc2"] = jnp.zeros((64,), jnp.float32)
    p["wc3"] = _xavier_normal(ks[2], (3, 3, 64, 64), 64 * 9, 64 * 9)
    p["bc3"] = jnp.zeros((64,), jnp.float32)
    # dense weights stored as [in, out]
    p["wl1"] = _xavier_normal(ks[3], (conv_shape, 512), conv_shape, 512)
    p["bl1"] = jnp.zeros((512,), jnp.float32)
    p["wa1"] = _xavier_normal(ks[4], (512, 256), 512, 256)
    p["ba1"] = jnp.zeros((256,), jnp.float32)
    p["wa2"] = _xavier_normal(ks[5], (256, output_size), 256, output_size)
    p["ba2"] = jnp.zeros((output_size,), jnp.float32)
    p["ws1"] = _xavier_normal(ks[6], (512, 256), 512, 256)
    p["bs1"] = jnp.zeros((256,), jnp.float32)
    p["ws2"] = _xavier_normal(ks[7], (256, 1), 256, 1)
    p["bs2"] = jnp.zeros((1,), jnp.float32)
    return p


def prepare_params(p, *, batch, input_size, output_size):
    """One-time preprocessing: unpadded bf16 matmul operands, f32 biases,
    fused/block-diagonal dueling weights, and the conv2/conv3 selection plans."""
    assert output_size + 1 <= LANE
    oh1 = _conv_shape(input_size, 8, 3)
    oh2 = _conv_shape(oh1, 4, 2)
    oh3 = _conv_shape(oh2, 3, 1)
    assert oh3 == 1, "fused flatten assumes the conv trunk ends at 1x1 spatial"

    m1p = _round_up(max(batch * oh1 * oh1, 8), 8)
    s2, _, m2p = _selection_matrices(batch, oh1, oh1, 4, 4, 2, m1p)
    s3, _, _ = _selection_matrices(batch, oh2, oh2, 3, 3, 1, m2p)

    bf = jnp.bfloat16
    t = {}
    t["w1"] = p["wc1"].reshape(-1, 32).astype(bf)              # [8*8*Cin, 32]
    t["b1"] = p["bc1"].reshape(1, 32)
    t["s2"] = s2                                               # [16, M2P, M1P]
    t["w2"] = p["wc2"].reshape(16, 32, 64).astype(bf)
    t["b2"] = p["bc2"].reshape(1, 64)
    t["s3"] = s3                                               # [9, M3P, M2P]
    t["w3"] = p["wc3"].reshape(9, 64, 64).astype(bf)
    t["b3"] = p["bc3"].reshape(1, 64)

    t["wl1"] = p["wl1"].astype(bf)                             # [64, 512]
    t["bl1"] = p["bl1"].reshape(1, -1)

    # branch-1 fused: [action1 | state1]
    t["wb1"] = jnp.concatenate([p["wa1"], p["ws1"]], axis=1).astype(bf)   # [512,512]
    t["bb1"] = jnp.concatenate([p["ba1"], p["bs1"]]).reshape(1, -1)

    # branch-2 block-diagonal, padded to 128 lanes (the only padded weight —
    # it produces the lane-dense output slab directly).
    out = output_size
    wb2 = jnp.zeros((512, LANE), jnp.float32)
    wb2 = wb2.at[:256, :out].set(p["wa2"])
    wb2 = wb2.at[256:, out].set(p["ws2"][:, 0])
    bb2 = jnp.zeros((1, LANE), jnp.float32)
    bb2 = bb2.at[0, :out].set(p["ba2"])
    bb2 = bb2.at[0, out].set(p["bs2"][0])
    t["wb2"] = wb2.astype(bf)
    t["bb2"] = bb2
    return t


# ---------------------------------------------------------------------------
# Forward pass (DDQN.forward), fully jitted — ONE pallas_call
# ---------------------------------------------------------------------------
@functools.partial(jax.jit, static_argnums=(2,))
def ddqn_forward(tp, x_nchw, output_size):
    x = x_nchw.astype(jnp.float32)
    batch = x.shape[0]

    patches = _im2col_nchw(x, 8, 8, 3)                     # [B*oh1*ow1, 8*8*Cin]
    m1p = tp["s2"].shape[2]
    patches = jnp.pad(patches, ((0, m1p - patches.shape[0]), (0, 0)))
    patches = patches.astype(jnp.bfloat16)                 # [M1P, 256] bf16

    m3p = tp["s3"].shape[1]
    q = pl.pallas_call(
        functools.partial(_ddqn_fused_kernel, batch=batch, out_size=output_size),
        out_shape=jax.ShapeDtypeStruct((m3p, LANE), jnp.float32),
        in_specs=[_VMEM] * 15,
        out_specs=_VMEM,
    )(patches, tp["w1"], tp["b1"], tp["s2"], tp["w2"], tp["b2"],
      tp["s3"], tp["w3"], tp["b3"], tp["wl1"], tp["bl1"],
      tp["wb1"], tp["bb1"], tp["wb2"], tp["bb2"])
    return q[:batch, :output_size]                         # [B, output_size]


if __name__ == "__main__":
    STATE_DIM = 4      # stacked frames / channels
    INPUT_SIZE = 32    # spatial size; 32 -> conv trunk ends at 1x1x64
    OUTPUT_SIZE = 5    # CarRacing discrete action count
    BATCH = 2

    key = jax.random.PRNGKey(0)
    pkey, xkey = jax.random.split(key)
    raw_params = init_params(pkey, STATE_DIM, INPUT_SIZE, OUTPUT_SIZE)
    params = prepare_params(raw_params, batch=BATCH, input_size=INPUT_SIZE,
                            output_size=OUTPUT_SIZE)
    x = jax.random.normal(xkey, (BATCH, STATE_DIM, INPUT_SIZE, INPUT_SIZE),
                          dtype=jnp.float32)

    out = ddqn_forward(params, x, OUTPUT_SIZE)
    out = jax.block_until_ready(out)
    assert out.shape == (BATCH, OUTPUT_SIZE), out.shape
    assert bool(jnp.all(jnp.isfinite(out)))
    print("KERNEL_OK")
</pallas_src>

<mosaic_0001>
module attributes {stable_mosaic.version = 11 : i64} {
  func.func @_ddqn_fused_kernel(%arg0: memref<168x256xbf16, #tpu.memory_space<vmem>>, %arg1: memref<256x32xbf16, #tpu.memory_space<vmem>>, %arg2: memref<1x32xf32, #tpu.memory_space<vmem>>, %arg3: memref<16x24x168xbf16, #tpu.memory_space<vmem>>, %arg4: memref<16x32x64xbf16, #tpu.memory_space<vmem>>, %arg5: memref<1x64xf32, #tpu.memory_space<vmem>>, %arg6: memref<9x8x24xbf16, #tpu.memory_space<vmem>>, %arg7: memref<9x64x64xbf16, #tpu.memory_space<vmem>>, %arg8: memref<1x64xf32, #tpu.memory_space<vmem>>, %arg9: memref<64x512xbf16, #tpu.memory_space<vmem>>, %arg10: memref<1x512xf32, #tpu.memory_space<vmem>>, %arg11: memref<512x512xbf16, #tpu.memory_space<vmem>>, %arg12: memref<1x512xf32, #tpu.memory_space<vmem>>, %arg13: memref<512x128xbf16, #tpu.memory_space<vmem>>, %arg14: memref<1x128xf32, #tpu.memory_space<vmem>>, %arg15: memref<8x128xf32, #tpu.memory_space<vmem>>) attributes {dimension_semantics = [], scalar_prefetch = 0 : i64, scratch_operands = 0 : i64, tpu.core_type = #tpu.core_type<tc>} {
    %c0 = arith.constant 0 : index
    %c0_0 = arith.constant 0 : index
    %0 = vector.load %arg0[%c0, %c0_0] : memref<168x256xbf16, #tpu.memory_space<vmem>>, vector<168x256xbf16>
    %c0_1 = arith.constant 0 : index
    %c0_2 = arith.constant 0 : index
    %1 = vector.load %arg1[%c0_1, %c0_2] : memref<256x32xbf16, #tpu.memory_space<vmem>>, vector<256x32xbf16>
    %cst = arith.constant dense<0.000000e+00> : vector<168x32xf32>
    %2 = tpu.matmul %0, %1, %cst {dimension_numbers = #tpu.dot_dimension_numbers<[1], [0], [0], [1], [0, 0, 1, 1], [], []>} : vector<168x256xbf16>, vector<256x32xbf16>, vector<168x32xf32> -> vector<168x32xf32>
    %c0_3 = arith.constant 0 : index
    %c0_4 = arith.constant 0 : index
    %3 = vector.load %arg2[%c0_3, %c0_4] : memref<1x32xf32, #tpu.memory_space<vmem>>, vector<1x32xf32>
    %4 = vector.broadcast %3 : vector<1x32xf32> to vector<168x32xf32>
    %5 = arith.addf %2, %4 : vector<168x32xf32>
    %cst_5 = arith.constant 0.000000e+00 : f32
    %cst_6 = arith.constant 6.000000e+00 : f32
    %6 = vector.broadcast %cst_5 : f32 to vector<168x32xf32>
    %7 = arith.maximumf %6, %5 : vector<168x32xf32>
    %8 = vector.broadcast %cst_6 : f32 to vector<168x32xf32>
    %9 = arith.minimumf %8, %7 : vector<168x32xf32>
    %10 = arith.truncf %9 : vector<168x32xf32> to vector<168x32xbf16>
    %cst_7 = arith.constant 0.000000e+00 : f32
    %11 = vector.broadcast %cst_7 : f32 to vector<24x64xf32>
    %c0_8 = arith.constant 0 : index
    %c0_9 = arith.constant 0 : index
    %c0_10 = arith.constant 0 : index
    %12 = vector.load %arg3[%c0_8, %c0_9, %c0_10] : memref<16x24x168xbf16, #tpu.memory_space<vmem>>, vector<1x24x168xbf16>
    %13 = vector.shape_cast %12 : vector<1x24x168xbf16> to vector<24x168xbf16>
    %cst_11 = arith.constant dense<0.000000e+00> : vector<24x32xf32>
    %14 = tpu.matmul %13, %10, %cst_11 {dimension_numbers = #tpu.dot_dimension_numbers<[1], [0], [0], [1], [0, 0, 1, 1], [], []>} : vector<24x168xbf16>, vector<168x32xbf16>, vector<24x32xf32> -> vector<24x32xf32>
    %15 = arith.truncf %14 : vector<24x32xf32> to vector<24x32xbf16>
    %c0_12 = arith.constant 0 : index
    %c0_13 = arith.constant 0 : index
    %c0_14 = arith.constant 0 : index
    %16 = vector.load %arg4[%c0_12, %c0_13, %c0_14] : memref<16x32x64xbf16, #tpu.memory_space<vmem>>, vector<1x32x64xbf16>
    %17 = vector.shape_cast %16 : vector<1x32x64xbf16> to vector<32x64xbf16>
    %cst_15 = arith.constant dense<0.000000e+00> : vector<24x64xf32>
    %18 = tpu.matmul %15, %17, %cst_15 {dimension_numbers = #tpu.dot_dimension_numbers<[1], [0], [0], [1], [0, 0, 1, 1], [], []>} : vector<24x32xbf16>, vector<32x64xbf16>, vector<24x64xf32> -> vector<24x64xf32>
    %19 = arith.addf %11, %18 : vector<24x64xf32>
    %c1 = arith.constant 1 : index
    %c0_16 = arith.constant 0 : index
    %c0_17 = arith.constant 0 : index
    %20 = vector.load %arg3[%c1, %c0_16, %c0_17] : memref<16x24x168xbf16, #tpu.memory_space<vmem>>, vector<1x24x168xbf16>
    %21 = vector.shape_cast %20 : vector<1x24x168xbf16> to vector<24x168xbf16>
    %cst_18 = arith.constant dense<0.000000e+00> : vector<24x32xf32>
    %22 = tpu.matmul %21, %10, %cst_18 {dimension_numbers = #tpu.dot_dimension_numbers<[1], [0], [0], [1], [0, 0, 1, 1], [], []>} : vector<24x168xbf16>, vector<168x32xbf16>, vector<24x32xf32> -> vector<24x32xf32>
    %23 = arith.truncf %22 : vector<24x32xf32> to vector<24x32xbf16>
    %c1_19 = arith.constant 1 : index
    %c0_20 = arith.constant 0 : index
    %c0_21 = arith.constant 0 : index
    %24 = vector.load %arg4[%c1_19, %c0_20, %c0_21] : memref<16x32x64xbf16, #tpu.memory_space<vmem>>, vector<1x32x64xbf16>
    %25 = vector.shape_cast %24 : vector<1x32x64xbf16> to vector<32x64xbf16>
    %cst_22 = arith.constant dense<0.000000e+00> : vector<24x64xf32>
    %26 = tpu.matmul %23, %25, %cst_22 {dimension_numbers = #tpu.dot_dimension_numbers<[1], [0], [0], [1], [0, 0, 1, 1], [], []>} : vector<24x32xbf16>, vector<32x64xbf16>, vector<24x64xf32> -> vector<24x64xf32>
    %27 = arith.addf %19, %26 : vector<24x64xf32>
    %c2 = arith.constant 2 : index
    %c0_23 = arith.constant 0 : index
    %c0_24 = arith.constant 0 : index
    %28 = vector.load %arg3[%c2, %c0_23, %c0_24] : memref<16x24x168xbf16, #tpu.memory_space<vmem>>, vector<1x24x168xbf16>
    %29 = vector.shape_cast %28 : vector<1x24x168xbf16> to vector<24x168xbf16>
    %cst_25 = arith.constant dense<0.000000e+00> : vector<24x32xf32>
    %30 = tpu.matmul %29, %10, %cst_25 {dimension_numbers = #tpu.dot_dimension_numbers<[1], [0], [0], [1], [0, 0, 1, 1], [], []>} : vector<24x168xbf16>, vector<168x32xbf16>, vector<24x32xf32> -> vector<24x32xf32>
    %31 = arith.truncf %30 : vector<24x32xf32> to vector<24x32xbf16>
    %c2_26 = arith.constant 2 : index
    %c0_27 = arith.constant 0 : index
    %c0_28 = arith.constant 0 : index
    %32 = vector.load %arg4[%c2_26, %c0_27, %c0_28] : memref<16x32x64xbf16, #tpu.memory_space<vmem>>, vector<1x32x64xbf16>
    %33 = vector.shape_cast %32 : vector<1x32x64xbf16> to vector<32x64xbf16>
    %cst_29 = arith.constant dense<0.000000e+00> : vector<24x64xf32>
    %34 = tpu.matmul %31, %33, %cst_29 {dimension_numbers = #tpu.dot_dimension_numbers<[1], [0], [0], [1], [0, 0, 1, 1], [], []>} : vector<24x32xbf16>, vector<32x64xbf16>, vector<24x64xf32> -> vector<24x64xf32>
    %35 = arith.addf %27, %34 : vector<24x64xf32>
    %c3 = arith.constant 3 : index
    %c0_30 = arith.constant 0 : index
    %c0_31 = arith.constant 0 : index
    %36 = vector.load %arg3[%c3, %c0_30, %c0_31] : memref<16x24x168xbf16, #tpu.memory_space<vmem>>, vector<1x24x168xbf16>
    %37 = vector.shape_cast %36 : vector<1x24x168xbf16> to vector<24x168xbf16>
    %cst_32 = arith.constant dense<0.000000e+00> : vector<24x32xf32>
    %38 = tpu.matmul %37, %10, %cst_32 {dimension_numbers = #tpu.dot_dimension_numbers<[1], [0], [0], [1], [0, 0, 1, 1], [], []>} : vector<24x168xbf16>, vector<168x32xbf16>, vector<24x32xf32> -> vector<24x32xf32>
    %39 = arith.truncf %38 : vector<24x32xf32> to vector<24x32xbf16>
    %c3_33 = arith.constant 3 : index
    %c0_34 = arith.constant 0 : index
    %c0_35 = arith.constant 0 : index
    %40 = vector.load %arg4[%c3_33, %c0_34, %c0_35] : memref<16x32x64xbf16, #tpu.memory_space<vmem>>, vector<1x32x64xbf16>
    %41 = vector.shape_cast %40 : vector<1x32x64xbf16> to vector<32x64xbf16>
    %cst_36 = arith.constant dense<0.000000e+00> : vector<24x64xf32>
    %42 = tpu.matmul %39, %41, %cst_36 {dimension_numbers = #tpu.dot_dimension_numbers<[1], [0], [0], [1], [0, 0, 1, 1], [], []>} : vector<24x32xbf16>, vector<32x64xbf16>, vector<24x64xf32> -> vector<24x64xf32>
    %43 = arith.addf %35, %42 : vector<24x64xf32>
    %c4 = arith.constant 4 : index
    %c0_37 = arith.constant 0 : index
    %c0_38 = arith.constant 0 : index
    %44 = vector.load %arg3[%c4, %c0_37, %c0_38] : memref<16x24x168xbf16, #tpu.memory_space<vmem>>, vector<1x24x168xbf16>
    %45 = vector.shape_cast %44 : vector<1x24x168xbf16> to vector<24x168xbf16>
    %cst_39 = arith.constant dense<0.000000e+00> : vector<24x32xf32>
    %46 = tpu.matmul %45, %10, %cst_39 {dimension_numbers = #tpu.dot_dimension_numbers<[1], [0], [0], [1], [0, 0, 1, 1], [], []>} : vector<24x168xbf16>, vector<168x32xbf16>, vector<24x32xf32> -> vector<24x32xf32>
    %47 = arith.truncf %46 : vector<24x32xf32> to vector<24x32xbf16>
    %c4_40 = arith.constant 4 : index
    %c0_41 = arith.constant 0 : index
    %c0_42 = arith.constant 0 : index
    %48 = vector.load %arg4[%c4_40, %c0_41, %c0_42] : memref<16x32x64xbf16, #tpu.memory_space<vmem>>, vector<1x32x64xbf16>
    %49 = vector.shape_cast %48 : vector<1x32x64xbf16> to vector<32x64xbf16>
    %cst_43 = arith.constant dense<0.000000e+00> : vector<24x64xf32>
    %50 = tpu.matmul %47, %49, %cst_43 {dimension_numbers = #tpu.dot_dimension_numbers<[1], [0], [0], [1], [0, 0, 1, 1], [], []>} : vector<24x32xbf16>, vector<32x64xbf16>, vector<24x64xf32> -> vector<24x64xf32>
    %51 = arith.addf %43, %50 : vector<24x64xf32>
    %c5 = arith.constant 5 : index
    %c0_44 = arith.constant 0 : index
    %c0_45 = arith.constant 0 : index
    %52 = vector.load %arg3[%c5, %c0_44, %c0_45] : memref<16x24x168xbf16, #tpu.memory_space<vmem>>, vector<1x24x168xbf16>
    %53 = vector.shape_cast %52 : vector<1x24x168xbf16> to vector<24x168xbf16>
    %cst_46 = arith.constant dense<0.000000e+00> : vector<24x32xf32>
    %54 = tpu.matmul %53, %10, %cst_46 {dimension_numbers = #tpu.dot_dimension_numbers<[1], [0], [0], [1], [0, 0, 1, 1], [], []>} : vector<24x168xbf16>, vector<168x32xbf16>, vector<24x32xf32> -> vector<24x32xf32>
    %55 = arith.truncf %54 : vector<24x32xf32> to vector<24x32xbf16>
    %c5_47 = arith.constant 5 : index
    %c0_48 = arith.constant 0 : index
    %c0_49 = arith.constant 0 : index
    %56 = vector.load %arg4[%c5_47, %c0_48, %c0_49] : memref<16x32x64xbf16, #tpu.memory_space<vmem>>, vector<1x32x64xbf16>
    %57 = vector.shape_cast %56 : vector<1x32x64xbf16> to vector<32x64xbf16>
    %cst_50 = arith.constant dense<0.000000e+00> : vector<24x64xf32>
    %58 = tpu.matmul %55, %57, %cst_50 {dimension_numbers = #tpu.dot_dimension_numbers<[1], [0], [0], [1], [0, 0, 1, 1], [], []>} : vector<24x32xbf16>, vector<32x64xbf16>, vector<24x64xf32> -> vector<24x64xf32>
    %59 = arith.addf %51, %58 : vector<24x64xf32>
    %c6 = arith.constant 6 : index
    %c0_51 = arith.constant 0 : index
    %c0_52 = arith.constant 0 : index
    %60 = vector.load %arg3[%c6, %c0_51, %c0_52] : memref<16x24x168xbf16, #tpu.memory_space<vmem>>, vector<1x24x168xbf16>
    %61 = vector.shape_cast %60 : vector<1x24x168xbf16> to vector<24x168xbf16>
    %cst_53 = arith.constant dense<0.000000e+00> : vector<24x32xf32>
    %62 = tpu.matmul %61, %10, %cst_53 {dimension_numbers = #tpu.dot_dimension_numbers<[1], [0], [0], [1], [0, 0, 1, 1], [], []>} : vector<24x168xbf16>, vector<168x32xbf16>, vector<24x32xf32> -> vector<24x32xf32>
    %63 = arith.truncf %62 : vector<24x32xf32> to vector<24x32xbf16>
    %c6_54 = arith.constant 6 : index
    %c0_55 = arith.constant 0 : index
    %c0_56 = arith.constant 0 : index
    %64 = vector.load %arg4[%c6_54, %c0_55, %c0_56] : memref<16x32x64xbf16, #tpu.memory_space<vmem>>, vector<1x32x64xbf16>
    %65 = vector.shape_cast %64 : vector<1x32x64xbf16> to vector<32x64xbf16>
    %cst_57 = arith.constant dense<0.000000e+00> : vector<24x64xf32>
    %66 = tpu.matmul %63, %65, %cst_57 {dimension_numbers = #tpu.dot_dimension_numbers<[1], [0], [0], [1], [0, 0, 1, 1], [], []>} : vector<24x32xbf16>, vector<32x64xbf16>, vector<24x64xf32> -> vector<24x64xf32>
    %67 = arith.addf %59, %66 : vector<24x64xf32>
    %c7 = arith.constant 7 : index
    %c0_58 = arith.constant 0 : index
    %c0_59 = arith.constant 0 : index
    %68 = vector.load %arg3[%c7, %c0_58, %c0_59] : memref<16x24x168xbf16, #tpu.memory_space<vmem>>, vector<1x24x168xbf16>
    %69 = vector.shape_cast %68 : vector<1x24x168xbf16> to vector<24x168xbf16>
    %cst_60 = arith.constant dense<0.000000e+00> : vector<24x32xf32>
    %70 = tpu.matmul %69, %10, %cst_60 {dimension_numbers = #tpu.dot_dimension_numbers<[1], [0], [0], [1], [0, 0, 1, 1], [], []>} : vector<24x168xbf16>, vector<168x32xbf16>, vector<24x32xf32> -> vector<24x32xf32>
    %71 = arith.truncf %70 : vector<24x32xf32> to vector<24x32xbf16>
    %c7_61 = arith.constant 7 : index
    %c0_62 = arith.constant 0 : index
    %c0_63 = arith.constant 0 : index
    %72 = vector.load %arg4[%c7_61, %c0_62, %c0_63] : memref<16x32x64xbf16, #tpu.memory_space<vmem>>, vector<1x32x64xbf16>
    %73 = vector.shape_cast %72 : vector<1x32x64xbf16> to vector<32x64xbf16>
    %cst_64 = arith.constant dense<0.000000e+00> : vector<24x64xf32>
    %74 = tpu.matmul %71, %73, %cst_64 {dimension_numbers = #tpu.dot_dimension_numbers<[1], [0], [0], [1], [0, 0, 1, 1], [], []>} : vector<24x32xbf16>, vector<32x64xbf16>, vector<24x64xf32> -> vector<24x64xf32>
    %75 = arith.addf %67, %74 : vector<24x64xf32>
    %c8 = arith.constant 8 : index
    %c0_65 = arith.constant 0 : index
    %c0_66 = arith.constant 0 : index
    %76 = vector.load %arg3[%c8, %c0_65, %c0_66] : memref<16x24x168xbf16, #tpu.memory_space<vmem>>, vector<1x24x168xbf16>
    %77 = vector.shape_cast %76 : vector<1x24x168xbf16> to vector<24x168xbf16>
    %cst_67 = arith.constant dense<0.000000e+00> : vector<24x32xf32>
    %78 = tpu.matmul %77, %10, %cst_67 {dimension_numbers = #tpu.dot_dimension_numbers<[1], [0], [0], [1], [0, 0, 1, 1], [], []>} : vector<24x168xbf16>, vector<168x32xbf16>, vector<24x32xf32> -> vector<24x32xf32>
    %79 = arith.truncf %78 : vector<24x32xf32> to vector<24x32xbf16>
    %c8_68 = arith.constant 8 : index
    %c0_69 = arith.constant 0 : index
    %c0_70 = arith.constant 0 : index
    %80 = vector.load %arg4[%c8_68, %c0_69, %c0_70] : memref<16x32x64xbf16, #tpu.memory_space<vmem>>, vector<1x32x64xbf16>
    %81 = vector.shape_cast %80 : vector<1x32x64xbf16> to vector<32x64xbf16>
    %cst_71 = arith.constant dense<0.000000e+00> : vector<24x64xf32>
    %82 = tpu.matmul %79, %81, %cst_71 {dimension_numbers = #tpu.dot_dimension_numbers<[1], [0], [0], [1], [0, 0, 1, 1], [], []>} : vector<24x32xbf16>, vector<32x64xbf16>, vector<24x64xf32> -> vector<24x64xf32>
    %83 = arith.addf %75, %82 : vector<24x64xf32>
    %c9 = arith.constant 9 : index
    %c0_72 = arith.constant 0 : index
    %c0_73 = arith.constant 0 : index
    %84 = vector.load %arg3[%c9, %c0_72, %c0_73] : memref<16x24x168xbf16, #tpu.memory_space<vmem>>, vector<1x24x168xbf16>
    %85 = vector.shape_cast %84 : vector<1x24x168xbf16> to vector<24x168xbf16>
    %cst_74 = arith.constant dense<0.000000e+00> : vector<24x32xf32>
    %86 = tpu.matmul %85, %10, %cst_74 {dimension_numbers = #tpu.dot_dimension_numbers<[1], [0], [0], [1], [0, 0, 1, 1], [], []>} : vector<24x168xbf16>, vector<168x32xbf16>, vector<24x32xf32> -> vector<24x32xf32>
    %87 = arith.truncf %86 : vector<24x32xf32> to vector<24x32xbf16>
    %c9_75 = arith.constant 9 : index
    %c0_76 = arith.constant 0 : index
    %c0_77 = arith.constant 0 : index
    %88 = vector.load %arg4[%c9_75, %c0_76, %c0_77] : memref<16x32x64xbf16, #tpu.memory_space<vmem>>, vector<1x32x64xbf16>
    %89 = vector.shape_cast %88 : vector<1x32x64xbf16> to vector<32x64xbf16>
    %cst_78 = arith.constant dense<0.000000e+00> : vector<24x64xf32>
    %90 = tpu.matmul %87, %89, %cst_78 {dimension_numbers = #tpu.dot_dimension_numbers<[1], [0], [0], [1], [0, 0, 1, 1], [], []>} : vector<24x32xbf16>, vector<32x64xbf16>, vector<24x64xf32> -> vector<24x64xf32>
    %91 = arith.addf %83, %90 : vector<24x64xf32>
    %c10 = arith.constant 10 : index
    %c0_79 = arith.constant 0 : index
    %c0_80 = arith.constant 0 : index
    %92 = vector.load %arg3[%c10, %c0_79, %c0_80] : memref<16x24x168xbf16, #tpu.memory_space<vmem>>, vector<1x24x168xbf16>
    %93 = vector.shape_cast %92 : vector<1x24x168xbf16> to vector<24x168xbf16>
    %cst_81 = arith.constant dense<0.000000e+00> : vector<24x32xf32>
    %94 = tpu.matmul %93, %10, %cst_81 {dimension_numbers = #tpu.dot_dimension_numbers<[1], [0], [0], [1], [0, 0, 1, 1], [], []>} : vector<24x168xbf16>, vector<168x32xbf16>, vector<24x32xf32> -> vector<24x32xf32>
    %95 = arith.truncf %94 : vector<24x32xf32> to vector<24x32xbf16>
    %c10_82 = arith.constant 10 : index
    %c0_83 = arith.constant 0 : index
    %c0_84 = arith.constant 0 : index
    %96 = vector.load %arg4[%c10_82, %c0_83, %c0_84] : memref<16x32x64xbf16, #tpu.memory_space<vmem>>, vector<1x32x64xbf16>
    %97 = vector.shape_cast %96 : vector<1x32x64xbf16> to vector<32x64xbf16>
    %cst_85 = arith.constant dense<0.000000e+00> : vector<24x64xf32>
    %98 = tpu.matmul %95, %97, %cst_85 {dimension_numbers = #tpu.dot_dimension_numbers<[1], [0], [0], [1], [0, 0, 1, 1], [], []>} : vector<24x32xbf16>, vector<32x64xbf16>, vector<24x64xf32> -> vector<24x64xf32>
    %99 = arith.addf %91, %98 : vector<24x64xf32>
    %c11 = arith.constant 11 : index
    %c0_86 = arith.constant 0 : index
    %c0_87 = arith.constant 0 : index
    %100 = vector.load %arg3[%c11, %c0_86, %c0_87] : memref<16x24x168xbf16, #tpu.memory_space<vmem>>, vector<1x24x168xbf16>
    %101 = vector.shape_cast %100 : vector<1x24x168xbf16> to vector<24x168xbf16>
    %cst_88 = arith.constant dense<0.000000e+00> : vector<24x32xf32>
    %102 = tpu.matmul %101, %10, %cst_88 {dimension_numbers = #tpu.dot_dimension_numbers<[1], [0], [0], [1], [0, 0, 1, 1], [], []>} : vector<24x168xbf16>, vector<168x32xbf16>, vector<24x32xf32> -> vector<24x32xf32>
    %103 = arith.truncf %102 : vector<24x32xf32> to vector<24x32xbf16>
    %c11_89 = arith.constant 11 : index
    %c0_90 = arith.constant 0 : index
    %c0_91 = arith.constant 0 : index
    %104 = vector.load %arg4[%c11_89, %c0_90, %c0_91] : memref<16x32x64xbf16, #tpu.memory_space<vmem>>, vector<1x32x64xbf16>
    %105 = vector.shape_cast %104 : vector<1x32x64xbf16> to vector<32x64xbf16>
    %cst_92 = arith.constant dense<0.000000e+00> : vector<24x64xf32>
    %106 = tpu.matmul %103, %105, %cst_92 {dimension_numbers = #tpu.dot_dimension_numbers<[1], [0], [0], [1], [0, 0, 1, 1], [], []>} : vector<24x32xbf16>, vector<32x64xbf16>, vector<24x64xf32> -> vector<24x64xf32>
    %107 = arith.addf %99, %106 : vector<24x64xf32>
    %c12 = arith.constant 12 : index
    %c0_93 = arith.constant 0 : index
    %c0_94 = arith.constant 0 : index
    %108 = vector.load %arg3[%c12, %c0_93, %c0_94] : memref<16x24x168xbf16, #tpu.memory_space<vmem>>, vector<1x24x168xbf16>
    %109 = vector.shape_cast %108 : vector<1x24x168xbf16> to vector<24x168xbf16>
    %cst_95 = arith.constant dense<0.000000e+00> : vector<24x32xf32>
    %110 = tpu.matmul %109, %10, %cst_95 {dimension_numbers = #tpu.dot_dimension_numbers<[1], [0], [0], [1], [0, 0, 1, 1], [], []>} : vector<24x168xbf16>, vector<168x32xbf16>, vector<24x32xf32> -> vector<24x32xf32>
    %111 = arith.truncf %110 : vector<24x32xf32> to vector<24x32xbf16>
    %c12_96 = arith.constant 12 : index
    %c0_97 = arith.constant 0 : index
    %c0_98 = arith.constant 0 : index
    %112 = vector.load %arg4[%c12_96, %c0_97, %c0_98] : memref<16x32x64xbf16, #tpu.memory_space<vmem>>, vector<1x32x64xbf16>
    %113 = vector.shape_cast %112 : vector<1x32x64xbf16> to vector<32x64xbf16>
    %cst_99 = arith.constant dense<0.000000e+00> : vector<24x64xf32>
    %114 = tpu.matmul %111, %113, %cst_99 {dimension_numbers = #tpu.dot_dimension_numbers<[1], [0], [0], [1], [0, 0, 1, 1], [], []>} : vector<24x32xbf16>, vector<32x64xbf16>, vector<24x64xf32> -> vector<24x64xf32>
    %115 = arith.addf %107, %114 : vector<24x64xf32>
    %c13 = arith.constant 13 : index
    %c0_100 = arith.constant 0 : index
    %c0_101 = arith.constant 0 : index
    %116 = vector.load %arg3[%c13, %c0_100, %c0_101] : memref<16x24x168xbf16, #tpu.memory_space<vmem>>, vector<1x24x168xbf16>
    %117 = vector.shape_cast %116 : vector<1x24x168xbf16> to vector<24x168xbf16>
    %cst_102 = arith.constant dense<0.000000e+00> : vector<24x32xf32>
    %118 = tpu.matmul %117, %10, %cst_102 {dimension_numbers = #tpu.dot_dimension_numbers<[1], [0], [0], [1], [0, 0, 1, 1], [], []>} : vector<24x168xbf16>, vector<168x32xbf16>, vector<24x32xf32> -> vector<24x32xf32>
    %119 = arith.truncf %118 : vector<24x32xf32> to vector<24x32xbf16>
    %c13_103 = arith.constant 13 : index
    %c0_104 = arith.constant 0 : index
    %c0_105 = arith.constant 0 : index
    %120 = vector.load %arg4[%c13_103, %c0_104, %c0_105] : memref<16x32x64xbf16, #tpu.memory_space<vmem>>, vector<1x32x64xbf16>
    %121 = vector.shape_cast %120 : vector<1x32x64xbf16> to vector<32x64xbf16>
    %cst_106 = arith.constant dense<0.000000e+00> : vector<24x64xf32>
    %122 = tpu.matmul %119, %121, %cst_106 {dimension_numbers = #tpu.dot_dimension_numbers<[1], [0], [0], [1], [0, 0, 1, 1], [], []>} : vector<24x32xbf16>, vector<32x64xbf16>, vector<24x64xf32> -> vector<24x64xf32>
    %123 = arith.addf %115, %122 : vector<24x64xf32>
    %c14 = arith.constant 14 : index
    %c0_107 = arith.constant 0 : index
    %c0_108 = arith.constant 0 : index
    %124 = vector.load %arg3[%c14, %c0_107, %c0_108] : memref<16x24x168xbf16, #tpu.memory_space<vmem>>, vector<1x24x168xbf16>
    %125 = vector.shape_cast %124 : vector<1x24x168xbf16> to vector<24x168xbf16>
    %cst_109 = arith.constant dense<0.000000e+00> : vector<24x32xf32>
    %126 = tpu.matmul %125, %10, %cst_109 {dimension_numbers = #tpu.dot_dimension_numbers<[1], [0], [0], [1], [0, 0, 1, 1], [], []>} : vector<24x168xbf16>, vector<168x32xbf16>, vector<24x32xf32> -> vector<24x32xf32>
    %127 = arith.truncf %126 : vector<24x32xf32> to vector<24x32xbf16>
    %c14_110 = arith.constant 14 : index
    %c0_111 = arith.constant 0 : index
    %c0_112 = arith.constant 0 : index
    %128 = vector.load %arg4[%c14_110, %c0_111, %c0_112] : memref<16x32x64xbf16, #tpu.memory_space<vmem>>, vector<1x32x64xbf16>
    %129 = vector.shape_cast %128 : vector<1x32x64xbf16> to vector<32x64xbf16>
    %cst_113 = arith.constant dense<0.000000e+00> : vector<24x64xf32>
    %130 = tpu.matmul %127, %129, %cst_113 {dimension_numbers = #tpu.dot_dimension_numbers<[1], [0], [0], [1], [0, 0, 1, 1], [], []>} : vector<24x32xbf16>, vector<32x64xbf16>, vector<24x64xf32> -> vector<24x64xf32>
    %131 = arith.addf %123, %130 : vector<24x64xf32>
    %c15 = arith.constant 15 : index
    %c0_114 = arith.constant 0 : index
    %c0_115 = arith.constant 0 : index
    %132 = vector.load %arg3[%c15, %c0_114, %c0_115] : memref<16x24x168xbf16, #tpu.memory_space<vmem>>, vector<1x24x168xbf16>
    %133 = vector.shape_cast %132 : vector<1x24x168xbf16> to vector<24x168xbf16>
    %cst_116 = arith.constant dense<0.000000e+00> : vector<24x32xf32>
    %134 = tpu.matmul %133, %10, %cst_116 {dimension_numbers = #tpu.dot_dimension_numbers<[1], [0], [0], [1], [0, 0, 1, 1], [], []>} : vector<24x168xbf16>, vector<168x32xbf16>, vector<24x32xf32> -> vector<24x32xf32>
    %135 = arith.truncf %134 : vector<24x32xf32> to vector<24x32xbf16>
    %c15_117 = arith.constant 15 : index
    %c0_118 = arith.constant 0 : index
    %c0_119 = arith.constant 0 : index
    %136 = vector.load %arg4[%c15_117, %c0_118, %c0_119] : memref<16x32x64xbf16, #tpu.memory_space<vmem>>, vector<1x32x64xbf16>
    %137 = vector.shape_cast %136 : vector<1x32x64xbf16> to vector<32x64xbf16>
    %cst_120 = arith.constant dense<0.000000e+00> : vector<24x64xf32>
    %138 = tpu.matmul %135, %137, %cst_120 {dimension_numbers = #tpu.dot_dimension_numbers<[1], [0], [0], [1], [0, 0, 1, 1], [], []>} : vector<24x32xbf16>, vector<32x64xbf16>, vector<24x64xf32> -> vector<24x64xf32>
    %139 = arith.addf %131, %138 : vector<24x64xf32>
    %c0_121 = arith.constant 0 : index
    %c0_122 = arith.constant 0 : index
    %140 = vector.load %arg5[%c0_121, %c0_122] : memref<1x64xf32, #tpu.memory_space<vmem>>, vector<1x64xf32>
    %141 = vector.broadcast %140 : vector<1x64xf32> to vector<24x64xf32>
    %142 = arith.addf %139, %141 : vector<24x64xf32>
    %cst_123 = arith.constant 0.000000e+00 : f32
    %cst_124 = arith.constant 6.000000e+00 : f32
    %143 = vector.broadcast %cst_123 : f32 to vector<24x64xf32>
    %144 = arith.maximumf %143, %142 : vector<24x64xf32>
    %145 = vector.broadcast %cst_124 : f32 to vector<24x64xf32>
    %146 = arith.minimumf %145, %144 : vector<24x64xf32>
    %147 = arith.truncf %146 : vector<24x64xf32> to vector<24x64xbf16>
    %cst_125 = arith.constant 0.000000e+00 : f32
    %148 = vector.broadcast %cst_125 : f32 to vector<8x64xf32>
    %c0_126 = arith.constant 0 : index
    %c0_127 = arith.constant 0 : index
    %c0_128 = arith.constant 0 : index
    %149 = vector.load %arg6[%c0_126, %c0_127, %c0_128] : memref<9x8x24xbf16, #tpu.memory_space<vmem>>, vector<1x8x24xbf16>
    %150 = vector.shape_cast %149 : vector<1x8x24xbf16> to vector<8x24xbf16>
    %cst_129 = arith.constant dense<0.000000e+00> : vector<8x64xf32>
    %151 = tpu.matmul %150, %147, %cst_129 {dimension_numbers = #tpu.dot_dimension_numbers<[1], [0], [0], [1], [0, 0, 1, 1], [], []>} : vector<8x24xbf16>, vector<24x64xbf16>, vector<8x64xf32> -> vector<8x64xf32>
    %152 = arith.truncf %151 : vector<8x64xf32> to vector<8x64xbf16>
    %c0_130 = arith.constant 0 : index
    %c0_131 = arith.constant 0 : index
    %c0_132 = arith.constant 0 : index
    %153 = vector.load %arg7[%c0_130, %c0_131, %c0_132] : memref<9x64x64xbf16, #tpu.memory_space<vmem>>, vector<1x64x64xbf16>
    %154 = vector.shape_cast %153 : vector<1x64x64xbf16> to vector<64x64xbf16>
    %cst_133 = arith.constant dense<0.000000e+00> : vector<8x64xf32>
    %155 = tpu.matmul %152, %154, %cst_133 {dimension_numbers = #tpu.dot_dimension_numbers<[1], [0], [0], [1], [0, 0, 1, 1], [], []>} : vector<8x64xbf16>, vector<64x64xbf16>, vector<8x64xf32> -> vector<8x64xf32>
    %156 = arith.addf %148, %155 : vector<8x64xf32>
    %c1_134 = arith.constant 1 : index
    %c0_135 = arith.constant 0 : index
    %c0_136 = arith.constant 0 : index
    %157 = vector.load %arg6[%c1_134, %c0_135, %c0_136] : memref<9x8x24xbf16, #tpu.memory_space<vmem>>, vector<1x8x24xbf16>
    %158 = vector.shape_cast %157 : vector<1x8x24xbf16> to vector<8x24xbf16>
    %cst_137 = arith.constant dense<0.000000e+00> : vector<8x64xf32>
    %159 = tpu.matmul %158, %147, %cst_137 {dimension_numbers = #tpu.dot_dimension_numbers<[1], [0], [0], [1], [0, 0, 1, 1], [], []>} : vector<8x24xbf16>, vector<24x64xbf16>, vector<8x64xf32> -> vector<8x64xf32>
    %160 = arith.truncf %159 : vector<8x64xf32> to vector<8x64xbf16>
    %c1_138 = arith.constant 1 : index
    %c0_139 = arith.constant 0 : index
    %c0_140 = arith.constant 0 : index
    %161 = vector.load %arg7[%c1_138, %c0_139, %c0_140] : memref<9x64x64xbf16, #tpu.memory_space<vmem>>, vector<1x64x64xbf16>
    %162 = vector.shape_cast %161 : vector<1x64x64xbf16> to vector<64x64xbf16>
    %cst_141 = arith.constant dense<0.000000e+00> : vector<8x64xf32>
    %163 = tpu.matmul %160, %162, %cst_141 {dimension_numbers = #tpu.dot_dimension_numbers<[1], [0], [0], [1], [0, 0, 1, 1], [], []>} : vector<8x64xbf16>, vector<64x64xbf16>, vector<8x64xf32> -> vector<8x64xf32>
    %164 = arith.addf %156, %163 : vector<8x64xf32>
    %c2_142 = arith.constant 2 : index
    %c0_143 = arith.constant 0 : index
    %c0_144 = arith.constant 0 : index
    %165 = vector.load %arg6[%c2_142, %c0_143, %c0_144] : memref<9x8x24xbf16, #tpu.memory_space<vmem>>, vector<1x8x24xbf16>
    %166 = vector.shape_cast %165 : vector<1x8x24xbf16> to vector<8x24xbf16>
    %cst_145 = arith.constant dense<0.000000e+00> : vector<8x64xf32>
    %167 = tpu.matmul %166, %147, %cst_145 {dimension_numbers = #tpu.dot_dimension_numbers<[1], [0], [0], [1], [0, 0, 1, 1], [], []>} : vector<8x24xbf16>, vector<24x64xbf16>, vector<8x64xf32> -> vector<8x64xf32>
    %168 = arith.truncf %167 : vector<8x64xf32> to vector<8x64xbf16>
    %c2_146 = arith.constant 2 : index
    %c0_147 = arith.constant 0 : index
    %c0_148 = arith.constant 0 : index
    %169 = vector.load %arg7[%c2_146, %c0_147, %c0_148] : memref<9x64x64xbf16, #tpu.memory_space<vmem>>, vector<1x64x64xbf16>
    %170 = vector.shape_cast %169 : vector<1x64x64xbf16> to vector<64x64xbf16>
    %cst_149 = arith.constant dense<0.000000e+00> : vector<8x64xf32>
    %171 = tpu.matmul %168, %170, %cst_149 {dimension_numbers = #tpu.dot_dimension_numbers<[1], [0], [0], [1], [0, 0, 1, 1], [], []>} : vector<8x64xbf16>, vector<64x64xbf16>, vector<8x64xf32> -> vector<8x64xf32>
    %172 = arith.addf %164, %171 : vector<8x64xf32>
    %c3_150 = arith.constant 3 : index
    %c0_151 = arith.constant 0 : index
    %c0_152 = arith.constant 0 : index
    %173 = vector.load %arg6[%c3_150, %c0_151, %c0_152] : memref<9x8x24xbf16, #tpu.memory_space<vmem>>, vector<1x8x24xbf16>
    %174 = vector.shape_cast %173 : vector<1x8x24xbf16> to vector<8x24xbf16>
    %cst_153 = arith.constant dense<0.000000e+00> : vector<8x64xf32>
    %175 = tpu.matmul %174, %147, %cst_153 {dimension_numbers = #tpu.dot_dimension_numbers<[1], [0], [0], [1], [0, 0, 1, 1], [], []>} : vector<8x24xbf16>, vector<24x64xbf16>, vector<8x64xf32> -> vector<8x64xf32>
    %176 = arith.truncf %175 : vector<8x64xf32> to vector<8x64xbf16>
    %c3_154 = arith.constant 3 : index
    %c0_155 = arith.constant 0 : index
    %c0_156 = arith.constant 0 : index
    %177 = vector.load %arg7[%c3_154, %c0_155, %c0_156] : memref<9x64x64xbf16, #tpu.memory_space<vmem>>, vector<1x64x64xbf16>
    %178 = vector.shape_cast %177 : vector<1x64x64xbf16> to vector<64x64xbf16>
    %cst_157 = arith.constant dense<0.000000e+00> : vector<8x64xf32>
    %179 = tpu.matmul %176, %178, %cst_157 {dimension_numbers = #tpu.dot_dimension_numbers<[1], [0], [0], [1], [0, 0, 1, 1], [], []>} : vector<8x64xbf16>, vector<64x64xbf16>, vector<8x64xf32> -> vector<8x64xf32>
    %180 = arith.addf %172, %179 : vector<8x64xf32>
    %c4_158 = arith.constant 4 : index
    %c0_159 = arith.constant 0 : index
    %c0_160 = arith.constant 0 : index
    %181 = vector.load %arg6[%c4_158, %c0_159, %c0_160] : memref<9x8x24xbf16, #tpu.memory_space<vmem>>, vector<1x8x24xbf16>
    %182 = vector.shape_cast %181 : vector<1x8x24xbf16> to vector<8x24xbf16>
    %cst_161 = arith.constant dense<0.000000e+00> : vector<8x64xf32>
    %183 = tpu.matmul %182, %147, %cst_161 {dimension_numbers = #tpu.dot_dimension_numbers<[1], [0], [0], [1], [0, 0, 1, 1], [], []>} : vector<8x24xbf16>, vector<24x64xbf16>, vector<8x64xf32> -> vector<8x64xf32>
    %184 = arith.truncf %183 : vector<8x64xf32> to vector<8x64xbf16>
    %c4_162 = arith.constant 4 : index
    %c0_163 = arith.constant 0 : index
    %c0_164 = arith.constant 0 : index
    %185 = vector.load %arg7[%c4_162, %c0_163, %c0_164] : memref<9x64x64xbf16, #tpu.memory_space<vmem>>, vector<1x64x64xbf16>
    %186 = vector.shape_cast %185 : vector<1x64x64xbf16> to vector<64x64xbf16>
    %cst_165 = arith.constant dense<0.000000e+00> : vector<8x64xf32>
    %187 = tpu.matmul %184, %186, %cst_165 {dimension_numbers = #tpu.dot_dimension_numbers<[1], [0], [0], [1], [0, 0, 1, 1], [], []>} : vector<8x64xbf16>, vector<64x64xbf16>, vector<8x64xf32> -> vector<8x64xf32>
    %188 = arith.addf %180, %187 : vector<8x64xf32>
    %c5_166 = arith.constant 5 : index
    %c0_167 = arith.constant 0 : index
    %c0_168 = arith.constant 0 : index
    %189 = vector.load %arg6[%c5_166, %c0_167, %c0_168] : memref<9x8x24xbf16, #tpu.memory_space<vmem>>, vector<1x8x24xbf16>
    %190 = vector.shape_cast %189 : vector<1x8x24xbf16> to vector<8x24xbf16>
    %cst_169 = arith.constant dense<0.000000e+00> : vector<8x64xf32>
    %191 = tpu.matmul %190, %147, %cst_169 {dimension_numbers = #tpu.dot_dimension_numbers<[1], [0], [0], [1], [0, 0, 1, 1], [], []>} : vector<8x24xbf16>, vector<24x64xbf16>, vector<8x64xf32> -> vector<8x64xf32>
    %192 = arith.truncf %191 : vector<8x64xf32> to vector<8x64xbf16>
    %c5_170 = arith.constant 5 : index
    %c0_171 = arith.constant 0 : index
    %c0_172 = arith.constant 0 : index
    %193 = vector.load %arg7[%c5_170, %c0_171, %c0_172] : memref<9x64x64xbf16, #tpu.memory_space<vmem>>, vector<1x64x64xbf16>
    %194 = vector.shape_cast %193 : vector<1x64x64xbf16> to vector<64x64xbf16>
    %cst_173 = arith.constant dense<0.000000e+00> : vector<8x64xf32>
    %195 = tpu.matmul %192, %194, %cst_173 {dimension_numbers = #tpu.dot_dimension_numbers<[1], [0], [0], [1], [0, 0, 1, 1], [], []>} : vector<8x64xbf16>, vector<64x64xbf16>, vector<8x64xf32> -> vector<8x64xf32>
    %196 = arith.addf %188, %195 : vector<8x64xf32>
    %c6_174 = arith.constant 6 : index
    %c0_175 = arith.constant 0 : index
    %c0_176 = arith.constant 0 : index
    %197 = vector.load %arg6[%c6_174, %c0_175, %c0_176] : memref<9x8x24xbf16, #tpu.memory_space<vmem>>, vector<1x8x24xbf16>
    %198 = vector.shape_cast %197 : vector<1x8x24xbf16> to vector<8x24xbf16>
    %cst_177 = arith.constant dense<0.000000e+00> : vector<8x64xf32>
    %199 = tpu.matmul %198, %147, %cst_177 {dimension_numbers = #tpu.dot_dimension_numbers<[1], [0], [0], [1], [0, 0, 1, 1], [], []>} : vector<8x24xbf16>, vector<24x64xbf16>, vector<8x64xf32> -> vector<8x64xf32>
    %200 = arith.truncf %199 : vector<8x64xf32> to vector<8x64xbf16>
    %c6_178 = arith.constant 6 : index
    %c0_179 = arith.constant 0 : index
    %c0_180 = arith.constant 0 : index
    %201 = vector.load %arg7[%c6_178, %c0_179, %c0_180] : memref<9x64x64xbf16, #tpu.memory_space<vmem>>, vector<1x64x64xbf16>
    %202 = vector.shape_cast %201 : vector<1x64x64xbf16> to vector<64x64xbf16>
    %cst_181 = arith.constant dense<0.000000e+00> : vector<8x64xf32>
    %203 = tpu.matmul %200, %202, %cst_181 {dimension_numbers = #tpu.dot_dimension_numbers<[1], [0], [0], [1], [0, 0, 1, 1], [], []>} : vector<8x64xbf16>, vector<64x64xbf16>, vector<8x64xf32> -> vector<8x64xf32>
    %204 = arith.addf %196, %203 : vector<8x64xf32>
    %c7_182 = arith.constant 7 : index
    %c0_183 = arith.constant 0 : index
    %c0_184 = arith.constant 0 : index
    %205 = vector.load %arg6[%c7_182, %c0_183, %c0_184] : memref<9x8x24xbf16, #tpu.memory_space<vmem>>, vector<1x8x24xbf16>
    %206 = vector.shape_cast %205 : vector<1x8x24xbf16> to vector<8x24xbf16>
    %cst_185 = arith.constant dense<0.000000e+00> : vector<8x64xf32>
    %207 = tpu.matmul %206, %147, %cst_185 {dimension_numbers = #tpu.dot_dimension_numbers<[1], [0], [0], [1], [0, 0, 1, 1], [], []>} : vector<8x24xbf16>, vector<24x64xbf16>, vector<8x64xf32> -> vector<8x64xf32>
    %208 = arith.truncf %207 : vector<8x64xf32> to vector<8x64xbf16>
    %c7_186 = arith.constant 7 : index
    %c0_187 = arith.constant 0 : index
    %c0_188 = arith.constant 0 : index
    %209 = vector.load %arg7[%c7_186, %c0_187, %c0_188] : memref<9x64x64xbf16, #tpu.memory_space<vmem>>, vector<1x64x64xbf16>
    %210 = vector.shape_cast %209 : vector<1x64x64xbf16> to vector<64x64xbf16>
    %cst_189 = arith.constant dense<0.000000e+00> : vector<8x64xf32>
    %211 = tpu.matmul %208, %210, %cst_189 {dimension_numbers = #tpu.dot_dimension_numbers<[1], [0], [0], [1], [0, 0, 1, 1], [], []>} : vector<8x64xbf16>, vector<64x64xbf16>, vector<8x64xf32> -> vector<8x64xf32>
    %212 = arith.addf %204, %211 : vector<8x64xf32>
    %c8_190 = arith.constant 8 : index
    %c0_191 = arith.constant 0 : index
    %c0_192 = arith.constant 0 : index
    %213 = vector.load %arg6[%c8_190, %c0_191, %c0_192] : memref<9x8x24xbf16, #tpu.memory_space<vmem>>, vector<1x8x24xbf16>
    %214 = vector.shape_cast %213 : vector<1x8x24xbf16> to vector<8x24xbf16>
    %cst_193 = arith.constant dense<0.000000e+00> : vector<8x64xf32>
    %215 = tpu.matmul %214, %147, %cst_193 {dimension_numbers = #tpu.dot_dimension_numbers<[1], [0], [0], [1], [0, 0, 1, 1], [], []>} : vector<8x24xbf16>, vector<24x64xbf16>, vector<8x64xf32> -> vector<8x64xf32>
    %216 = arith.truncf %215 : vector<8x64xf32> to vector<8x64xbf16>
    %c8_194 = arith.constant 8 : index
    %c0_195 = arith.constant 0 : index
    %c0_196 = arith.constant 0 : index
    %217 = vector.load %arg7[%c8_194, %c0_195, %c0_196] : memref<9x64x64xbf16, #tpu.memory_space<vmem>>, vector<1x64x64xbf16>
    %218 = vector.shape_cast %217 : vector<1x64x64xbf16> to vector<64x64xbf16>
    %cst_197 = arith.constant dense<0.000000e+00> : vector<8x64xf32>
    %219 = tpu.matmul %216, %218, %cst_197 {dimension_numbers = #tpu.dot_dimension_numbers<[1], [0], [0], [1], [0, 0, 1, 1], [], []>} : vector<8x64xbf16>, vector<64x64xbf16>, vector<8x64xf32> -> vector<8x64xf32>
    %220 = arith.addf %212, %219 : vector<8x64xf32>
    %c0_198 = arith.constant 0 : index
    %c0_199 = arith.constant 0 : index
    %221 = vector.load %arg8[%c0_198, %c0_199] : memref<1x64xf32, #tpu.memory_space<vmem>>, vector<1x64xf32>
    %222 = vector.broadcast %221 : vector<1x64xf32> to vector<8x64xf32>
    %223 = arith.addf %220, %222 : vector<8x64xf32>
    %cst_200 = arith.constant 0.000000e+00 : f32
    %cst_201 = arith.constant 6.000000e+00 : f32
    %224 = vector.broadcast %cst_200 : f32 to vector<8x64xf32>
    %225 = arith.maximumf %224, %223 : vector<8x64xf32>
    %226 = vector.broadcast %cst_201 : f32 to vector<8x64xf32>
    %227 = arith.minimumf %226, %225 : vector<8x64xf32>
    %228 = arith.truncf %227 : vector<8x64xf32> to vector<8x64xbf16>
    %c0_202 = arith.constant 0 : index
    %c0_203 = arith.constant 0 : index
    %229 = vector.load %arg9[%c0_202, %c0_203] : memref<64x512xbf16, #tpu.memory_space<vmem>>, vector<64x512xbf16>
    %cst_204 = arith.constant dense<0.000000e+00> : vector<8x512xf32>
    %230 = tpu.matmul %228, %229, %cst_204 {dimension_numbers = #tpu.dot_dimension_numbers<[1], [0], [0], [1], [0, 0, 1, 1], [], []>} : vector<8x64xbf16>, vector<64x512xbf16>, vector<8x512xf32> -> vector<8x512xf32>
    %c0_205 = arith.constant 0 : index
    %c0_206 = arith.constant 0 : index
    %231 = vector.load %arg10[%c0_205, %c0_206] : memref<1x512xf32, #tpu.memory_space<vmem>>, vector<1x512xf32>
    %232 = vector.broadcast %231 : vector<1x512xf32> to vector<8x512xf32>
    %233 = arith.addf %230, %232 : vector<8x512xf32>
    %cst_207 = arith.constant 0.000000e+00 : f32
    %cst_208 = arith.constant 6.000000e+00 : f32
    %234 = vector.broadcast %cst_207 : f32 to vector<8x512xf32>
    %235 = arith.maximumf %234, %233 : vector<8x512xf32>
    %236 = vector.broadcast %cst_208 : f32 to vector<8x512xf32>
    %237 = arith.minimumf %236, %235 : vector<8x512xf32>
    %238 = arith.truncf %237 : vector<8x512xf32> to vector<8x512xbf16>
    %c0_209 = arith.constant 0 : index
    %c0_210 = arith.constant 0 : index
    %239 = vector.load %arg11[%c0_209, %c0_210] : memref<512x512xbf16, #tpu.memory_space<vmem>>, vector<512x512xbf16>
    %cst_211 = arith.constant dense<0.000000e+00> : vector<8x512xf32>
    %240 = tpu.matmul %238, %239, %cst_211 {dimension_numbers = #tpu.dot_dimension_numbers<[1], [0], [0], [1], [0, 0, 1, 1], [], []>} : vector<8x512xbf16>, vector<512x512xbf16>, vector<8x512xf32> -> vector<8x512xf32>
    %c0_212 = arith.constant 0 : index
    %c0_213 = arith.constant 0 : index
    %241 = vector.load %arg12[%c0_212, %c0_213] : memref<1x512xf32, #tpu.memory_space<vmem>>, vector<1x512xf32>
    %242 = vector.broadcast %241 : vector<1x512xf32> to vector<8x512xf32>
    %243 = arith.addf %240, %242 : vector<8x512xf32>
    %cst_214 = arith.constant 0.000000e+00 : f32
    %cst_215 = arith.constant 6.000000e+00 : f32
    %244 = vector.broadcast %cst_214 : f32 to vector<8x512xf32>
    %245 = arith.maximumf %244, %243 : vector<8x512xf32>
    %246 = vector.broadcast %cst_215 : f32 to vector<8x512xf32>
    %247 = arith.minimumf %246, %245 : vector<8x512xf32>
    %248 = arith.truncf %247 : vector<8x512xf32> to vector<8x512xbf16>
    %c0_216 = arith.constant 0 : index
    %c0_217 = arith.constant 0 : index
    %249 = vector.load %arg13[%c0_216, %c0_217] : memref<512x128xbf16, #tpu.memory_space<vmem>>, vector<512x128xbf16>
    %cst_218 = arith.constant dense<0.000000e+00> : vector<8x128xf32>
    %250 = tpu.matmul %248, %249, %cst_218 {dimension_numbers = #tpu.dot_dimension_numbers<[1], [0], [0], [1], [0, 0, 1, 1], [], []>} : vector<8x512xbf16>, vector<512x128xbf16>, vector<8x128xf32> -> vector<8x128xf32>
    %c0_219 = arith.constant 0 : index
    %c0_220 = arith.constant 0 : index
    %251 = vector.load %arg14[%c0_219, %c0_220] : memref<1x128xf32, #tpu.memory_space<vmem>>, vector<1x128xf32>
    %252 = vector.broadcast %251 : vector<1x128xf32> to vector<8x128xf32>
    %253 = arith.addf %250, %252 : vector<8x128xf32>
    %254 = tpu.iota {dimensions = array<i32: 0>} : vector<8x128xi32>
    %255 = tpu.iota {dimensions = array<i32: 1>} : vector<8x128xi32>
    %c2_i32 = arith.constant 2 : i32
    %256 = vector.broadcast %c2_i32 : i32 to vector<8x128xi32>
    %257 = arith.cmpi slt, %254, %256 : vector<8x128xi32>
    %c5_i32 = arith.constant 5 : i32
    %258 = vector.broadcast %c5_i32 : i32 to vector<8x128xi32>
    %259 = arith.cmpi slt, %255, %258 : vector<8x128xi32>
    %260 = arith.andi %257, %259 : vector<8x128xi1>
    %cst_221 = arith.constant 0.000000e+00 : f32
    %261 = vector.broadcast %cst_221 : f32 to vector<8x128xf32>
    %262 = arith.select %260, %253, %261 : vector<8x128xi1>, vector<8x128xf32>
    %263 = vector.shape_cast %262 : vector<8x128xf32> to vector<1x8x128xf32>
    %cst_222 = arith.constant dense<0.000000e+00> : vector<1xf32>
    %264 = vector.multi_reduction <add>, %263, %cst_222 [1, 2] : vector<1x8x128xf32> to vector<1xf32>
    %265 = vector.shape_cast %264 : vector<1xf32> to vector<1x1x1xf32>
    %266 = vector.extract %265[0, 0, 0] : f32 from vector<1x1x1xf32>
    %cst_223 = arith.constant 1.000000e+01 : f32
    %267 = arith.divf %266, %cst_223 : f32
    %268 = vector.extract_strided_slice %253 {offsets = [0, 5], sizes = [8, 1], strides = [1, 1]} : vector<8x128xf32> to vector<8x1xf32>
    %269 = vector.broadcast %267 : f32 to vector<8x128xf32>
    %270 = arith.subf %253, %269 : vector<8x128xf32>
    %271 = vector.broadcast %268 : vector<8x1xf32> to vector<8x128xf32>
    %272 = arith.addf %270, %271 : vector<8x128xf32>
    %cst_224 = arith.constant 0.000000e+00 : f32
    %273 = vector.broadcast %cst_224 : f32 to vector<8x128xf32>
    %274 = arith.select %260, %272, %273 : vector<8x128xi1>, vector<8x128xf32>
    %c0_225 = arith.constant 0 : index
    %c0_226 = arith.constant 0 : index
    %275 = vector.load %arg15[%c0_225, %c0_226] : memref<8x128xf32, #tpu.memory_space<vmem>>, vector<8x128xf32>
    tpu.vector_store %arg15[%c0_225, %c0_226], %274 {strides = array<i32>} : memref<8x128xf32, #tpu.memory_space<vmem>>, vector<8x128xf32>,
    return
  }
}

</mosaic_0001>

<bundles_post_ra>
// kernel: ddqn_forward.1
= control target key start
LH: loop header
LB: loop body
LE: loop exit
PB: predicated region body
PF: predicated region fallthrough
CT: control target
= control target key end

     0   :  { %v7196_v39 = vmov 0   ;;  %vm505_vm0 = vcmask 326656   ;;  %vm512_vm1 = vcmask 1043456   ;;  %vm662_vm2 = vcmask 261120   ;;  %s9029_s1 = inlined_call_operand.vmem [shape: bf16[256,32], index: 1, kind: input, shape index: {}]   ;;  %s9030_s0 = inlined_call_operand.vmem [shape: bf16[168,256], index: 0, kind: input, shape index: {}]   ;;  %s9031_s3 = inlined_call_operand.vmem [shape: bf16[16,24,168], index: 3, kind: input, shape index: {}]   ;;  %s9032_s2 = inlined_call_operand.vmem [shape: f32[1,32], index: 2, kind: input, shape index: {}]   ;;  %s9033_s4 = inlined_call_operand.vmem [shape: bf16[16,32,64], index: 4, kind: input, shape index: {}]   ;;  %s9034_s7 = inlined_call_operand.vmem [shape: bf16[9,64,64], index: 7, kind: input, shape index: {}]   ;;  %s9035_s5 = inlined_call_operand.vmem [shape: f32[1,64], index: 5, kind: input, shape index: {}]   ;;  %s9036_s6 = inlined_call_operand.vmem [shape: bf16[9,8,24], index: 6, kind: input, shape index: {}]   ;;  %s9037_s9 = inlined_call_operand.vmem [shape: bf16[64,512], index: 9, kind: input, shape index: {}]   ;;  %s9038_s11 = inlined_call_operand.vmem [shape: bf16[512,512], index: 11, kind: input, shape index: {}]   ;;  %s9039_s8 = inlined_call_operand.vmem [shape: f32[1,64], index: 8, kind: input, shape index: {}]   ;;  %s9040_s13 = inlined_call_operand.vmem [shape: bf16[512,128], index: 13, kind: input, shape index: {}]   ;;  %s9041_s10 = inlined_call_operand.vmem [shape: f32[1,512], index: 10, kind: input, shape index: {}]   ;;  %s9042_s12 = inlined_call_operand.vmem [shape: f32[1,512], index: 12, kind: input, shape index: {}]   ;;  %s9043_s14 = inlined_call_operand.vmem [shape: f32[1,128], index: 14, kind: input, shape index: {}]   ;;  %s9044_s15 = inlined_call_operand.vmem [shape: f32[8,128], index: 15, kind: output, shape index: {}]  }
   0x1   :  { %v6752_v0 = vld [vmem:[%s9029_s1 + $0x78] sm:$0xff]   ;;  %v6754_v2 = vld [vmem:[%s9029_s1 + $0x70] sm:$0xff]   ;;  %v6756_v4 = vld [vmem:[%s9029_s1 + $0x68] sm:$0xff]   ;;  %516 = vmatprep.subr.bf16.mxu1 %v7196_v39  ;;  %vm7198_vm3 = vmmov 0   ;;  %vm2888_vm4 = vcmask 195584   ;;  %vm3023_vm5 = vcmask 523264  }
   0x2   :  { %v6753_v1 = vld [vmem:[%s9029_s1 + $0x38] sm:$0xff]   ;;  %6175 = vmatprep.subr.bf16.mxu0 %v6752_v0  ;;  %v6755_v3 = vld [vmem:[%s9029_s1 + $0x30] sm:$0xff]   ;;  %v6757_v5 = vld [vmem:[%s9029_s1 + $0x28] sm:$0xff]  }
   0x3   :  { %6176 = vmatpush3.bf16.msra.mxu0 %v6753_v1  ;;  %v6758_v6 = vld [vmem:[%s9029_s1 + $0x60] sm:$0xff]   ;;  %v6760_v8 = vld [vmem:[%s9029_s1 + $0x58] sm:$0xff]   ;;  %v6762_v10 = vld [vmem:[%s9029_s1 + $0x50] sm:$0xff]  }
   0x4   :  { %6177 = vmatprep.subr.bf16.mxu0 %v6754_v2  ;;  %v6759_v7 = vld [vmem:[%s9029_s1 + $0x20] sm:$0xff]   ;;  %v6761_v9 = vld [vmem:[%s9029_s1 + $0x18] sm:$0xff]   ;;  %v6763_v12 = vld [vmem:[%s9029_s1 + $0x10] sm:$0xff]  }
   0x5   :  { %v6770_v11 = vld [vmem:[%s9030_s0 + $0x4] ss:$8 sps:$4 sm:$0xff]   ;;  %v6768_v17 = vld [vmem:[%s9030_s0] ss:$8 sps:$4 sm:$0xff]   ;;  %v6771_v18 = vld [vmem:[%s9030_s0 + $0x14] ss:$8 sps:$4 sm:$0xff]  }
   0x6   :  { %346 = vmatprep.mubr.bf16.mxu0 %v6770_v11  ;;  %v6764_v13 = vld [vmem:[%s9029_s1 + $0x48] sm:$0xff]   ;;  %v6766_v15 = vld [vmem:[%s9029_s1 + $0x40] sm:$0xff]   ;;  %v6773_v19 = vld [vmem:[%s9030_s0 + $0x10] ss:$8 sps:$4 sm:$0xff]  }
   0x7   :  { %6178 = vmatpush3.bf16.msra.mxu0 %v6755_v3  ;;  %v6765_v14 = vld [vmem:[%s9029_s1 + $0x8] sm:$0xff]   ;;  %v6767_v16 = vld [vmem:[%s9029_s1] sm:$0xff]   ;;  %v6777_v22 = vld [vmem:[%s9030_s0 + $0x34] ss:$8 sps:$4 sm:$0xff]  }
   0x8   :  { %6179 = vmatprep.subr.bf16.mxu0 %v6756_v4  ;;  %v6774_v20 = vld [vmem:[%s9030_s0 + $0x24] ss:$8 sps:$4 sm:$0xff]   ;;  %v6776_v21 = vld [vmem:[%s9030_s0 + $0x20] ss:$8 sps:$4 sm:$0xff]   ;;  %v6779_v23 = vld [vmem:[%s9030_s0 + $0x30] ss:$8 sps:$4 sm:$0xff]  }
   0x9   :  { %v6780_v24 = vld [vmem:[%s9030_s0 + $0x44] ss:$8 sps:$4 sm:$0xff]   ;;  %v6782_v25 = vld [vmem:[%s9030_s0 + $0x40] ss:$8 sps:$4 sm:$0xff]   ;;  %v6783_v26 = vld [vmem:[%s9030_s0 + $0x54] ss:$8 sps:$4 sm:$0xff]  }
   0xa   :  { %v6785_v27 = vld [vmem:[%s9030_s0 + $0x50] ss:$8 sps:$4 sm:$0xff]   ;;  %v6786_v28 = vld [vmem:[%s9030_s0 + $0x64] ss:$8 sps:$4 sm:$0xff]   ;;  %v6788_v29 = vld [vmem:[%s9030_s0 + $0x60] ss:$8 sps:$4 sm:$0xff]  }
   0xb   :  { %6180 = vmatpush3.bf16.msra.mxu0 %v6757_v5  ;;  %v6789_v30 = vld [vmem:[%s9030_s0 + $0x74] ss:$8 sps:$4 sm:$0xff]   ;;  %v6791_v31 = vld [vmem:[%s9030_s0 + $0x70] ss:$8 sps:$4 sm:$0xff]   ;;  %v6792_v32 = vld [vmem:[%s9030_s0 + $0x84] ss:$8 sps:$4 sm:$0xff]  }
   0xc   :  { %6181 = vmatprep.subr.bf16.mxu0 %v6758_v6  ;;  %v6794_v33 = vld [vmem:[%s9030_s0 + $0x80] ss:$8 sps:$4 sm:$0xff]   ;;  %v6795_v34 = vld [vmem:[%s9030_s0 + $0x94] ss:$8 sps:$4 sm:$0xff]   ;;  %v6797_v36 = vld [vmem:[%s9030_s0 + $0x90] ss:$8 sps:$4 sm:$0xff]  }
   0xd   :  { %v71_v35 = vld [vmem:[%s9030_s0 + $0xa0] sm:$0xff]  ;;  %v6805_v41 = vld [vmem:[%s9031_s3 + $0x34] ss:$8 sps:$4 sm:$0xff]  }
   0xe   :  { %v5586_v37 = vcombine.high %v71_v35, %v71_v35  ;;  %v5585_v38 = vcombine.low %v71_v35, %v71_v35  ;;  %v6802_v40 = vld [vmem:[%s9031_s3 + $0x4] ss:$8 sps:$4 sm:$0xff]   ;;  %v7404_v43 = vld [vmem:[%s9032_s2] ss:$0 sm:$0xff] }
   0xf   :  { %6182 = vmatpush3.bf16.msra.mxu0 %v6759_v7  ;;  %5607 = vmatprep.mubr.msk.bf16.mxu1 %vm505_vm0, %v6802_v40 }
  0x10   :  { %6183 = vmatprep.subr.bf16.mxu0 %v6760_v8 }
  0x13   :  { %6184 = vmatpush3.bf16.msra.mxu0 %v6761_v9 }
  0x14   :  { %6185 = vmatprep.subr.bf16.mxu0 %v6762_v10 }
  0x17   :  { %6186 = vmatpush3.bf16.msra.mxu0 %v6763_v12 }
  0x18   :  { %6187 = vmatprep.subr.bf16.mxu0 %v6764_v13 }
  0x1b   :  { %6188 = vmatpush3.bf16.msra.mxu0 %v6765_v14 }
  0x1c   :  { %6189 = vmatprep.subr.bf16.mxu0 %v6766_v15 }
  0x1f   :  { %6190 = vmatpush3.bf16.msra.mxu0 %v6767_v16 }
  0x20   :  { %808 = vmatprep.subr.bf16.mxu0 %v7196_v39 }
  0x22   :  { %347 = vmatmul.mubr.bf16.vlgmr.msra.gmra.mxu0 %v6768_v17 }
  0x23   :  { %354 = vmatprep.mubr.bf16.mxu0 %v6771_v18 }
  0x2a   :  { %355 = vmatmul.mubr.bf16.gmra.mxu0 %v6773_v19 }
  0x2b   :  { %362 = vmatprep.mubr.bf16.mxu0 %v6774_v20 }
  0x32   :  { %363 = vmatmul.mubr.bf16.gmra.mxu0 %v6776_v21 }
  0x33   :  { %370 = vmatprep.mubr.bf16.mxu0 %v6777_v22 }
  0x3a   :  { %371 = vmatmul.mubr.bf16.gmra.mxu0 %v6779_v23 }
  0x3b   :  { %378 = vmatprep.mubr.bf16.mxu0 %v6780_v24 }
  0x42   :  { %379 = vmatmul.mubr.bf16.gmra.mxu0 %v6782_v25 }
  0x43   :  { %386 = vmatprep.mubr.bf16.mxu0 %v6783_v26 }
  0x4a   :  { %387 = vmatmul.mubr.bf16.gmra.mxu0 %v6785_v27 }
  0x4b   :  { %394 = vmatprep.mubr.bf16.mxu0 %v6786_v28 }
  0x52   :  { %395 = vmatmul.mubr.bf16.gmra.mxu0 %v6788_v29 }
  0x53   :  { %402 = vmatprep.mubr.bf16.mxu0 %v6789_v30 }
  0x5a   :  { %403 = vmatmul.mubr.bf16.gmra.mxu0 %v6791_v31 }
  0x5b   :  { %410 = vmatprep.mubr.bf16.mxu0 %v6792_v32 }
  0x62   :  { %411 = vmatmul.mubr.bf16.gmra.mxu0 %v6794_v33 }
  0x63   :  { %418 = vmatprep.mubr.bf16.mxu0 %v6795_v34 }
  0x6a   :  { %419 = vmatmul.mubr.bf16.gmra.mxu0 %v6797_v36 }
  0x6b   :  { %426 = vmatprep.mubr.bf16.mxu0 %v5586_v37 }
  0x72   :  { %427 = vmatmul.mubr.bf16.gmra.mxu0 %v5585_v38 }
  0x73   :  { %5637 = vmatprep.mubr.msk.bf16.mxu0 %vm505_vm0, %v6805_v41 }
  0xe2   :  { %v6191_v42 = vpop.f32.mrf.mxu0 }
  0xe4   :  { %v6192_v44 = vpop.f32.mrf.mxu0 }
  0xe5   :  { %v6193_v45 = vadd.f32 %v6192_v44, %v6191_v42 }
  0xe6   :  { %v6194_v46 = vpop.f32.mrf.mxu0 }
  0xe7   :  { %v349_v47 = vadd.f32 %v6193_v45, %v7404_v43 }
  0xe8   :  { %v6195_v48 = vpop.f32.mrf.mxu0 }
  0xe9   :  { %v6196_v49 = vadd.f32 %v6195_v48, %v6194_v46  ;;  %v434_v51 = vmax.f32 %v349_v47, 0.0 }
  0xea   :  { %v6197_v50 = vpop.f32.mrf.mxu0 }
  0xeb   :  { %v352_v52 = vadd.f32 %v6196_v49, %v7404_v43  ;;  %v455_v57 = vmin.f32 %v434_v51, 6.0 }
  0xec   :  { %v6198_v53 = vpop.f32.mrf.mxu0 }
  0xed   :  { %v435_v54 = vmax.f32 %v352_v52, 0.0  ;;  %v6199_v55 = vadd.f32 %v6198_v53, %v6197_v50 }
  0xee   :  { %v6200_v56 = vpop.f32.mrf.mxu0 }
  0xef   :  { %v456_v58 = vmin.f32 %v435_v54, 6.0  ;;  %v357_v59 = vadd.f32 %v6199_v55, %v7404_v43 }
  0xf0   :  { %v6201_v60 = vpop.f32.mrf.mxu0 }
  0xf1   :  { %v7409_v61 = vpack.c.bf16 %v456_v58, %v455_v57  ;;  %v6202_v62 = vadd.f32 %v6201_v60, %v6200_v56  ;;  %v436_v0 = vmax.f32 %v357_v59, 0.0 }
  0xf2   :  { %v6203_v63 = vpop.f32.mrf.mxu0 }
  0xf3   :  { %v360_v1 = vadd.f32 %v6202_v62, %v7404_v43  ;;  %v457_v6 = vmin.f32 %v436_v0, 6.0 }
  0xf4   :  { %v6204_v2 = vpop.f32.mrf.mxu0 }
  0xf5   :  { %v437_v3 = vmax.f32 %v360_v1, 0.0  ;;  %v7412_v4 = vadd.f32 %v6204_v2, %v6203_v63 }
  0xf6   :  { %v6206_v5 = vpop.f32.mrf.mxu0 }
  0xf7   :  { %v458_v7 = vmin.f32 %v437_v3, 6.0 }
  0xf8   :  { %v6207_v8 = vpop.f32.mrf.mxu0 }
  0xf9   :  { %v7414_v9 = vpack.c.bf16 %v458_v7, %v457_v6  ;;  %v6208_v3 = vadd.f32 %v6207_v8, %v6206_v5 }
  0xfa   :  { %v6209_v10 = vpop.f32.mrf.mxu0 }
  0xfb   :  { %v368_v8 = vadd.f32 %v6208_v3, %v7404_v43 }
  0xfc   :  { %v6210_v11 = vpop.f32.mrf.mxu0 }
  0xfd   :  { %v6211_v63 = vadd.f32 %v6210_v11, %v6209_v10 }
  0xfe   :  { %v6212_v12 = vpop.f32.mrf.mxu0 }
  0xff   :  { %v373_v11 = vadd.f32 %v6211_v63, %v7404_v43  ;;  %v6803_v63 = vld [vmem:[%s9031_s3 + $0x30] ss:$8 sps:$4 sm:$0xff]  }
 0x100   :  { %v6213_v13 = vpop.f32.mrf.mxu0 }
 0x101   :  { %v6214_v55 = vadd.f32 %v6213_v13, %v6212_v12 }
 0x102   :  { %v6215_v14 = vpop.f32.mrf.mxu0 }
 0x103   :  { %v376_v7 = vadd.f32 %v6214_v55, %v7404_v43 }
 0x104   :  { %v6216_v15 = vpop.f32.mrf.mxu0 }
 0x105   :  { %v6217_v49 = vadd.f32 %v6216_v15, %v6215_v14 }
 0x106   :  { %v6218_v16 = vpop.f32.mrf.mxu0 }
 0x107   :  { %v381_v0 = vadd.f32 %v6217_v49, %v7404_v43 }
 0x108   :  { %v6219_v17 = vpop.f32.mrf.mxu0 }
 0x109   :  { %v6220_v45 = vadd.f32 %v6219_v17, %v6218_v16  ;;  %v442_v15 = vmax.f32 %v381_v0, 0.0  ;;  %v441_v17 = vmax.f32 %v376_v7, 0.0  ;;  %v489_v0 = vld [vmem:[%s9031_s3 + $0x10] sm:$0xff] }
 0x10a   :  { %v6221_v18 = vpop.f32.mrf.mxu0 }
 0x10b   :  { %v384_v57 = vadd.f32 %v6220_v45, %v7404_v43 }
 0x10c   :  { %v6222_v19 = vpop.f32.mrf.mxu0 }
 0x10d   :  { %v6223_v38 = vadd.f32 %v6222_v19, %v6221_v18  ;;  %v443_v12 = vmax.f32 %v384_v57, 0.0 }
 0x10e   :  { %v6224_v20 = vpop.f32.mrf.mxu0 }
 0x10f   :  { %v389_v51 = vadd.f32 %v6223_v38, %v7404_v43  ;;  %v464_v18 = vmin.f32 %v443_v12, 6.0  ;;  %v6810_v12 = vld [vmem:[%s9031_s3 + $0x1c] ss:$8 sps:$4 sm:$0xff]  }
 0x110   :  { %v6225_v21 = vpop.f32.mrf.mxu0 }
 0x111   :  { %v6226_v34 = vadd.f32 %v6225_v21, %v6224_v20  ;;  %v444_v1 = vmax.f32 %v389_v51, 0.0  ;;  %v365_v21 = vadd.f32 %v7412_v4, %v7404_v43 }
 0x112   :  { %v6227_v22 = vpop.f32.mrf.mxu0 }
 0x113   :  { %v392_v46 = vadd.f32 %v6226_v34, %v7404_v43  ;;  %v465_v16 = vmin.f32 %v444_v1, 6.0  ;;  %v5632_v1 = vld [vmem:[%s9031_s3 + $0x40] sm:$0xff] }
 0x114   :  { %v6228_v23 = vpop.f32.mrf.mxu0  ;;  %v5636_v3 = vcombine.high %v5632_v1, %v5632_v1  ;;  %v5635_v7 = vcombine.low %v5632_v1, %v5632_v1 }
 0x115   :  { %v6229_v31 = vadd.f32 %v6228_v23, %v6227_v22  ;;  %v445_v58 = vmax.f32 %v392_v46, 0.0  ;;  %v440_v22 = vmax.f32 %v373_v11, 0.0  ;;  %v463_v23 = vmin.f32 %v442_v15, 6.0  ;;  %v5649_v11 = vld [vmem:[%s9031_s3 + $0x58] sm:$0xff] }
 0x116   :  { %v6230_v24 = vpop.f32.mrf.mxu0  ;;  %v6808_v15 = vld [vmem:[%s9031_s3 + $0x18] ss:$8 sps:$4 sm:$0xff]  }
 0x117   :  { %v397_v40 = vadd.f32 %v6229_v31, %v7404_v43  ;;  %v466_v13 = vmin.f32 %v445_v58, 6.0  ;;  %v461_v31 = vmin.f32 %v440_v22, 6.0  ;;  %v6822_v22 = vld [vmem:[%s9033_s4 + $0x8] sm:$0xff]  }
 0x118   :  { %v6231_v25 = vpop.f32.mrf.mxu0 }
 0x119   :  { %v6232_v28 = vadd.f32 %v6231_v25, %v6230_v24  ;;  %v446_v52 = vmax.f32 %v397_v40, 0.0  ;;  %v7447_v19 = vpack.c.bf16 %v466_v13, %v465_v16  ;;  %v439_v25 = vmax.f32 %v368_v8, 0.0  ;;  %v6817_v13 = vld [vmem:[%s9031_s3 + $0x4c] ss:$8 sps:$4 sm:$0xff]   ;;  %v6815_v16 = vld [vmem:[%s9031_s3 + $0x48] ss:$8 sps:$4 sm:$0xff]  }
 0x11a   :  { %v6233_v26 = vpop.f32.mrf.mxu0  ;;  %v5653_v8 = vcombine.high %v5649_v11, %v5649_v11 }
 0x11b   :  { %v400_v35 = vadd.f32 %v6232_v28, %v7404_v43  ;;  %v467_v2 = vmin.f32 %v446_v52, 6.0 }
 0x11c   :  { %v6234_v27 = vpop.f32.mrf.mxu0 }
 0x11d   :  { %v6235_v29 = vadd.f32 %v6234_v27, %v6233_v26  ;;  %v447_v47 = vmax.f32 %v400_v35, 0.0  ;;  %v462_v26 = vmin.f32 %v441_v17, 6.0  ;;  %v7455_v27 = vpack.c.bf16 %v464_v18, %v463_v23  ;;  %v6825_v23 = vld [vmem:[%s9033_s4 + $0x38] sm:$0xff]  }
 0x11e   :  { %v6236_v30 = vpop.f32.mrf.mxu0  ;;  %v5652_v18 = vcombine.low %v5649_v11, %v5649_v11 }
 0x11f   :  { %v405_v32 = vadd.f32 %v6235_v29, %v7404_v43  ;;  %v468_v59 = vmin.f32 %v447_v47, 6.0 }
 0x120   :  { %v6237_v33 = vpop.f32.mrf.mxu0 }
 0x121   :  { %v6238_v36 = vadd.f32 %v6237_v33, %v6236_v30  ;;  %v448_v41 = vmax.f32 %v405_v32, 0.0  ;;  %v7439_v14 = vpack.c.bf16 %v468_v59, %v467_v2  ;;  %v438_v30 = vmax.f32 %v365_v21, 0.0  ;;  %v6821_v21 = vld [vmem:[%s9033_s4 + $0x10] sm:$0xff]  }
 0x122   :  { %v7418_v37 = vpop.f32.mrf.mxu0  ;;  %v460_v32 = vmin.f32 %v439_v25, 6.0  ;;  %v7461_v33 = vpack.c.bf16 %v462_v26, %v461_v31  ;;  %v5606_v2 = vcombine.high %v489_v0, %v489_v0 }
 0x123   :  { %v408_v42 = vadd.f32 %v6238_v36, %v7404_v43  ;;  %v469_v53 = vmin.f32 %v448_v41, 6.0  ;;  %v459_v35 = vmin.f32 %v438_v30, 6.0 }
 0x124   :  { %v7422_v44 = vpop.f32.mrf.mxu0 }
 0x125   :  { %v449_v48 = vmax.f32 %v408_v42, 0.0  ;;  %v7468_v36 = vpack.c.bf16 %v460_v32, %v459_v35  ;;  %v6241_v42 = vadd.f32 %v7422_v44, %v7418_v37 }
 0x126   :  { %v7425_v50 = vpop.f32.mrf.mxu0 }
 0x127   :  { %v470_v54 = vmin.f32 %v449_v48, 6.0  ;;  %v413_v49 = vadd.f32 %v6241_v42, %v7404_v43 }
 0x128   :  { %v7428_v56 = vpop.f32.mrf.mxu0 }
 0x129   :  { %v7431_v60 = vpack.c.bf16 %v470_v54, %v469_v53  ;;  %v6244_v45 = vadd.f32 %v7428_v56, %v7425_v50  ;;  %v450_v52 = vmax.f32 %v413_v49, 0.0 }
 0x12a   :  { %v6245_v62 = vpop.f32.mrf.mxu0 }
 0x12b   :  { %517 = vmatpush1.bf16.msra.mxu1 %v7431_v60  ;;  %809 = vmatpush1.bf16.msra.mxu0 %v7431_v60  ;;  %v416_v37 = vadd.f32 %v6244_v45, %v7404_v43 }
 0x12c   :  { %518 = vmatprep.subr.bf16.mxu1 %v7196_v39  ;;  %810 = vmatprep.subr.bf16.mxu0 %v7196_v39  ;;  %v6246_v6 = vpop.f32.mrf.mxu0 }
 0x12d   :  { %v6247_v38 = vadd.f32 %v6246_v6, %v6245_v62  ;;  %v451_v53 = vmax.f32 %v416_v37, 0.0  ;;  %v6800_v62 = vld [vmem:[%s9031_s3] ss:$8 sps:$4 sm:$0xff]   ;;  %v5605_v6 = vcombine.low %v489_v0, %v489_v0 }
 0x12e   :  { %v6248_v10 = vpop.f32.mrf.mxu0 }
 0x12f   :  { %519 = vmatpush1.bf16.msra.mxu1 %v7439_v14  ;;  %811 = vmatpush1.bf16.msra.mxu0 %v7439_v14  ;;  %v421_v46 = vadd.f32 %v6247_v38, %v7404_v43  ;;  %v472_v57 = vmin.f32 %v451_v53, 6.0 }
 0x130   :  { %520 = vmatprep.subr.bf16.mxu1 %v7196_v39  ;;  %812 = vmatprep.subr.bf16.mxu0 %v7196_v39  ;;  %v6249_v5 = vpop.f32.mrf.mxu0 }
 0x131   :  { %v6250_v40 = vadd.f32 %v6249_v5, %v6248_v10  ;;  %v452_v44 = vmax.f32 %v421_v46, 0.0  ;;  %v5611_v10 = vld [vmem:[%s9031_s3 + $0x28] sm:$0xff] }
 0x132   :  { %v6251_v20 = vpop.f32.mrf.mxu0  ;;  %v5615_v5 = vcombine.high %v5611_v10, %v5611_v10  ;;  %v5614_v17 = vcombine.low %v5611_v10, %v5611_v10 }
 0x133   :  { %521 = vmatpush1.bf16.msra.mxu1 %v7447_v19  ;;  %813 = vmatpush1.bf16.msra.mxu0 %v7447_v19  ;;  %v424_v47 = vadd.f32 %v6250_v40, %v7404_v43  ;;  %v473_v54 = vmin.f32 %v452_v44, 6.0 }
 0x134   :  { %522 = vmatprep.subr.bf16.mxu1 %v7196_v39  ;;  %814 = vmatprep.subr.bf16.mxu0 %v7196_v39  ;;  %v6252_v24 = vpop.f32.mrf.mxu0 }
 0x135   :  { %v6253_v28 = vadd.f32 %v6252_v24, %v6251_v20  ;;  %v453_v51 = vmax.f32 %v424_v47, 0.0  ;;  %v6820_v20 = vld [vmem:[%s9033_s4 + $0x18] sm:$0xff]   ;;  %v6827_v24 = vld [vmem:[%s9033_s4 + $0x30] sm:$0xff]  }
 0x136   :  { %v6254_v29 = vpop.f32.mrf.mxu0 }
 0x137   :  { %523 = vmatpush1.bf16.msra.mxu1 %v7455_v27  ;;  %815 = vmatpush1.bf16.msra.mxu0 %v7455_v27  ;;  %v429_v34 = vadd.f32 %v6253_v28, %v7404_v43  ;;  %v474_v55 = vmin.f32 %v453_v51, 6.0  ;;  %v471_v43 = vmin.f32 %v450_v52, 6.0 }
 0x138   :  { %524 = vmatprep.subr.bf16.mxu1 %v7196_v39  ;;  %816 = vmatprep.subr.bf16.mxu0 %v7196_v39  ;;  %v6255_v4 = vpop.f32.mrf.mxu0 }
 0x139   :  { %v454_v41 = vmax.f32 %v429_v34, 0.0  ;;  %v7497_v58 = vpack.c.bf16 %v474_v55, %v473_v54  ;;  %v7503_v59 = vpack.c.bf16 %v472_v57, %v471_v43 }
 0x13b   :  { %525 = vmatpush1.bf16.msra.mxu1 %v7461_v33  ;;  %817 = vmatpush1.bf16.msra.mxu0 %v7461_v33  ;;  %v475_v48 = vmin.f32 %v454_v41, 6.0 }
 0x13c   :  { %526 = vmatprep.subr.bf16.mxu1 %v7196_v39  ;;  %818 = vmatprep.subr.bf16.mxu0 %v7196_v39 }
 0x13d   :  { %v486_v50 = vpack.c.bf16 %v475_v48, %v475_v48 }
 0x13f   :  { %527 = vmatpush1.bf16.msra.mxu1 %v7468_v36  ;;  %819 = vmatpush1.bf16.msra.mxu0 %v7468_v36  ;;  %v7491_v56 = vsel %vm512_vm1, %v486_v50, 0 }
 0x140   :  { %528 = vmatprep.subr.bf16.mxu1 %v7196_v39  ;;  %820 = vmatprep.subr.bf16.mxu0 %v7196_v39 }
 0x143   :  { %529 = vmatpush1.bf16.msra.mxu1 %v7414_v9  ;;  %821 = vmatpush1.bf16.msra.mxu0 %v7414_v9 }
 0x144   :  { %530 = vmatprep.subr.bf16.mxu1 %v7196_v39  ;;  %822 = vmatprep.subr.bf16.mxu0 %v7196_v39 }
 0x147   :  { %531 = vmatpush1.bf16.msra.mxu1 %v7409_v61  ;;  %823 = vmatpush1.bf16.msra.mxu0 %v7409_v61 }
 0x148   :  { %542 = vmatprep.subr.bf16.mxu1 %v7196_v39  ;;  %834 = vmatprep.subr.bf16.mxu0 %v7196_v39 }
 0x14b   :  { %543 = vmatpush2.bf16.msra.mxu1 %v7491_v56  ;;  %835 = vmatpush2.bf16.msra.mxu0 %v7491_v56 }
 0x14c   :  { %544 = vmatprep.subr.bf16.mxu1 %v7196_v39  ;;  %836 = vmatprep.subr.bf16.mxu0 %v7196_v39 }
 0x14f   :  { %545 = vmatpush2.bf16.msra.mxu1 %v7497_v58  ;;  %837 = vmatpush2.bf16.msra.mxu0 %v7497_v58 }
 0x150   :  { %546 = vmatprep.subr.bf16.mxu1 %v7196_v39  ;;  %838 = vmatprep.subr.bf16.mxu0 %v7196_v39 }
 0x153   :  { %547 = vmatpush2.bf16.msra.mxu1 %v7503_v59  ;;  %839 = vmatpush2.bf16.msra.mxu0 %v7503_v59 }
 0x154   :  { %595 = vmatprep.subr.bf16.mxu1 %v7196_v39  ;;  %957 = vmatprep.subr.bf16.mxu0 %v7196_v39 }
 0x156   :  { %549 = vmatmul.mubr.bf16.vlgmr.msra.gmra.mxu1 %v6800_v62  ;;  %841 = vmatmul.mubr.bf16.vlgmr.msra.gmra.mxu0 %v6803_v63  ;;  %v6823_v62 = vld [vmem:[%s9033_s4] sm:$0xff]  }
 0x157   :  { %596 = vmatpush1.bf16.msra.mxu1 %v7431_v60  ;;  %958 = vmatpush1.bf16.msra.mxu0 %v7431_v60 }
 0x158   :  { %597 = vmatprep.subr.bf16.mxu1 %v7196_v39  ;;  %959 = vmatprep.subr.bf16.mxu0 %v7196_v39 }
 0x159   :  { %5608 = vmatprep.mubr.msk.bf16.mxu1 %vm505_vm0, %v5606_v2  ;;  %5638 = vmatprep.mubr.msk.bf16.mxu0 %vm505_vm0, %v5636_v3 }
 0x15b   :  { %598 = vmatpush1.bf16.msra.mxu1 %v7439_v14  ;;  %960 = vmatpush1.bf16.msra.mxu0 %v7439_v14 }
 0x15c   :  { %599 = vmatprep.subr.bf16.mxu1 %v7196_v39  ;;  %961 = vmatprep.subr.bf16.mxu0 %v7196_v39 }
 0x15e   :  { %557 = vmatmul.mubr.bf16.gmra.mxu1 %v5605_v6  ;;  %849 = vmatmul.mubr.bf16.gmra.mxu0 %v5635_v7  ;;  %v6824_v7 = vld [vmem:[%s9033_s4 + $0x28] sm:$0xff]  }
 0x15f   :  { %600 = vmatpush1.bf16.msra.mxu1 %v7447_v19  ;;  %962 = vmatpush1.bf16.msra.mxu0 %v7447_v19 }
 0x160   :  { %601 = vmatprep.subr.bf16.mxu1 %v7196_v39  ;;  %963 = vmatprep.subr.bf16.mxu0 %v7196_v39 }
 0x161   :  { %5616 = vmatprep.mubr.msk.bf16.mxu1 %vm505_vm0, %v6810_v12  ;;  %5654 = vmatprep.mubr.msk.bf16.mxu0 %vm505_vm0, %v6817_v13 }
 0x163   :  { %602 = vmatpush1.bf16.msra.mxu1 %v7455_v27  ;;  %964 = vmatpush1.bf16.msra.mxu0 %v7455_v27 }
 0x164   :  { %603 = vmatprep.subr.bf16.mxu1 %v7196_v39  ;;  %965 = vmatprep.subr.bf16.mxu0 %v7196_v39 }
 0x167   :  { %604 = vmatpush1.bf16.msra.mxu1 %v7461_v33  ;;  %966 = vmatpush1.bf16.msra.mxu0 %v7461_v33 }
 0x168   :  { %605 = vmatprep.subr.bf16.mxu1 %v7196_v39  ;;  %967 = vmatprep.subr.bf16.mxu0 %v7196_v39 }
 0x16b   :  { %606 = vmatpush1.bf16.msra.mxu1 %v7468_v36  ;;  %968 = vmatpush1.bf16.msra.mxu0 %v7468_v36 }
 0x16c   :  { %607 = vmatprep.subr.bf16.mxu1 %v7196_v39  ;;  %969 = vmatprep.subr.bf16.mxu0 %v7196_v39 }
 0x16f   :  { %608 = vmatpush1.bf16.msra.mxu1 %v7414_v9  ;;  %970 = vmatpush1.bf16.msra.mxu0 %v7414_v9 }
 0x170   :  { %609 = vmatprep.subr.bf16.mxu1 %v7196_v39  ;;  %971 = vmatprep.subr.bf16.mxu0 %v7196_v39 }
 0x173   :  { %610 = vmatpush1.bf16.msra.mxu1 %v7409_v61  ;;  %972 = vmatpush1.bf16.msra.mxu0 %v7409_v61 }
 0x174   :  { %621 = vmatprep.subr.bf16.mxu1 %v7196_v39  ;;  %983 = vmatprep.subr.bf16.mxu0 %v7196_v39 }
 0x177   :  { %622 = vmatpush2.bf16.msra.mxu1 %v7491_v56  ;;  %984 = vmatpush2.bf16.msra.mxu0 %v7491_v56 }
 0x178   :  { %623 = vmatprep.subr.bf16.mxu1 %v7196_v39  ;;  %985 = vmatprep.subr.bf16.mxu0 %v7196_v39 }
 0x17b   :  { %624 = vmatpush2.bf16.msra.mxu1 %v7497_v58  ;;  %986 = vmatpush2.bf16.msra.mxu0 %v7497_v58 }
 0x17c   :  { %625 = vmatprep.subr.bf16.mxu1 %v7196_v39  ;;  %987 = vmatprep.subr.bf16.mxu0 %v7196_v39 }
 0x17f   :  { %626 = vmatpush2.bf16.msra.mxu1 %v7503_v59  ;;  %988 = vmatpush2.bf16.msra.mxu0 %v7503_v59 }
 0x180   :  { %6437 = vmatprep.subr.bf16.mxu1 %v6820_v20  ;;  %6461 = vmatprep.subr.bf16.mxu0 %v6825_v23 }
 0x182   :  { %628 = vmatmul.mubr.bf16.vlgmr.msra.gmra.mxu1 %v6808_v15  ;;  %990 = vmatmul.mubr.bf16.vlgmr.msra.gmra.mxu0 %v6815_v16  ;;  %v6826_v15 = vld [vmem:[%s9033_s4 + $0x20] sm:$0xff]  }
 0x183   :  { %5617 = vmatprep.mubr.msk.bf16.mxu1 %vm505_vm0, %v5615_v5  ;;  %5655 = vmatprep.mubr.msk.bf16.mxu0 %vm505_vm0, %v5653_v8  ;;  %v6828_v5 = vld [vmem:[%s9031_s3 + $0x64] ss:$8 sps:$4 sm:$0xff]   ;;  %v5666_v8 = vld [vmem:[%s9031_s3 + $0x70] sm:$0xff] }
 0x184   :  { %6438 = vmatpush3.bf16.msra.mxu1 %v6820_v20  ;;  %6462 = vmatpush3.bf16.msra.mxu0 %v6825_v23  ;;  %v5669_v20 = vcombine.low %v5666_v8, %v5666_v8  ;;  %v6833_v23 = vld [vmem:[%s9031_s3 + $0x78] ss:$8 sps:$4 sm:$0xff]  }
 0x185   :  { %6439 = vmatprep.subr.bf16.mxu1 %v6821_v21  ;;  %6463 = vmatprep.subr.bf16.mxu0 %v6827_v24 }
 0x188   :  { %6440 = vmatpush3.bf16.msra.mxu1 %v6821_v21  ;;  %6464 = vmatpush3.bf16.msra.mxu0 %v6827_v24  ;;  %v6835_v21 = vld [vmem:[%s9031_s3 + $0x7c] ss:$8 sps:$4 sm:$0xff]  }
 0x189   :  { %6445 = vmatprep.subr.bf16.mxu1 %v6822_v22 }
 0x18a   :  { %636 = vmatmul.mubr.bf16.gmra.mxu1 %v5614_v17  ;;  %998 = vmatmul.mubr.bf16.gmra.mxu0 %v5652_v18  ;;  %v6830_v17 = vld [vmem:[%s9031_s3 + $0x60] ss:$8 sps:$4 sm:$0xff]   ;;  %v5670_v18 = vcombine.high %v5666_v8, %v5666_v8 }
 0x216   :  { %v550_v25 = vpop.f32.mrf.mxu1  ;;  %v842_v26 = vpop.f32.mrf.mxu0 }
 0x218   :  { %v552_v28 = vpop.f32.mrf.mxu1  ;;  %v844_v29 = vpop.f32.mrf.mxu0 }
 0x219   :  { %v6839_v28 = vld [vmem:[%s9033_s4 + $0x40] sm:$0xff]   ;;  %v6840_v29 = vld [vmem:[%s9033_s4 + $0x58] sm:$0xff]  }
 0x21a   :  { %v553_v30 = vpop.f32.mrf.mxu1  ;;  %v845_v31 = vpop.f32.mrf.mxu0 }
 0x21b   :  { %v564_v0 = vpack.c.bf16 %v553_v30, %v550_v25  ;;  %v856_v10 = vpack.c.bf16 %v845_v31, %v842_v26  ;;  %v6838_v26 = vld [vmem:[%s9033_s4 + $0x48] sm:$0xff]  }
 0x21c   :  { %v555_v4 = vpop.f32.mrf.mxu1  ;;  %v847_v32 = vpop.f32.mrf.mxu0  ;;  %6469 = vmatprep.subr.bf16.mxu0 %v6838_v26 }
 0x21e   :  { %v558_v34 = vpop.f32.mrf.mxu1  ;;  %v850_v35 = vpop.f32.mrf.mxu0 }
 0x21f   :  { %v565_v11 = vpack.c.bf16 %v558_v34, %v558_v34  ;;  %v857_v16 = vpack.c.bf16 %v850_v35, %v850_v35 }
 0x220   :  { %v560_v38 = vpop.f32.mrf.mxu1  ;;  %v852_v40 = vpop.f32.mrf.mxu0 }
 0x222   :  { %v561_v41 = vpop.f32.mrf.mxu1  ;;  %v853_v42 = vpop.f32.mrf.mxu0 }
 0x224   :  { %v562_v45 = vpop.f32.mrf.mxu1  ;;  %v854_v46 = vpop.f32.mrf.mxu0 }
 0x242   :  { %v629_v47 = vpop.f32.mrf.mxu1  ;;  %v991_v48 = vpop.f32.mrf.mxu0 }
 0x244   :  { %v631_v49 = vpop.f32.mrf.mxu1  ;;  %v993_v37 = vpop.f32.mrf.mxu0 }
 0x246   :  { %v632_v44 = vpop.f32.mrf.mxu1  ;;  %v994_v51 = vpop.f32.mrf.mxu0 }
 0x247   :  { %v643_v50 = vpack.c.bf16 %v632_v44, %v629_v47  ;;  %v1005_v52 = vpack.c.bf16 %v994_v51, %v991_v48 }
 0x248   :  { %v634_v53 = vpop.f32.mrf.mxu1  ;;  %v996_v54 = vpop.f32.mrf.mxu0 }
 0x249   :  { %6441 = vmatprep.mubr.msk.bf16.mxu1 %vm662_vm2, %v643_v50  ;;  %6465 = vmatprep.mubr.msk.bf16.mxu0 %vm662_vm2, %v1005_v52 }
 0x24a   :  { %v637_v55 = vpop.f32.mrf.mxu1  ;;  %v999_v43 = vpop.f32.mrf.mxu0 }
 0x24b   :  { %v644_v57 = vpack.c.bf16 %v637_v55, %v637_v55  ;;  %v1006_v63 = vpack.c.bf16 %v999_v43, %v999_v43 }
 0x24c   :  { %v639_v1 = vpop.f32.mrf.mxu1  ;;  %v1001_v2 = vpop.f32.mrf.mxu0 }
 0x24d   :  { %6442 = vmatmul.mubr.msk.bf16.vlgmr.msra.gmra.mxu1 %vm662_vm2, %v644_v57  ;;  %6466 = vmatmul.mubr.msk.bf16.vlgmr.msra.gmra.mxu0 %vm662_vm2, %v1006_v63  ;;  %v6841_v1 = vld [vmem:[%s9033_s4 + $0x50] sm:$0xff]  }
 0x24e   :  { %6446 = vmatpush3.bf16.msra.mxu1 %v6822_v22  ;;  %v640_v3 = vpop.f32.mrf.mxu1  ;;  %6449 = vmatprep.mubr.msk.bf16.mxu1 %vm662_vm2, %v564_v0  ;;  %v1002_v6 = vpop.f32.mrf.mxu0  ;;  %v5683_v22 = vld [vmem:[%s9031_s3 + $0x88] sm:$0xff] }
 0x24f   :  { %6447 = vmatprep.subr.bf16.mxu1 %v6823_v62  ;;  %v5687_v24 = vcombine.high %v5683_v22, %v5683_v22  ;;  %v5686_v25 = vcombine.low %v5683_v22, %v5683_v22  ;;  %6470 = vmatpush3.bf16.msra.mxu0 %v6838_v26  ;;  %v6847_v26 = vld [vmem:[%s9031_s3 + $0xa8] ss:$8 sps:$4 sm:$0xff]  }
 0x250   :  { %v641_v12 = vpop.f32.mrf.mxu1  ;;  %v1003_v13 = vpop.f32.mrf.mxu0  ;;  %6471 = vmatprep.subr.bf16.mxu0 %v6839_v28 }
 0x252   :  { %6448 = vmatpush3.bf16.msra.mxu1 %v6823_v62 }
 0x253   :  { %6453 = vmatprep.subr.bf16.mxu1 %v6824_v7  ;;  %6472 = vmatpush3.bf16.msra.mxu0 %v6839_v28 }
 0x254   :  { %6477 = vmatprep.subr.bf16.mxu0 %v6840_v29 }
 0x255   :  { %6450 = vmatmul.mubr.msk.bf16.vlgmr.msra.gmra.mxu1 %vm662_vm2, %v565_v11 }
 0x256   :  { %6454 = vmatpush3.bf16.msra.mxu1 %v6824_v7  ;;  %6457 = vmatprep.mubr.msk.bf16.mxu1 %vm662_vm2, %v856_v10 }
 0x257   :  { %6455 = vmatprep.subr.bf16.mxu1 %v6826_v15 }
 0x25a   :  { %6456 = vmatpush3.bf16.msra.mxu1 %v6826_v15 }
 0x25b   :  { %1106 = vmatprep.subr.bf16.mxu1 %v7196_v39 }
 0x25d   :  { %6458 = vmatmul.mubr.msk.bf16.vlgmr.msra.gmra.mxu1 %vm662_vm2, %v857_v16  ;;  %v6842_v16 = vld [vmem:[%s9031_s3 + $0x94] ss:$8 sps:$4 sm:$0xff]  }
 0x25e   :  { %1107 = vmatpush1.bf16.msra.mxu1 %v7431_v60  ;;  %5671 = vmatprep.mubr.msk.bf16.mxu1 %vm505_vm0, %v6828_v5 }
 0x25f   :  { %1108 = vmatprep.subr.bf16.mxu1 %v7196_v39 }
 0x262   :  { %1109 = vmatpush1.bf16.msra.mxu1 %v7439_v14 }
 0x263   :  { %1110 = vmatprep.subr.bf16.mxu1 %v7196_v39 }
 0x266   :  { %1111 = vmatpush1.bf16.msra.mxu1 %v7447_v19 }
 0x267   :  { %1112 = vmatprep.subr.bf16.mxu1 %v7196_v39 }
 0x26a   :  { %1113 = vmatpush1.bf16.msra.mxu1 %v7455_v27 }
 0x26b   :  { %1114 = vmatprep.subr.bf16.mxu1 %v7196_v39 }
 0x26e   :  { %1115 = vmatpush1.bf16.msra.mxu1 %v7461_v33 }
 0x26f   :  { %1116 = vmatprep.subr.bf16.mxu1 %v7196_v39 }
 0x272   :  { %1117 = vmatpush1.bf16.msra.mxu1 %v7468_v36 }
 0x273   :  { %1118 = vmatprep.subr.bf16.mxu1 %v7196_v39 }
 0x276   :  { %1119 = vmatpush1.bf16.msra.mxu1 %v7414_v9 }
 0x277   :  { %1120 = vmatprep.subr.bf16.mxu1 %v7196_v39 }
 0x27a   :  { %1121 = vmatpush1.bf16.msra.mxu1 %v7409_v61 }
 0x27b   :  { %1132 = vmatprep.subr.bf16.mxu1 %v7196_v39 }
 0x27e   :  { %1133 = vmatpush2.bf16.msra.mxu1 %v7491_v56 }
 0x27f   :  { %1134 = vmatprep.subr.bf16.mxu1 %v7196_v39 }
 0x282   :  { %1135 = vmatpush2.bf16.msra.mxu1 %v7497_v58 }
 0x283   :  { %1136 = vmatprep.subr.bf16.mxu1 %v7196_v39 }
 0x286   :  { %1137 = vmatpush2.bf16.msra.mxu1 %v7503_v59 }
 0x287   :  { %1255 = vmatprep.subr.bf16.mxu1 %v7196_v39 }
 0x289   :  { %1139 = vmatmul.mubr.bf16.vlgmr.msra.gmra.mxu1 %v6830_v17 }
 0x28a   :  { %1256 = vmatpush1.bf16.msra.mxu1 %v7431_v60  ;;  %5672 = vmatprep.mubr.msk.bf16.mxu1 %vm505_vm0, %v5670_v18 }
 0x28b   :  { %1257 = vmatprep.subr.bf16.mxu1 %v7196_v39 }
 0x28e   :  { %1258 = vmatpush1.bf16.msra.mxu1 %v7439_v14 }
 0x28f   :  { %1259 = vmatprep.subr.bf16.mxu1 %v7196_v39 }
 0x291   :  { %1147 = vmatmul.mubr.bf16.gmra.mxu1 %v5669_v20  ;;  %v5700_v20 = vld [vmem:[%s9031_s3 + $0xa0] sm:$0xff] }
 0x292   :  { %1260 = vmatpush1.bf16.msra.mxu1 %v7447_v19  ;;  %5688 = vmatprep.mubr.msk.bf16.mxu1 %vm505_vm0, %v6835_v21  ;;  %v6844_v21 = vld [vmem:[%s9031_s3 + $0x90] ss:$8 sps:$4 sm:$0xff]   ;;  %v5704_v22 = vcombine.high %v5700_v20, %v5700_v20 }
 0x293   :  { %1261 = vmatprep.subr.bf16.mxu1 %v7196_v39 }
 0x296   :  { %1262 = vmatpush1.bf16.msra.mxu1 %v7455_v27 }
 0x297   :  { %1263 = vmatprep.subr.bf16.mxu1 %v7196_v39 }
 0x29a   :  { %1264 = vmatpush1.bf16.msra.mxu1 %v7461_v33 }
 0x29b   :  { %1265 = vmatprep.subr.bf16.mxu1 %v7196_v39 }
 0x29e   :  { %1266 = vmatpush1.bf16.msra.mxu1 %v7468_v36 }
 0x29f   :  { %1267 = vmatprep.subr.bf16.mxu1 %v7196_v39 }
 0x2a2   :  { %1268 = vmatpush1.bf16.msra.mxu1 %v7414_v9 }
 0x2a3   :  { %1269 = vmatprep.subr.bf16.mxu1 %v7196_v39 }
 0x2a6   :  { %1270 = vmatpush1.bf16.msra.mxu1 %v7409_v61 }
 0x2a7   :  { %1281 = vmatprep.subr.bf16.mxu1 %v7196_v39 }
 0x2aa   :  { %1282 = vmatpush2.bf16.msra.mxu1 %v7491_v56 }
 0x2ab   :  { %1283 = vmatprep.subr.bf16.mxu1 %v7196_v39 }
 0x2ae   :  { %1284 = vmatpush2.bf16.msra.mxu1 %v7497_v58 }
 0x2af   :  { %1285 = vmatprep.subr.bf16.mxu1 %v7196_v39 }
 0x2b2   :  { %1286 = vmatpush2.bf16.msra.mxu1 %v7503_v59 }
 0x2b5   :  { %1288 = vmatmul.mubr.bf16.vlgmr.msra.gmra.mxu1 %v6833_v23  ;;  %v5703_v23 = vcombine.low %v5700_v20, %v5700_v20 }
 0x2b6   :  { %5689 = vmatprep.mubr.msk.bf16.mxu1 %vm505_vm0, %v5687_v24  ;;  %v6849_v24 = vld [vmem:[%s9031_s3 + $0xac] ss:$8 sps:$4 sm:$0xff]  }
 0x2bd   :  { %1296 = vmatmul.mubr.bf16.gmra.mxu1 %v5686_v25  ;;  %v5717_v25 = vld [vmem:[%s9031_s3 + $0xb8] sm:$0xff] }
 0x2be   :  { %v5721_v28 = vcombine.high %v5717_v25, %v5717_v25 }
 0x30d   :  { %v6443_v30 = vpop.f32.mrf.mxu1  ;;  %v6467_v31 = vpop.f32.mrf.mxu0 }
 0x30f   :  { %v703_v4 = vpop.f32.mrf.mxu1  ;;  %v1064_v32 = vpop.f32.mrf.mxu0 }
 0x311   :  { %v6444_v34 = vpop.f32.mrf.mxu1  ;;  %v6468_v35 = vpop.f32.mrf.mxu0 }
 0x313   :  { %v7694_v38 = vpop.f32.mrf.mxu1 }
 0x315   :  { %v6451_v40 = vpop.f32.mrf.mxu1 }
 0x316   :  { %v778_v41 = vadd.f32 %v6451_v40, %v6443_v30  ;;  %v6852_v30 = vld [vmem:[%s9033_s4 + $0x68] sm:$0xff]  }
 0x317   :  { %v769_v42 = vpop.f32.mrf.mxu1  ;;  %6485 = vmatprep.subr.bf16.mxu1 %v6852_v30 }
 0x318   :  { %v770_v45 = vadd.f32 %v769_v42, %v703_v4  ;;  %6486 = vmatpush3.bf16.msra.mxu1 %v6852_v30  ;;  %v7783_v4 = vpop.f32.mrf.mxu0  ;;  %v6854_v42 = vld [vmem:[%s9033_s4 + $0x78] sm:$0xff]  }
 0x319   :  { %v6452_v46 = vpop.f32.mrf.mxu1 }
 0x31b   :  { %v7696_v47 = vpop.f32.mrf.mxu1 }
 0x31d   :  { %v6459_v48 = vpop.f32.mrf.mxu1 }
 0x31e   :  { %v931_v49 = vadd.f32 %v6459_v48, %v778_v41 }
 0x31f   :  { %v915_v37 = vpop.f32.mrf.mxu1 }
 0x320   :  { %v929_v44 = vadd.f32 %v915_v37, %v770_v45  ;;  %v7698_v51 = vadd.f32 %v6467_v31, %v931_v49  ;;  %v6853_v31 = vld [vmem:[%s9033_s4 + $0x60] sm:$0xff]  }
 0x321   :  { %v6460_v50 = vpop.f32.mrf.mxu1  ;;  %6487 = vmatprep.subr.bf16.mxu1 %v6853_v31 }
 0x322   :  { %v7700_v52 = vadd.f32 %v1064_v32, %v929_v44  ;;  %6488 = vmatpush3.bf16.msra.mxu1 %v6853_v31 }
 0x323   :  { %v7702_v53 = vpop.f32.mrf.mxu1  ;;  %6493 = vmatprep.subr.bf16.mxu1 %v6854_v42 }
 0x349   :  { %v1140_v54 = vpop.f32.mrf.mxu1 }
 0x34b   :  { %v1142_v55 = vpop.f32.mrf.mxu1 }
 0x34d   :  { %v1143_v43 = vpop.f32.mrf.mxu1 }
 0x34e   :  { %v1154_v57 = vpack.c.bf16 %v1143_v43, %v1140_v54 }
 0x34f   :  { %v1145_v62 = vpop.f32.mrf.mxu1 }
 0x350   :  { %6473 = vmatprep.mubr.msk.bf16.mxu0 %vm662_vm2, %v1154_v57 }
 0x351   :  { %v1148_v63 = vpop.f32.mrf.mxu1 }
 0x352   :  { %v1155_v0 = vpack.c.bf16 %v1148_v63, %v1148_v63  ;;  %v6855_v63 = vld [vmem:[%s9033_s4 + $0x70] sm:$0xff]  }
 0x353   :  { %v1150_v2 = vpop.f32.mrf.mxu1 }
 0x354   :  { %6474 = vmatmul.mubr.msk.bf16.vlgmr.msra.gmra.mxu0 %vm662_vm2, %v1155_v0 }
 0x355   :  { %v1151_v3 = vpop.f32.mrf.mxu1  ;;  %6478 = vmatpush3.bf16.msra.mxu0 %v6840_v29  ;;  %v5720_v29 = vcombine.low %v5717_v25, %v5717_v25 }
 0x356   :  { %6479 = vmatprep.subr.bf16.mxu0 %v6841_v1 }
 0x357   :  { %v1152_v6 = vpop.f32.mrf.mxu1 }
 0x359   :  { %6480 = vmatpush3.bf16.msra.mxu0 %v6841_v1 }
 0x35a   :  { %1404 = vmatprep.subr.bf16.mxu0 %v7196_v39 }
 0x375   :  { %v1289_v7 = vpop.f32.mrf.mxu1 }
 0x377   :  { %v1291_v12 = vpop.f32.mrf.mxu1 }
 0x379   :  { %v1292_v13 = vpop.f32.mrf.mxu1 }
 0x37a   :  { %v1303_v10 = vpack.c.bf16 %v1292_v13, %v1289_v7 }
 0x37b   :  { %v1294_v11 = vpop.f32.mrf.mxu1 }
 0x37c   :  { %6481 = vmatprep.mubr.msk.bf16.mxu0 %vm662_vm2, %v1303_v10  ;;  %v6856_v11 = vld [vmem:[%s9031_s3 + $0xc4] ss:$8 sps:$4 sm:$0xff]  }
 0x37d   :  { %v1297_v15 = vpop.f32.mrf.mxu1 }
 0x37e   :  { %v1304_v5 = vpack.c.bf16 %v1297_v15, %v1297_v15 }
 0x37f   :  { %v1299_v8 = vpop.f32.mrf.mxu1 }
 0x380   :  { %6482 = vmatmul.mubr.msk.bf16.vlgmr.msra.gmra.mxu0 %vm662_vm2, %v1304_v5 }
 0x381   :  { %1405 = vmatpush1.bf16.msra.mxu0 %v7431_v60  ;;  %v1300_v17 = vpop.f32.mrf.mxu1  ;;  %5705 = vmatprep.mubr.msk.bf16.mxu0 %vm505_vm0, %v6842_v16 }
 0x382   :  { %1406 = vmatprep.subr.bf16.mxu0 %v7196_v39  ;;  %v5734_v17 = vld [vmem:[%s9031_s3 + $0xd0] sm:$0xff] }
 0x383   :  { %v1301_v18 = vpop.f32.mrf.mxu1  ;;  %v5738_v20 = vcombine.high %v5734_v17, %v5734_v17 }
 0x384   :  { %v6858_v18 = vld [vmem:[%s9031_s3 + $0xc0] ss:$8 sps:$4 sm:$0xff]  }
 0x385   :  { %1407 = vmatpush1.bf16.msra.mxu0 %v7439_v14 }
 0x386   :  { %1408 = vmatprep.subr.bf16.mxu0 %v7196_v39 }
 0x389   :  { %1409 = vmatpush1.bf16.msra.mxu0 %v7447_v19 }
 0x38a   :  { %1410 = vmatprep.subr.bf16.mxu0 %v7196_v39 }
 0x38d   :  { %1411 = vmatpush1.bf16.msra.mxu0 %v7455_v27 }
 0x38e   :  { %1412 = vmatprep.subr.bf16.mxu0 %v7196_v39 }
 0x391   :  { %1413 = vmatpush1.bf16.msra.mxu0 %v7461_v33 }
 0x392   :  { %1414 = vmatprep.subr.bf16.mxu0 %v7196_v39 }
 0x395   :  { %1415 = vmatpush1.bf16.msra.mxu0 %v7468_v36 }
 0x396   :  { %1416 = vmatprep.subr.bf16.mxu0 %v7196_v39 }
 0x399   :  { %1417 = vmatpush1.bf16.msra.mxu0 %v7414_v9 }
 0x39a   :  { %1418 = vmatprep.subr.bf16.mxu0 %v7196_v39 }
 0x39d   :  { %1419 = vmatpush1.bf16.msra.mxu0 %v7409_v61 }
 0x39e   :  { %1430 = vmatprep.subr.bf16.mxu0 %v7196_v39 }
 0x3a1   :  { %1431 = vmatpush2.bf16.msra.mxu0 %v7491_v56 }
 0x3a2   :  { %1432 = vmatprep.subr.bf16.mxu0 %v7196_v39 }
 0x3a5   :  { %1433 = vmatpush2.bf16.msra.mxu0 %v7497_v58 }
 0x3a6   :  { %1434 = vmatprep.subr.bf16.mxu0 %v7196_v39 }
 0x3a9   :  { %1435 = vmatpush2.bf16.msra.mxu0 %v7503_v59 }
 0x3aa   :  { %1553 = vmatprep.subr.bf16.mxu0 %v7196_v39 }
 0x3ac   :  { %1437 = vmatmul.mubr.bf16.vlgmr.msra.gmra.mxu0 %v6844_v21  ;;  %v5737_v21 = vcombine.low %v5734_v17, %v5734_v17 }
 0x3ad   :  { %1554 = vmatpush1.bf16.msra.mxu0 %v7431_v60  ;;  %5706 = vmatprep.mubr.msk.bf16.mxu0 %vm505_vm0, %v5704_v22  ;;  %v6863_v22 = vld [vmem:[%s9031_s3 + $0xdc] ss:$8 sps:$4 sm:$0xff]  }
 0x3ae   :  { %1555 = vmatprep.subr.bf16.mxu0 %v7196_v39 }
 0x3b1   :  { %1556 = vmatpush1.bf16.msra.mxu0 %v7439_v14 }
 0x3b2   :  { %1557 = vmatprep.subr.bf16.mxu0 %v7196_v39 }
 0x3b4   :  { %1445 = vmatmul.mubr.bf16.gmra.mxu0 %v5703_v23  ;;  %v5751_v23 = vld [vmem:[%s9031_s3 + $0xe8] sm:$0xff] }
 0x3b5   :  { %1558 = vmatpush1.bf16.msra.mxu0 %v7447_v19  ;;  %5722 = vmatprep.mubr.msk.bf16.mxu0 %vm505_vm0, %v6849_v24  ;;  %v6861_v24 = vld [vmem:[%s9031_s3 + $0xd8] ss:$8 sps:$4 sm:$0xff]   ;;  %v5755_v25 = vcombine.high %v5751_v23, %v5751_v23 }
 0x3b6   :  { %1559 = vmatprep.subr.bf16.mxu0 %v7196_v39 }
 0x3b9   :  { %1560 = vmatpush1.bf16.msra.mxu0 %v7455_v27 }
 0x3ba   :  { %1561 = vmatprep.subr.bf16.mxu0 %v7196_v39 }
 0x3bd   :  { %1562 = vmatpush1.bf16.msra.mxu0 %v7461_v33 }
 0x3be   :  { %1563 = vmatprep.subr.bf16.mxu0 %v7196_v39 }
 0x3c1   :  { %1564 = vmatpush1.bf16.msra.mxu0 %v7468_v36 }
 0x3c2   :  { %1565 = vmatprep.subr.bf16.mxu0 %v7196_v39 }
 0x3c5   :  { %1566 = vmatpush1.bf16.msra.mxu0 %v7414_v9 }
 0x3c6   :  { %1567 = vmatprep.subr.bf16.mxu0 %v7196_v39 }
 0x3c9   :  { %1568 = vmatpush1.bf16.msra.mxu0 %v7409_v61 }
 0x3ca   :  { %1579 = vmatprep.subr.bf16.mxu0 %v7196_v39 }
 0x3cd   :  { %1580 = vmatpush2.bf16.msra.mxu0 %v7491_v56 }
 0x3ce   :  { %1581 = vmatprep.subr.bf16.mxu0 %v7196_v39 }
 0x3d1   :  { %1582 = vmatpush2.bf16.msra.mxu0 %v7497_v58 }
 0x3d2   :  { %1583 = vmatprep.subr.bf16.mxu0 %v7196_v39 }
 0x3d5   :  { %1584 = vmatpush2.bf16.msra.mxu0 %v7503_v59 }
 0x3d8   :  { %1586 = vmatmul.mubr.bf16.vlgmr.msra.gmra.mxu0 %v6847_v26  ;;  %v5754_v26 = vcombine.low %v5751_v23, %v5751_v23  ;;  %v6877_v23 = vld [vmem:[%s9031_s3 + $0x10c] ss:$8 sps:$4 sm:$0xff]  }
 0x3d9   :  { %5723 = vmatprep.mubr.msk.bf16.mxu0 %vm505_vm0, %v5721_v28  ;;  %v6866_v28 = vld [vmem:[%s9033_s4 + $0x88] sm:$0xff]  }
 0x3da   :  { %6501 = vmatprep.subr.bf16.mxu0 %v6866_v28 }
 0x3db   :  { %6502 = vmatpush3.bf16.msra.mxu0 %v6866_v28 }
 0x3e0   :  { %1594 = vmatmul.mubr.bf16.gmra.mxu0 %v5720_v29  ;;  %v6867_v29 = vld [vmem:[%s9033_s4 + $0x80] sm:$0xff]  }
 0x3e1   :  { %6503 = vmatprep.subr.bf16.mxu0 %v6867_v29 }
 0x3e2   :  { %6504 = vmatpush3.bf16.msra.mxu0 %v6867_v29  ;;  %v6880_v29 = vld [vmem:[%s9033_s4 + $0xa8] sm:$0xff]  }
 0x414   :  { %v6475_v32 = vpop.f32.mrf.mxu0 }
 0x415   :  { %v1229_v34 = vadd.f32 %v6475_v32, %v7698_v51 }
 0x416   :  { %v1213_v35 = vpop.f32.mrf.mxu0 }
 0x417   :  { %v1227_v40 = vadd.f32 %v1213_v35, %v7700_v52 }
 0x418   :  { %v6476_v41 = vpop.f32.mrf.mxu0 }
 0x419   :  { %v773_v41 = vadd.f32 %v7696_v47, %v7694_v38 }
 0x41a   :  { %v7790_v45 = vpop.f32.mrf.mxu0 }
 0x440   :  { %v6483_v46 = vpop.f32.mrf.mxu0 }
 0x441   :  { %v7792_v48 = vadd.f32 %v6483_v46, %v1229_v34 }
 0x442   :  { %v1362_v49 = vpop.f32.mrf.mxu0 }
 0x443   :  { %v7794_v37 = vadd.f32 %v1362_v49, %v1227_v40  ;;  %v6868_v40 = vld [vmem:[%s9033_s4 + $0x98] sm:$0xff]  }
 0x444   :  { %v6484_v44 = vpop.f32.mrf.mxu0  ;;  %6509 = vmatprep.subr.bf16.mxu0 %v6868_v40 }
 0x446   :  { %v7796_v50 = vpop.f32.mrf.mxu0 }
 0x46c   :  { %v1438_v51 = vpop.f32.mrf.mxu0 }
 0x46e   :  { %v1440_v54 = vpop.f32.mrf.mxu0 }
 0x470   :  { %v1441_v52 = vpop.f32.mrf.mxu0 }
 0x471   :  { %v1452_v55 = vpack.c.bf16 %v1441_v52, %v1438_v51 }
 0x472   :  { %v1443_v43 = vpop.f32.mrf.mxu0 }
 0x473   :  { %6489 = vmatprep.mubr.msk.bf16.mxu1 %vm662_vm2, %v1452_v55 }
 0x474   :  { %v1446_v57 = vpop.f32.mrf.mxu0 }
 0x475   :  { %v1453_v62 = vpack.c.bf16 %v1446_v57, %v1446_v57 }
 0x476   :  { %v1448_v0 = vpop.f32.mrf.mxu0 }
 0x477   :  { %6490 = vmatmul.mubr.msk.bf16.vlgmr.msra.gmra.mxu1 %vm662_vm2, %v1453_v62 }
 0x478   :  { %v1449_v1 = vpop.f32.mrf.mxu0  ;;  %6494 = vmatpush3.bf16.msra.mxu1 %v6854_v42  ;;  %v930_v42 = vadd.f32 %v7702_v53, %v773_v41  ;;  %v6882_v41 = vld [vmem:[%s9033_s4 + $0xb8] sm:$0xff]  }
 0x479   :  { %6495 = vmatprep.subr.bf16.mxu1 %v6855_v63 }
 0x47a   :  { %v1450_v2 = vpop.f32.mrf.mxu0  ;;  %v1079_v49 = vadd.f32 %v7783_v4, %v930_v42 }
 0x47c   :  { %6496 = vmatpush3.bf16.msra.mxu1 %v6855_v63 }
 0x47d   :  { %1702 = vmatprep.subr.bf16.mxu1 %v7196_v39 }
 0x498   :  { %v1587_v3 = vpop.f32.mrf.mxu0 }
 0x49a   :  { %v1589_v6 = vpop.f32.mrf.mxu0 }
 0x49c   :  { %v1590_v7 = vpop.f32.mrf.mxu0 }
 0x49d   :  { %v1601_v12 = vpack.c.bf16 %v1590_v7, %v1587_v3 }
 0x49e   :  { %v1592_v13 = vpop.f32.mrf.mxu0 }
 0x49f   :  { %6497 = vmatprep.mubr.msk.bf16.mxu1 %vm662_vm2, %v1601_v12 }
 0x4a0   :  { %v1595_v10 = vpop.f32.mrf.mxu0 }
 0x4a1   :  { %v1602_v15 = vpack.c.bf16 %v1595_v10, %v1595_v10 }
 0x4a2   :  { %v1597_v16 = vpop.f32.mrf.mxu0 }
 0x4a3   :  { %6498 = vmatmul.mubr.msk.bf16.vlgmr.msra.gmra.mxu1 %vm662_vm2, %v1602_v15  ;;  %v6870_v15 = vld [vmem:[%s9031_s3 + $0xf4] ss:$8 sps:$4 sm:$0xff]  }
 0x4a4   :  { %1703 = vmatpush1.bf16.msra.mxu1 %v7431_v60  ;;  %v1598_v5 = vpop.f32.mrf.mxu0  ;;  %5739 = vmatprep.mubr.msk.bf16.mxu1 %vm505_vm0, %v6856_v11 }
 0x4a5   :  { %1704 = vmatprep.subr.bf16.mxu1 %v7196_v39 }
 0x4a6   :  { %v1599_v8 = vpop.f32.mrf.mxu0 }
 0x4a8   :  { %1705 = vmatpush1.bf16.msra.mxu1 %v7439_v14 }
 0x4a9   :  { %1706 = vmatprep.subr.bf16.mxu1 %v7196_v39 }
 0x4ac   :  { %1707 = vmatpush1.bf16.msra.mxu1 %v7447_v19 }
 0x4ad   :  { %1708 = vmatprep.subr.bf16.mxu1 %v7196_v39 }
 0x4b0   :  { %1709 = vmatpush1.bf16.msra.mxu1 %v7455_v27 }
 0x4b1   :  { %1710 = vmatprep.subr.bf16.mxu1 %v7196_v39 }
 0x4b4   :  { %1711 = vmatpush1.bf16.msra.mxu1 %v7461_v33 }
 0x4b5   :  { %1712 = vmatprep.subr.bf16.mxu1 %v7196_v39 }
 0x4b8   :  { %1713 = vmatpush1.bf16.msra.mxu1 %v7468_v36 }
 0x4b9   :  { %1714 = vmatprep.subr.bf16.mxu1 %v7196_v39 }
 0x4bc   :  { %1715 = vmatpush1.bf16.msra.mxu1 %v7414_v9 }
 0x4bd   :  { %1716 = vmatprep.subr.bf16.mxu1 %v7196_v39 }
 0x4c0   :  { %1717 = vmatpush1.bf16.msra.mxu1 %v7409_v61 }
 0x4c1   :  { %1728 = vmatprep.subr.bf16.mxu1 %v7196_v39 }
 0x4c4   :  { %1729 = vmatpush2.bf16.msra.mxu1 %v7491_v56 }
 0x4c5   :  { %1730 = vmatprep.subr.bf16.mxu1 %v7196_v39 }
 0x4c8   :  { %1731 = vmatpush2.bf16.msra.mxu1 %v7497_v58 }
 0x4c9   :  { %1732 = vmatprep.subr.bf16.mxu1 %v7196_v39 }
 0x4cc   :  { %1733 = vmatpush2.bf16.msra.mxu1 %v7503_v59 }
 0x4cd   :  { %1851 = vmatprep.subr.bf16.mxu1 %v7196_v39 }
 0x4cf   :  { %1735 = vmatmul.mubr.bf16.vlgmr.msra.gmra.mxu1 %v6858_v18  ;;  %v5768_v18 = vld [vmem:[%s9031_s3 + $0x100] sm:$0xff] }
 0x4d0   :  { %1852 = vmatpush1.bf16.msra.mxu1 %v7431_v60  ;;  %5740 = vmatprep.mubr.msk.bf16.mxu1 %vm505_vm0, %v5738_v20  ;;  %v6872_v20 = vld [vmem:[%s9031_s3 + $0xf0] ss:$8 sps:$4 sm:$0xff]  }
 0x4d1   :  { %1853 = vmatprep.subr.bf16.mxu1 %v7196_v39 }
 0x4d4   :  { %1854 = vmatpush1.bf16.msra.mxu1 %v7439_v14 }
 0x4d5   :  { %1855 = vmatprep.subr.bf16.mxu1 %v7196_v39 }
 0x4d7   :  { %1743 = vmatmul.mubr.bf16.gmra.mxu1 %v5737_v21  ;;  %v5772_v21 = vcombine.high %v5768_v18, %v5768_v18 }
 0x4d8   :  { %1856 = vmatpush1.bf16.msra.mxu1 %v7447_v19  ;;  %5756 = vmatprep.mubr.msk.bf16.mxu1 %vm505_vm0, %v6863_v22  ;;  %v5771_v22 = vcombine.low %v5768_v18, %v5768_v18  ;;  %v6891_v18 = vld [vmem:[%s9031_s3 + $0x13c] ss:$8 sps:$4 sm:$0xff]  }
 0x4d9   :  { %1857 = vmatprep.subr.bf16.mxu1 %v7196_v39 }
 0x4dc   :  { %1858 = vmatpush1.bf16.msra.mxu1 %v7455_v27 }
 0x4dd   :  { %1859 = vmatprep.subr.bf16.mxu1 %v7196_v39 }
 0x4e0   :  { %1860 = vmatpush1.bf16.msra.mxu1 %v7461_v33 }
 0x4e1   :  { %1861 = vmatprep.subr.bf16.mxu1 %v7196_v39 }
 0x4e4   :  { %1862 = vmatpush1.bf16.msra.mxu1 %v7468_v36 }
 0x4e5   :  { %1863 = vmatprep.subr.bf16.mxu1 %v7196_v39 }
 0x4e8   :  { %1864 = vmatpush1.bf16.msra.mxu1 %v7414_v9 }
 0x4e9   :  { %1865 = vmatprep.subr.bf16.mxu1 %v7196_v39 }
 0x4ec   :  { %1866 = vmatpush1.bf16.msra.mxu1 %v7409_v61 }
 0x4ed   :  { %1877 = vmatprep.subr.bf16.mxu1 %v7196_v39 }
 0x4f0   :  { %1878 = vmatpush2.bf16.msra.mxu1 %v7491_v56 }
 0x4f1   :  { %1879 = vmatprep.subr.bf16.mxu1 %v7196_v39 }
 0x4f4   :  { %1880 = vmatpush2.bf16.msra.mxu1 %v7497_v58 }
 0x4f5   :  { %1881 = vmatprep.subr.bf16.mxu1 %v7196_v39 }
 0x4f8   :  { %1882 = vmatpush2.bf16.msra.mxu1 %v7503_v59 }
 0x4f9   :  { %6517 = vmatprep.subr.bf16.mxu1 %v6880_v29 }
 0x4fb   :  { %1884 = vmatmul.mubr.bf16.vlgmr.msra.gmra.mxu1 %v6861_v24  ;;  %v5785_v24 = vld [vmem:[%s9031_s3 + $0x118] sm:$0xff] }
 0x4fc   :  { %5757 = vmatprep.mubr.msk.bf16.mxu1 %vm505_vm0, %v5755_v25  ;;  %v6875_v25 = vld [vmem:[%s9031_s3 + $0x108] ss:$8 sps:$4 sm:$0xff]   ;;  %v5788_v28 = vcombine.low %v5785_v24, %v5785_v24  ;;  %6518 = vmatpush3.bf16.msra.mxu1 %v6880_v29 }
 0x503   :  { %1892 = vmatmul.mubr.bf16.gmra.mxu1 %v5754_v26  ;;  %v5789_v26 = vcombine.high %v5785_v24, %v5785_v24  ;;  %v6894_v24 = vld [vmem:[%s9033_s4 + $0xc8] sm:$0xff]  }
 0x537   :  { %v6491_v30 = vpop.f32.mrf.mxu1 }
 0x538   :  { %v1527_v31 = vadd.f32 %v6491_v30, %v7792_v48  ;;  %v1228_v48 = vadd.f32 %v7790_v45, %v1079_v49  ;;  %v6881_v30 = vld [vmem:[%s9033_s4 + $0xa0] sm:$0xff]  }
 0x539   :  { %v1511_v32 = vpop.f32.mrf.mxu1  ;;  %6519 = vmatprep.subr.bf16.mxu1 %v6881_v30 }
 0x53a   :  { %v1525_v34 = vadd.f32 %v1511_v32, %v7794_v37  ;;  %v1377_v54 = vadd.f32 %v7796_v50, %v1228_v48  ;;  %v6869_v50 = vld [vmem:[%s9033_s4 + $0x90] sm:$0xff]   ;;  %6520 = vmatpush3.bf16.msra.mxu1 %v6881_v30 }
 0x53b   :  { %v6492_v35 = vpop.f32.mrf.mxu1  ;;  %6525 = vmatprep.subr.bf16.mxu1 %v6882_v41 }
 0x53d   :  { %v1514_v46 = vpop.f32.mrf.mxu1 }
 0x53e   :  { %v1526_v43 = vadd.f32 %v1514_v46, %v1377_v54 }
 0x563   :  { %v6499_v44 = vpop.f32.mrf.mxu1 }
 0x564   :  { %v7887_v51 = vadd.f32 %v6499_v44, %v1527_v31 }
 0x565   :  { %v1660_v37 = vpop.f32.mrf.mxu1 }
 0x566   :  { %v7890_v52 = vadd.f32 %v1660_v37, %v1525_v34 }
 0x567   :  { %v6500_v55 = vpop.f32.mrf.mxu1 }
 0x569   :  { %v1663_v57 = vpop.f32.mrf.mxu1 }
 0x56a   :  { %v7892_v62 = vadd.f32 %v1663_v57, %v1526_v43 }
 0x58f   :  { %v1736_v38 = vpop.f32.mrf.mxu1 }
 0x591   :  { %v1738_v47 = vpop.f32.mrf.mxu1 }
 0x593   :  { %v1739_v53 = vpop.f32.mrf.mxu1 }
 0x594   :  { %v1750_v63 = vpack.c.bf16 %v1739_v53, %v1736_v38 }
 0x595   :  { %v1741_v4 = vpop.f32.mrf.mxu1 }
 0x596   :  { %6505 = vmatprep.mubr.msk.bf16.mxu0 %vm662_vm2, %v1750_v63 }
 0x597   :  { %v1744_v45 = vpop.f32.mrf.mxu1 }
 0x598   :  { %v1751_v0 = vpack.c.bf16 %v1744_v45, %v1744_v45 }
 0x599   :  { %v1746_v1 = vpop.f32.mrf.mxu1 }
 0x59a   :  { %6506 = vmatmul.mubr.msk.bf16.vlgmr.msra.gmra.mxu0 %vm662_vm2, %v1751_v0 }
 0x59b   :  { %v1747_v2 = vpop.f32.mrf.mxu1  ;;  %6510 = vmatpush3.bf16.msra.mxu0 %v6868_v40 }
 0x59c   :  { %6511 = vmatprep.subr.bf16.mxu0 %v6869_v50 }
 0x59d   :  { %v1748_v3 = vpop.f32.mrf.mxu1 }
 0x59f   :  { %6512 = vmatpush3.bf16.msra.mxu0 %v6869_v50 }
 0x5a0   :  { %2000 = vmatprep.subr.bf16.mxu0 %v7196_v39 }
 0x5bb   :  { %v1885_v6 = vpop.f32.mrf.mxu1 }
 0x5bd   :  { %v1887_v7 = vpop.f32.mrf.mxu1 }
 0x5bf   :  { %v1888_v12 = vpop.f32.mrf.mxu1 }
 0x5c0   :  { %v1899_v13 = vpack.c.bf16 %v1888_v12, %v1885_v6  ;;  %v6884_v12 = vld [vmem:[%s9031_s3 + $0x124] ss:$8 sps:$4 sm:$0xff]  }
 0x5c1   :  { %v1890_v10 = vpop.f32.mrf.mxu1 }
 0x5c2   :  { %6513 = vmatprep.mubr.msk.bf16.mxu0 %vm662_vm2, %v1899_v13 }
 0x5c3   :  { %v1893_v11 = vpop.f32.mrf.mxu1 }
 0x5c4   :  { %v1900_v16 = vpack.c.bf16 %v1893_v11, %v1893_v11 }
 0x5c5   :  { %v1895_v5 = vpop.f32.mrf.mxu1 }
 0x5c6   :  { %6514 = vmatmul.mubr.msk.bf16.vlgmr.msra.gmra.mxu0 %vm662_vm2, %v1900_v16  ;;  %v5802_v16 = vld [vmem:[%s9031_s3 + $0x130] sm:$0xff]  ;;  %v6886_v5 = vld [vmem:[%s9031_s3 + $0x120] ss:$8 sps:$4 sm:$0xff]  }
 0x5c7   :  { %2001 = vmatpush1.bf16.msra.mxu0 %v7431_v60  ;;  %v1896_v8 = vpop.f32.mrf.mxu1  ;;  %5773 = vmatprep.mubr.msk.bf16.mxu0 %vm505_vm0, %v6870_v15 }
 0x5c8   :  { %2002 = vmatprep.subr.bf16.mxu0 %v7196_v39  ;;  %v5806_v8 = vcombine.high %v5802_v16, %v5802_v16 }
 0x5c9   :  { %v1897_v17 = vpop.f32.mrf.mxu1 }
 0x5ca   :  { %v5805_v17 = vcombine.low %v5802_v16, %v5802_v16  ;;  %v6905_v16 = vld [vmem:[%s9031_s3 + $0x16c] ss:$8 sps:$4 sm:$0xff]  }
 0x5cb   :  { %2003 = vmatpush1.bf16.msra.mxu0 %v7439_v14 }
 0x5cc   :  { %2004 = vmatprep.subr.bf16.mxu0 %v7196_v39 }
 0x5cf   :  { %2005 = vmatpush1.bf16.msra.mxu0 %v7447_v19 }
 0x5d0   :  { %2006 = vmatprep.subr.bf16.mxu0 %v7196_v39 }
 0x5d3   :  { %2007 = vmatpush1.bf16.msra.mxu0 %v7455_v27 }
 0x5d4   :  { %2008 = vmatprep.subr.bf16.mxu0 %v7196_v39 }
 0x5d7   :  { %2009 = vmatpush1.bf16.msra.mxu0 %v7461_v33 }
 0x5d8   :  { %2010 = vmatprep.subr.bf16.mxu0 %v7196_v39 }
 0x5db   :  { %2011 = vmatpush1.bf16.msra.mxu0 %v7468_v36 }
 0x5dc   :  { %2012 = vmatprep.subr.bf16.mxu0 %v7196_v39 }
 0x5df   :  { %2013 = vmatpush1.bf16.msra.mxu0 %v7414_v9 }
 0x5e0   :  { %2014 = vmatprep.subr.bf16.mxu0 %v7196_v39 }
 0x5e3   :  { %2015 = vmatpush1.bf16.msra.mxu0 %v7409_v61 }
 0x5e4   :  { %2026 = vmatprep.subr.bf16.mxu0 %v7196_v39 }
 0x5e7   :  { %2027 = vmatpush2.bf16.msra.mxu0 %v7491_v56 }
 0x5e8   :  { %2028 = vmatprep.subr.bf16.mxu0 %v7196_v39 }
 0x5eb   :  { %2029 = vmatpush2.bf16.msra.mxu0 %v7497_v58 }
 0x5ec   :  { %2030 = vmatprep.subr.bf16.mxu0 %v7196_v39 }
 0x5ef   :  { %2031 = vmatpush2.bf16.msra.mxu0 %v7503_v59 }
 0x5f0   :  { %2149 = vmatprep.subr.bf16.mxu0 %v7196_v39 }
 0x5f2   :  { %2033 = vmatmul.mubr.bf16.vlgmr.msra.gmra.mxu0 %v6872_v20  ;;  %v5819_v20 = vld [vmem:[%s9031_s3 + $0x148] sm:$0xff] }
 0x5f3   :  { %2150 = vmatpush1.bf16.msra.mxu0 %v7431_v60  ;;  %5774 = vmatprep.mubr.msk.bf16.mxu0 %vm505_vm0, %v5772_v21  ;;  %v6889_v21 = vld [vmem:[%s9031_s3 + $0x138] ss:$8 sps:$4 sm:$0xff]  }
 0x5f4   :  { %2151 = vmatprep.subr.bf16.mxu0 %v7196_v39 }
 0x5f7   :  { %2152 = vmatpush1.bf16.msra.mxu0 %v7439_v14 }
 0x5f8   :  { %2153 = vmatprep.subr.bf16.mxu0 %v7196_v39 }
 0x5fa   :  { %2041 = vmatmul.mubr.bf16.gmra.mxu0 %v5771_v22  ;;  %v5823_v22 = vcombine.high %v5819_v20, %v5819_v20 }
 0x5fb   :  { %2154 = vmatpush1.bf16.msra.mxu0 %v7447_v19  ;;  %5790 = vmatprep.mubr.msk.bf16.mxu0 %vm505_vm0, %v6877_v23  ;;  %v5822_v23 = vcombine.low %v5819_v20, %v5819_v20 }
 0x5fc   :  { %2155 = vmatprep.subr.bf16.mxu0 %v7196_v39 }
 0x5ff   :  { %2156 = vmatpush1.bf16.msra.mxu0 %v7455_v27 }
 0x600   :  { %2157 = vmatprep.subr.bf16.mxu0 %v7196_v39 }
 0x603   :  { %2158 = vmatpush1.bf16.msra.mxu0 %v7461_v33 }
 0x604   :  { %2159 = vmatprep.subr.bf16.mxu0 %v7196_v39 }
 0x607   :  { %2160 = vmatpush1.bf16.msra.mxu0 %v7468_v36 }
 0x608   :  { %2161 = vmatprep.subr.bf16.mxu0 %v7196_v39 }
 0x60b   :  { %2162 = vmatpush1.bf16.msra.mxu0 %v7414_v9 }
 0x60c   :  { %2163 = vmatprep.subr.bf16.mxu0 %v7196_v39 }
 0x60f   :  { %2164 = vmatpush1.bf16.msra.mxu0 %v7409_v61 }
 0x610   :  { %2175 = vmatprep.subr.bf16.mxu0 %v7196_v39 }
 0x613   :  { %2176 = vmatpush2.bf16.msra.mxu0 %v7491_v56 }
 0x614   :  { %2177 = vmatprep.subr.bf16.mxu0 %v7196_v39 }
 0x617   :  { %2178 = vmatpush2.bf16.msra.mxu0 %v7497_v58 }
 0x618   :  { %2179 = vmatprep.subr.bf16.mxu0 %v7196_v39 }
 0x61b   :  { %2180 = vmatpush2.bf16.msra.mxu0 %v7503_v59 }
 0x61c   :  { %6533 = vmatprep.subr.bf16.mxu0 %v6894_v24 }
 0x61e   :  { %2182 = vmatmul.mubr.bf16.vlgmr.msra.gmra.mxu0 %v6875_v25  ;;  %v6895_v25 = vld [vmem:[%s9033_s4 + $0xc0] sm:$0xff]  }
 0x61f   :  { %5791 = vmatprep.mubr.msk.bf16.mxu0 %vm505_vm0, %v5789_v26  ;;  %6534 = vmatpush3.bf16.msra.mxu0 %v6894_v24 }
 0x620   :  { %6535 = vmatprep.subr.bf16.mxu0 %v6895_v25 }
 0x623   :  { %6536 = vmatpush3.bf16.msra.mxu0 %v6895_v25 }
 0x626   :  { %2190 = vmatmul.mubr.bf16.gmra.mxu0 %v5788_v28 }
 0x65a   :  { %v6507_v31 = vpop.f32.mrf.mxu0 }
 0x65b   :  { %v1825_v32 = vadd.f32 %v6507_v31, %v7887_v51 }
 0x65c   :  { %v1809_v34 = vpop.f32.mrf.mxu0 }
 0x65d   :  { %v1823_v35 = vadd.f32 %v1809_v34, %v7890_v52 }
 0x65e   :  { %v6508_v40 = vpop.f32.mrf.mxu0 }
 0x660   :  { %v1812_v42 = vpop.f32.mrf.mxu0 }
 0x661   :  { %v1824_v46 = vadd.f32 %v1812_v42, %v7892_v62  ;;  %v6883_v62 = vld [vmem:[%s9033_s4 + $0xb0] sm:$0xff]  }
 0x686   :  { %v6515_v49 = vpop.f32.mrf.mxu0 }
 0x687   :  { %v7979_v44 = vadd.f32 %v6515_v49, %v1825_v32  ;;  %v6896_v32 = vld [vmem:[%s9033_s4 + $0xd8] sm:$0xff]  }
 0x688   :  { %v1958_v48 = vpop.f32.mrf.mxu0  ;;  %6541 = vmatprep.subr.bf16.mxu0 %v6896_v32 }
 0x689   :  { %v7981_v37 = vadd.f32 %v1958_v48, %v1823_v35 }
 0x68a   :  { %v6516_v54 = vpop.f32.mrf.mxu0 }
 0x68c   :  { %v1961_v51 = vpop.f32.mrf.mxu0 }
 0x68d   :  { %v7983_v55 = vadd.f32 %v1961_v51, %v1824_v46 }
 0x6b2   :  { %v2034_v52 = vpop.f32.mrf.mxu0 }
 0x6b4   :  { %v2036_v43 = vpop.f32.mrf.mxu0 }
 0x6b6   :  { %v2037_v57 = vpop.f32.mrf.mxu0 }
 0x6b7   :  { %v2048_v38 = vpack.c.bf16 %v2037_v57, %v2034_v52 }
 0x6b8   :  { %v2039_v47 = vpop.f32.mrf.mxu0 }
 0x6b9   :  { %6521 = vmatprep.mubr.msk.bf16.mxu1 %vm662_vm2, %v2048_v38 }
 0x6ba   :  { %v2042_v53 = vpop.f32.mrf.mxu0 }
 0x6bb   :  { %v2049_v63 = vpack.c.bf16 %v2042_v53, %v2042_v53 }
 0x6bc   :  { %v2044_v4 = vpop.f32.mrf.mxu0 }
 0x6bd   :  { %6522 = vmatmul.mubr.msk.bf16.vlgmr.msra.gmra.mxu1 %vm662_vm2, %v2049_v63 }
 0x6be   :  { %v2045_v45 = vpop.f32.mrf.mxu0  ;;  %6526 = vmatpush3.bf16.msra.mxu1 %v6882_v41 }
 0x6bf   :  { %6527 = vmatprep.subr.bf16.mxu1 %v6883_v62 }
 0x6c0   :  { %v2046_v0 = vpop.f32.mrf.mxu0 }
 0x6c2   :  { %6528 = vmatpush3.bf16.msra.mxu1 %v6883_v62 }
 0x6c3   :  { %2298 = vmatprep.subr.bf16.mxu1 %v7196_v39 }
 0x6de   :  { %v2183_v50 = vpop.f32.mrf.mxu0 }
 0x6e0   :  { %v2185_v1 = vpop.f32.mrf.mxu0 }
 0x6e2   :  { %v2186_v2 = vpop.f32.mrf.mxu0 }
 0x6e3   :  { %v2197_v3 = vpack.c.bf16 %v2186_v2, %v2183_v50  ;;  %v6900_v2 = vld [vmem:[%s9031_s3 + $0x154] ss:$8 sps:$4 sm:$0xff]  }
 0x6e4   :  { %v2188_v6 = vpop.f32.mrf.mxu0 }
 0x6e5   :  { %6529 = vmatprep.mubr.msk.bf16.mxu1 %vm662_vm2, %v2197_v3 }
 0x6e6   :  { %v2191_v7 = vpop.f32.mrf.mxu0 }
 0x6e7   :  { %v2198_v13 = vpack.c.bf16 %v2191_v7, %v2191_v7 }
 0x6e8   :  { %v2193_v10 = vpop.f32.mrf.mxu0 }
 0x6e9   :  { %6530 = vmatmul.mubr.msk.bf16.vlgmr.msra.gmra.mxu1 %vm662_vm2, %v2198_v13  ;;  %v5836_v13 = vld [vmem:[%s9031_s3 + $0x160] sm:$0xff]  ;;  %v6898_v10 = vld [vmem:[%s9031_s3 + $0x150] ss:$8 sps:$4 sm:$0xff]  }
 0x6ea   :  { %2299 = vmatpush1.bf16.msra.mxu1 %v7431_v60  ;;  %v2194_v11 = vpop.f32.mrf.mxu0  ;;  %5807 = vmatprep.mubr.msk.bf16.mxu1 %vm505_vm0, %v6884_v12 }
 0x6eb   :  { %2300 = vmatprep.subr.bf16.mxu1 %v7196_v39  ;;  %v5840_v11 = vcombine.high %v5836_v13, %v5836_v13 }
 0x6ec   :  { %v2195_v15 = vpop.f32.mrf.mxu0 }
 0x6ed   :  { %v5839_v15 = vcombine.low %v5836_v13, %v5836_v13 }
 0x6ee   :  { %2301 = vmatpush1.bf16.msra.mxu1 %v7439_v14 }
 0x6ef   :  { %2302 = vmatprep.subr.bf16.mxu1 %v7196_v39 }
 0x6f2   :  { %2303 = vmatpush1.bf16.msra.mxu1 %v7447_v19 }
 0x6f3   :  { %2304 = vmatprep.subr.bf16.mxu1 %v7196_v39 }
 0x6f6   :  { %2305 = vmatpush1.bf16.msra.mxu1 %v7455_v27 }
 0x6f7   :  { %2306 = vmatprep.subr.bf16.mxu1 %v7196_v39 }
 0x6fa   :  { %2307 = vmatpush1.bf16.msra.mxu1 %v7461_v33 }
 0x6fb   :  { %2308 = vmatprep.subr.bf16.mxu1 %v7196_v39 }
 0x6fe   :  { %2309 = vmatpush1.bf16.msra.mxu1 %v7468_v36 }
 0x6ff   :  { %2310 = vmatprep.subr.bf16.mxu1 %v7196_v39 }
 0x702   :  { %2311 = vmatpush1.bf16.msra.mxu1 %v7414_v9 }
 0x703   :  { %2312 = vmatprep.subr.bf16.mxu1 %v7196_v39 }
 0x706   :  { %2313 = vmatpush1.bf16.msra.mxu1 %v7409_v61 }
 0x707   :  { %2324 = vmatprep.subr.bf16.mxu1 %v7196_v39 }
 0x70a   :  { %2325 = vmatpush2.bf16.msra.mxu1 %v7491_v56 }
 0x70b   :  { %2326 = vmatprep.subr.bf16.mxu1 %v7196_v39 }
 0x70e   :  { %2327 = vmatpush2.bf16.msra.mxu1 %v7497_v58 }
 0x70f   :  { %2328 = vmatprep.subr.bf16.mxu1 %v7196_v39 }
 0x712   :  { %2329 = vmatpush2.bf16.msra.mxu1 %v7503_v59 }
 0x713   :  { %2447 = vmatprep.subr.bf16.mxu1 %v7196_v39 }
 0x715   :  { %2331 = vmatmul.mubr.bf16.vlgmr.msra.gmra.mxu1 %v6886_v5  ;;  %v6910_v5 = vld [vmem:[%s9033_s4 + $0xf8] sm:$0xff]  }
 0x716   :  { %2448 = vmatpush1.bf16.msra.mxu1 %v7431_v60  ;;  %5808 = vmatprep.mubr.msk.bf16.mxu1 %vm505_vm0, %v5806_v8 }
 0x717   :  { %2449 = vmatprep.subr.bf16.mxu1 %v7196_v39 }
 0x71a   :  { %2450 = vmatpush1.bf16.msra.mxu1 %v7439_v14 }
 0x71b   :  { %2451 = vmatprep.subr.bf16.mxu1 %v7196_v39 }
 0x71d   :  { %2339 = vmatmul.mubr.bf16.gmra.mxu1 %v5805_v17 }
 0x71e   :  { %2452 = vmatpush1.bf16.msra.mxu1 %v7447_v19  ;;  %5824 = vmatprep.mubr.msk.bf16.mxu1 %vm505_vm0, %v6891_v18 }
 0x71f   :  { %2453 = vmatprep.subr.bf16.mxu1 %v7196_v39 }
 0x722   :  { %2454 = vmatpush1.bf16.msra.mxu1 %v7455_v27 }
 0x723   :  { %2455 = vmatprep.subr.bf16.mxu1 %v7196_v39 }
 0x726   :  { %2456 = vmatpush1.bf16.msra.mxu1 %v7461_v33 }
 0x727   :  { %2457 = vmatprep.subr.bf16.mxu1 %v7196_v39 }
 0x72a   :  { %2458 = vmatpush1.bf16.msra.mxu1 %v7468_v36 }
 0x72b   :  { %2459 = vmatprep.subr.bf16.mxu1 %v7196_v39 }
 0x72e   :  { %2460 = vmatpush1.bf16.msra.mxu1 %v7414_v9 }
 0x72f   :  { %2461 = vmatprep.subr.bf16.mxu1 %v7196_v39 }
 0x732   :  { %2462 = vmatpush1.bf16.msra.mxu1 %v7409_v61 }
 0x733   :  { %2473 = vmatprep.subr.bf16.mxu1 %v7196_v39 }
 0x736   :  { %2474 = vmatpush2.bf16.msra.mxu1 %v7491_v56 }
 0x737   :  { %2475 = vmatprep.subr.bf16.mxu1 %v7196_v39 }
 0x73a   :  { %2476 = vmatpush2.bf16.msra.mxu1 %v7497_v58 }
 0x73b   :  { %2477 = vmatprep.subr.bf16.mxu1 %v7196_v39 }
 0x73e   :  { %2478 = vmatpush2.bf16.msra.mxu1 %v7503_v59 }
 0x741   :  { %2480 = vmatmul.mubr.bf16.vlgmr.msra.gmra.mxu1 %v6889_v21 }
 0x742   :  { %5825 = vmatprep.mubr.msk.bf16.mxu1 %vm505_vm0, %v5823_v22 }
 0x749   :  { %2488 = vmatmul.mubr.bf16.gmra.mxu1 %v5822_v23 }
 0x77d   :  { %v6523_v26 = vpop.f32.mrf.mxu1 }
 0x77e   :  { %v2123_v28 = vadd.f32 %v6523_v26, %v7979_v44 }
 0x77f   :  { %v2107_v29 = vpop.f32.mrf.mxu1 }
 0x780   :  { %v2121_v30 = vadd.f32 %v2107_v29, %v7981_v37 }
 0x781   :  { %v6524_v31 = vpop.f32.mrf.mxu1 }
 0x783   :  { %v2110_v34 = vpop.f32.mrf.mxu1 }
 0x784   :  { %v2122_v35 = vadd.f32 %v2110_v34, %v7983_v55  ;;  %v6897_v55 = vld [vmem:[%s9033_s4 + $0xd0] sm:$0xff]  }
 0x7a9   :  { %v6531_v40 = vpop.f32.mrf.mxu1 }
 0x7aa   :  { %v8070_v41 = vadd.f32 %v6531_v40, %v2123_v28 }
 0x7ab   :  { %v2256_v42 = vpop.f32.mrf.mxu1 }
 0x7ac   :  { %v8072_v46 = vadd.f32 %v2256_v42, %v2121_v30 }
 0x7ad   :  { %v6532_v49 = vpop.f32.mrf.mxu1 }
 0x7af   :  { %v2259_v44 = vpop.f32.mrf.mxu1 }
 0x7b0   :  { %v8074_v48 = vadd.f32 %v2259_v44, %v2122_v35  ;;  %v6911_v35 = vld [vmem:[%s9033_s4 + $0xf0] sm:$0xff]  }
 0x7d5   :  { %v2332_v37 = vpop.f32.mrf.mxu1 }
 0x7d7   :  { %v2334_v54 = vpop.f32.mrf.mxu1 }
 0x7d9   :  { %v2335_v51 = vpop.f32.mrf.mxu1 }
 0x7da   :  { %v2346_v52 = vpack.c.bf16 %v2335_v51, %v2332_v37 }
 0x7db   :  { %v2337_v43 = vpop.f32.mrf.mxu1 }
 0x7dc   :  { %6537 = vmatprep.mubr.msk.bf16.mxu0 %vm662_vm2, %v2346_v52 }
 0x7dd   :  { %v2340_v57 = vpop.f32.mrf.mxu1 }
 0x7de   :  { %v2347_v38 = vpack.c.bf16 %v2340_v57, %v2340_v57 }
 0x7df   :  { %v2342_v47 = vpop.f32.mrf.mxu1 }
 0x7e0   :  { %6538 = vmatmul.mubr.msk.bf16.vlgmr.msra.gmra.mxu0 %vm662_vm2, %v2347_v38  ;;  %v7197_v38 = vmov 0.0  }
 0x7e1   :  { %v2343_v53 = vpop.f32.mrf.mxu1  ;;  %6542 = vmatpush3.bf16.msra.mxu0 %v6896_v32 }
 0x7e2   :  { %6543 = vmatprep.subr.bf16.mxu0 %v6897_v55 }
 0x7e3   :  { %v2344_v63 = vpop.f32.mrf.mxu1 }
 0x7e5   :  { %6544 = vmatpush3.bf16.msra.mxu0 %v6897_v55 }
 0x7e6   :  { %2596 = vmatprep.subr.bf16.mxu0 %v7196_v39 }
 0x801   :  { %v2481_v62 = vpop.f32.mrf.mxu1 }
 0x803   :  { %v2483_v4 = vpop.f32.mrf.mxu1 }
 0x805   :  { %v2484_v45 = vpop.f32.mrf.mxu1 }
 0x806   :  { %v2495_v0 = vpack.c.bf16 %v2484_v45, %v2481_v62  ;;  %v5868_v45 = vld [vmem:[%s9035_s5] ss:$0 sm:$0xff] }
 0x807   :  { %v2486_v50 = vpop.f32.mrf.mxu1 }
 0x808   :  { %6545 = vmatprep.mubr.msk.bf16.mxu0 %vm662_vm2, %v2495_v0 }
 0x809   :  { %v2489_v1 = vpop.f32.mrf.mxu1 }
 0x80a   :  { %v2496_v3 = vpack.c.bf16 %v2489_v1, %v2489_v1 }
 0x80b   :  { %v2491_v6 = vpop.f32.mrf.mxu1 }
 0x80c   :  { %6546 = vmatmul.mubr.msk.bf16.vlgmr.msra.gmra.mxu0 %vm662_vm2, %v2496_v3 }
 0x80d   :  { %2597 = vmatpush1.bf16.msra.mxu0 %v7431_v60  ;;  %v2492_v7 = vpop.f32.mrf.mxu1  ;;  %5841 = vmatprep.mubr.msk.bf16.mxu0 %vm505_vm0, %v6900_v2 }
 0x80e   :  { %2598 = vmatprep.subr.bf16.mxu0 %v7196_v39 }
 0x80f   :  { %v2493_v12 = vpop.f32.mrf.mxu1 }
 0x811   :  { %2599 = vmatpush1.bf16.msra.mxu0 %v7439_v14 }
 0x812   :  { %2600 = vmatprep.subr.bf16.mxu0 %v7196_v39 }
 0x815   :  { %2601 = vmatpush1.bf16.msra.mxu0 %v7447_v19 }
 0x816   :  { %2602 = vmatprep.subr.bf16.mxu0 %v7196_v39 }
 0x819   :  { %2603 = vmatpush1.bf16.msra.mxu0 %v7455_v27 }
 0x81a   :  { %2604 = vmatprep.subr.bf16.mxu0 %v7196_v39 }
 0x81d   :  { %2605 = vmatpush1.bf16.msra.mxu0 %v7461_v33 }
 0x81e   :  { %2606 = vmatprep.subr.bf16.mxu0 %v7196_v39 }
 0x821   :  { %2607 = vmatpush1.bf16.msra.mxu0 %v7468_v36 }
 0x822   :  { %2608 = vmatprep.subr.bf16.mxu0 %v7196_v39 }
 0x825   :  { %2609 = vmatpush1.bf16.msra.mxu0 %v7414_v9 }
 0x826   :  { %2610 = vmatprep.subr.bf16.mxu0 %v7196_v39 }
 0x829   :  { %2611 = vmatpush1.bf16.msra.mxu0 %v7409_v61 }
 0x82a   :  { %2622 = vmatprep.subr.bf16.mxu0 %v7196_v39 }
 0x82d   :  { %2623 = vmatpush2.bf16.msra.mxu0 %v7491_v56 }
 0x82e   :  { %2624 = vmatprep.subr.bf16.mxu0 %v7196_v39 }
 0x831   :  { %2625 = vmatpush2.bf16.msra.mxu0 %v7497_v58 }
 0x832   :  { %2626 = vmatprep.subr.bf16.mxu0 %v7196_v39 }
 0x835   :  { %2627 = vmatpush2.bf16.msra.mxu0 %v7503_v59 }
 0x836   :  { %2745 = vmatprep.subr.bf16.mxu0 %v7196_v39 }
 0x838   :  { %2629 = vmatmul.mubr.bf16.vlgmr.msra.gmra.mxu0 %v6898_v10 }
 0x839   :  { %2746 = vmatpush1.bf16.msra.mxu0 %v7431_v60  ;;  %5842 = vmatprep.mubr.msk.bf16.mxu0 %vm505_vm0, %v5840_v11  ;;  %v5853_v60 = vld [vmem:[%s9031_s3 + $0x178] sm:$0xff] }
 0x83a   :  { %2747 = vmatprep.subr.bf16.mxu0 %v7196_v39 }
 0x83d   :  { %2748 = vmatpush1.bf16.msra.mxu0 %v7439_v14  ;;  %v5856_v14 = vcombine.low %v5853_v60, %v5853_v60 }
 0x83e   :  { %2749 = vmatprep.subr.bf16.mxu0 %v7196_v39 }
 0x840   :  { %2637 = vmatmul.mubr.bf16.gmra.mxu0 %v5839_v15 }
 0x841   :  { %2750 = vmatpush1.bf16.msra.mxu0 %v7447_v19  ;;  %5858 = vmatprep.mubr.msk.bf16.mxu0 %vm505_vm0, %v6905_v16  ;;  %v6908_v19 = vld [vmem:[%s9033_s4 + $0xe8] sm:$0xff]  }
 0x842   :  { %2751 = vmatprep.subr.bf16.mxu0 %v7196_v39  ;;  %6549 = vmatprep.subr.bf16.mxu1 %v6908_v19 }
 0x843   :  { %6550 = vmatpush3.bf16.msra.mxu1 %v6908_v19 }
 0x845   :  { %2752 = vmatpush1.bf16.msra.mxu0 %v7455_v27  ;;  %v6909_v27 = vld [vmem:[%s9033_s4 + $0xe0] sm:$0xff]  }
 0x846   :  { %2753 = vmatprep.subr.bf16.mxu0 %v7196_v39  ;;  %6551 = vmatprep.subr.bf16.mxu1 %v6909_v27 }
 0x847   :  { %6552 = vmatpush3.bf16.msra.mxu1 %v6909_v27 }
 0x848   :  { %6557 = vmatprep.subr.bf16.mxu1 %v6910_v5 }
 0x849   :  { %2754 = vmatpush1.bf16.msra.mxu0 %v7461_v33 }
 0x84a   :  { %2755 = vmatprep.subr.bf16.mxu0 %v7196_v39 }
 0x84d   :  { %2756 = vmatpush1.bf16.msra.mxu0 %v7468_v36 }
 0x84e   :  { %2757 = vmatprep.subr.bf16.mxu0 %v7196_v39 }
 0x851   :  { %2758 = vmatpush1.bf16.msra.mxu0 %v7414_v9  ;;  %v6903_v9 = vld [vmem:[%s9031_s3 + $0x168] ss:$8 sps:$4 sm:$0xff]  }
 0x852   :  { %2759 = vmatprep.subr.bf16.mxu0 %v7196_v39 }
 0x855   :  { %2760 = vmatpush1.bf16.msra.mxu0 %v7409_v61  ;;  %v5857_v61 = vcombine.high %v5853_v60, %v5853_v60 }
 0x856   :  { %2771 = vmatprep.subr.bf16.mxu0 %v7196_v39 }
 0x859   :  { %2772 = vmatpush2.bf16.msra.mxu0 %v7491_v56 }
 0x85a   :  { %2773 = vmatprep.subr.bf16.mxu0 %v7196_v39 }
 0x85d   :  { %2774 = vmatpush2.bf16.msra.mxu0 %v7497_v58 }
 0x85e   :  { %2775 = vmatprep.subr.bf16.mxu0 %v7196_v39 }
 0x861   :  { %2776 = vmatpush2.bf16.msra.mxu0 %v7503_v59 }
 0x862   :  { %6605 = vmatprep.subr.bf16.mxu0 %v7197_v38 }
 0x864   :  { %2778 = vmatmul.mubr.bf16.vlgmr.msra.gmra.mxu0 %v6903_v9 }
 0x865   :  { %5859 = vmatprep.mubr.msk.bf16.mxu0 %vm505_vm0, %v5857_v61 }
 0x86c   :  { %2786 = vmatmul.mubr.bf16.gmra.mxu0 %v5856_v14 }
 0x86d   :  { %6609 = vmatprep.mubr.msk.bf16.mxu0 %vm7198_vm3, %v7197_v38 }
 0x8a0   :  { %v6539_v33 = vpop.f32.mrf.mxu0 }
 0x8a1   :  { %v2421_v36 = vadd.f32 %v6539_v33, %v8070_v41 }
 0x8a2   :  { %v2405_v56 = vpop.f32.mrf.mxu0 }
 0x8a3   :  { %v2419_v58 = vadd.f32 %v2405_v56, %v8072_v46  ;;  %v5890_v56 = vld [vmem:[%s9036_s6 + $0x8] sm:$0xf] }
 0x8a4   :  { %v6540_v59 = vpop.f32.mrf.mxu0 }
 0x8a5   :  { %v5905_v59 = vld [vmem:[%s9036_s6 + $0xc] sm:$0xf] }
 0x8a6   :  { %v2408_v8 = vpop.f32.mrf.mxu0 }
 0x8a7   :  { %v2420_v17 = vadd.f32 %v2408_v8, %v8074_v48  ;;  %v6913_v8 = vld [vmem:[%s9034_s7 + $0x78] sm:$0xff]  }
 0x8cc   :  { %v6547_v18 = vpop.f32.mrf.mxu0 }
 0x8cd   :  { %v2570_v20 = vadd.f32 %v6547_v18, %v2421_v36  ;;  %v2887_v36 = vld [vmem:[%s9036_s6] sm:$0xf]  ;;  %v6915_v18 = vld [vmem:[%s9034_s7 + $0x70] sm:$0xff]  }
 0x8ce   :  { %v2554_v21 = vpop.f32.mrf.mxu0 }
 0x8cf   :  { %v2568_v22 = vadd.f32 %v2554_v21, %v2419_v58  ;;  %v5870_v58 = vld [vmem:[%s9036_s6 + $0x4] sm:$0xf]  ;;  %v6917_v21 = vld [vmem:[%s9034_s7 + $0x68] sm:$0xff]  }
 0x8d0   :  { %v6548_v23 = vpop.f32.mrf.mxu0 }
 0x8d1   :  { %v6919_v23 = vld [vmem:[%s9034_s7 + $0x60] sm:$0xff]  }
 0x8d2   :  { %v2557_v24 = vpop.f32.mrf.mxu0 }
 0x8d3   :  { %v2569_v25 = vadd.f32 %v2557_v24, %v2420_v17  ;;  %v6914_v17 = vld [vmem:[%s9034_s7 + $0x30] sm:$0xff]  }
 0x8f8   :  { %v2630_v26 = vpop.f32.mrf.mxu0 }
 0x8fa   :  { %v2632_v28 = vpop.f32.mrf.mxu0 }
 0x8fc   :  { %v2633_v29 = vpop.f32.mrf.mxu0 }
 0x8fd   :  { %v2644_v30 = vpack.c.bf16 %v2633_v29, %v2630_v26 }
 0x8fe   :  { %v2635_v31 = vpop.f32.mrf.mxu0 }
 0x8ff   :  { %6553 = vmatprep.mubr.msk.bf16.mxu1 %vm662_vm2, %v2644_v30 }
 0x900   :  { %v2638_v32 = vpop.f32.mrf.mxu0 }
 0x901   :  { %v2645_v34 = vpack.c.bf16 %v2638_v32, %v2638_v32 }
 0x902   :  { %v2640_v40 = vpop.f32.mrf.mxu0 }
 0x903   :  { %6554 = vmatmul.mubr.msk.bf16.vlgmr.msra.gmra.mxu1 %vm662_vm2, %v2645_v34  ;;  %v6920_v40 = vld [vmem:[%s9034_s7 + $0x18] sm:$0xff]  }
 0x904   :  { %v2641_v41 = vpop.f32.mrf.mxu0  ;;  %6558 = vmatpush3.bf16.msra.mxu1 %v6910_v5  ;;  %v6912_v5 = vld [vmem:[%s9034_s7 + $0x38] sm:$0xff]  }
 0x905   :  { %6559 = vmatprep.subr.bf16.mxu1 %v6911_v35 }
 0x906   :  { %v2642_v42 = vpop.f32.mrf.mxu0 }
 0x908   :  { %6560 = vmatpush3.bf16.msra.mxu1 %v6911_v35 }
 0x909   :  { %6565 = vmatprep.subr.bf16.mxu1 %v7197_v38 }
 0x924   :  { %v2779_v46 = vpop.f32.mrf.mxu0 }
 0x926   :  { %v2781_v49 = vpop.f32.mrf.mxu0 }
 0x928   :  { %v2782_v44 = vpop.f32.mrf.mxu0 }
 0x929   :  { %v2793_v48 = vpack.c.bf16 %v2782_v44, %v2779_v46 }
 0x92a   :  { %v2784_v37 = vpop.f32.mrf.mxu0 }
 0x92b   :  { %6561 = vmatprep.mubr.msk.bf16.mxu1 %vm662_vm2, %v2793_v48  ;;  %v6921_v48 = vld [vmem:[%s9034_s7 + $0x10] sm:$0xff]  }
 0x92c   :  { %v2787_v54 = vpop.f32.mrf.mxu0 }
 0x92d   :  { %v2794_v51 = vpack.c.bf16 %v2787_v54, %v2787_v54 }
 0x92e   :  { %v2789_v52 = vpop.f32.mrf.mxu0 }
 0x92f   :  { %6562 = vmatmul.mubr.msk.bf16.vlgmr.msra.gmra.mxu1 %vm662_vm2, %v2794_v51  ;;  %v6922_v52 = vld [vmem:[%s9034_s7 + $0x8] sm:$0xff]  }
 0x930   :  { %v2790_v43 = vpop.f32.mrf.mxu0  ;;  %6569 = vmatprep.mubr.msk.bf16.mxu1 %vm7198_vm3, %v7197_v38 }
 0x931   :  { %v5935_v43 = vld [vmem:[%s9036_s6 + $0x14] sm:$0xf] }
 0x932   :  { %v2791_v57 = vpop.f32.mrf.mxu0 }
 0x933   :  { %v6928_v57 = vld [vmem:[%s9034_s7 + $0xb8] sm:$0xff]  }
 0x9c3   :  { %v6555_v55 = vpop.f32.mrf.mxu1 }
 0x9c4   :  { %v2719_v62 = vadd.f32 %v6555_v55, %v2570_v20  ;;  %v6916_v20 = vld [vmem:[%s9034_s7 + $0x28] sm:$0xff]   ;;  %v6923_v55 = vld [vmem:[%s9034_s7] sm:$0xff]  }
 0x9c5   :  { %v2703_v47 = vpop.f32.mrf.mxu1 }
 0x9c6   :  { %v2717_v0 = vadd.f32 %v2703_v47, %v2568_v22  ;;  %v6918_v22 = vld [vmem:[%s9034_s7 + $0x20] sm:$0xff]   ;;  %v6929_v47 = vld [vmem:[%s9034_s7 + $0xb0] sm:$0xff]  }
 0x9c7   :  { %v6556_v53 = vpop.f32.mrf.mxu1 }
 0x9c8   :  { %v6924_v53 = vld [vmem:[%s9034_s7 + $0x58] sm:$0xff]  }
 0x9c9   :  { %v2706_v63 = vpop.f32.mrf.mxu1 }
 0x9ca   :  { %v2718_v7 = vadd.f32 %v2706_v63, %v2569_v25 }
 0x9ef   :  { %v6563_v4 = vpop.f32.mrf.mxu1 }
 0x9f0   :  { %v2868_v50 = vadd.f32 %v6563_v4, %v2719_v62  ;;  %v6925_v62 = vld [vmem:[%s9034_s7 + $0x50] sm:$0xff]   ;;  %v6926_v4 = vld [vmem:[%s9034_s7 + $0x48] sm:$0xff]  }
 0x9f1   :  { %v2852_v1 = vpop.f32.mrf.mxu1 }
 0x9f2   :  { %v2878_v2 = vadd.f32 %v5868_v45, %v2868_v50  ;;  %v2866_v3 = vadd.f32 %v2852_v1, %v2717_v0  ;;  %v5920_v50 = vld [vmem:[%s9036_s6 + $0x10] sm:$0xf]  ;;  %v6930_v1 = vld [vmem:[%s9034_s7 + $0xa8] sm:$0xff]  }
 0x9f3   :  { %v6564_v6 = vpop.f32.mrf.mxu1 }
 0x9f4   :  { %v2881_v12 = vmax.f32 %v2878_v2, 0.0  ;;  %v2876_v13 = vadd.f32 %v5868_v45, %v2866_v3  ;;  %v6931_v2 = vld [vmem:[%s9034_s7 + $0xa0] sm:$0xff]   ;;  %v6932_v3 = vld [vmem:[%s9034_s7 + $0x98] sm:$0xff]   ;;  %v6933_v6 = vld [vmem:[%s9034_s7 + $0x90] sm:$0xff]  }
 0x9f5   :  { %v2855_v10 = vpop.f32.mrf.mxu1 }
 0x9f6   :  { %v2884_v11 = vmin.f32 %v2881_v12, 6.0  ;;  %v2867_v15 = vadd.f32 %v2855_v10, %v2718_v7  ;;  %v2879_v60 = vmax.f32 %v2876_v13, 0.0  ;;  %v6934_v7 = vld [vmem:[%s9034_s7 + $0x88] sm:$0xff]   ;;  %v6935_v12 = vld [vmem:[%s9034_s7 + $0x80] sm:$0xff]  }
 0x9f8   :  { %v2886_v16 = vpack.c.bf16 %v2884_v11, %v2884_v11  ;;  %v2877_v9 = vadd.f32 %v5868_v45, %v2867_v15  ;;  %v2882_v19 = vmin.f32 %v2879_v60, 6.0  ;;  %v6927_v45 = vld [vmem:[%s9034_s7 + $0x40] sm:$0xff]  }
 0x9fa   :  { %v8178_v61 = vsel %vm512_vm1, %v2886_v16, 0  ;;  %v2880_v14 = vmax.f32 %v2877_v9, 0.0 }
 0x9fb   :  { %6566 = vmatpush3.bf16.msra.mxu1 %v8178_v61  ;;  %6606 = vmatpush3.bf16.msra.mxu0 %v8178_v61 }
 0x9fc   :  { %v2883_v27 = vmin.f32 %v2880_v14, 6.0  ;;  %6567 = vmatprep.subr.bf16.mxu1 %v7197_v38  ;;  %6607 = vmatprep.subr.bf16.mxu0 %v7197_v38 }
 0x9fe   :  { %v8184_v33 = vpack.c.bf16 %v2883_v27, %v2882_v19 }
 0xa00   :  { %6568 = vmatpush3.bf16.msra.mxu1 %v8184_v33  ;;  %6608 = vmatpush3.bf16.msra.mxu0 %v8184_v33 }
 0xa01   :  { %6573 = vmatprep.subr.bf16.mxu1 %v7197_v38  ;;  %6625 = vmatprep.subr.bf16.mxu0 %v7197_v38 }
 0xa03   :  { %6570 = vmatmul.mubr.msk.bf16.vlgmr.msra.gmra.mxu1 %vm2888_vm4, %v2887_v36  ;;  %6610 = vmatmul.mubr.msk.bf16.vlgmr.msra.gmra.mxu0 %vm2888_vm4, %v5890_v56 }
 0xa04   :  { %6574 = vmatpush3.bf16.msra.mxu1 %v8178_v61  ;;  %6626 = vmatpush3.bf16.msra.mxu0 %v8178_v61 }
 0xa05   :  { %6575 = vmatprep.subr.bf16.mxu1 %v7197_v38  ;;  %6627 = vmatprep.subr.bf16.mxu0 %v7197_v38 }
 0xa06   :  { %6577 = vmatprep.mubr.msk.bf16.mxu1 %vm7198_vm3, %v7197_v38  ;;  %6629 = vmatprep.mubr.msk.bf16.mxu0 %vm7198_vm3, %v7197_v38 }
 0xa08   :  { %6576 = vmatpush3.bf16.msra.mxu1 %v8184_v33  ;;  %6628 = vmatpush3.bf16.msra.mxu0 %v8184_v33 }
 0xa09   :  { %6581 = vmatprep.subr.bf16.mxu1 %v7197_v38  ;;  %6633 = vmatprep.subr.bf16.mxu0 %v7197_v38 }
 0xa0b   :  { %6578 = vmatmul.mubr.msk.bf16.vlgmr.msra.gmra.mxu1 %vm2888_vm4, %v5870_v58  ;;  %6630 = vmatmul.mubr.msk.bf16.vlgmr.msra.gmra.mxu0 %vm2888_vm4, %v5905_v59 }
 0xa0c   :  { %6582 = vmatpush3.bf16.msra.mxu1 %v6912_v5  ;;  %6634 = vmatpush3.bf16.msra.mxu0 %v6913_v8  ;;  %v5965_v5 = vld [vmem:[%s9036_s6 + $0x1c] sm:$0xf] }
 0xa0d   :  { %6583 = vmatprep.subr.bf16.mxu1 %v7197_v38  ;;  %6635 = vmatprep.subr.bf16.mxu0 %v7197_v38  ;;  %v6937_v8 = vld [vmem:[%s9034_s7 + $0xf8] sm:$0xff]  }
 0xa0e   :  { %6589 = vmatprep.mubr.msk.bf16.mxu1 %vm7198_vm3, %v7197_v38  ;;  %6641 = vmatprep.mubr.msk.bf16.mxu0 %vm7198_vm3, %v7197_v38 }
 0xa10   :  { %6584 = vmatpush3.bf16.msra.mxu1 %v6914_v17  ;;  %6636 = vmatpush3.bf16.msra.mxu0 %v6915_v18 }
 0xa11   :  { %6585 = vmatprep.subr.bf16.mxu1 %v7197_v38  ;;  %6637 = vmatprep.subr.bf16.mxu0 %v7197_v38 }
 0xa14   :  { %6586 = vmatpush3.bf16.msra.mxu1 %v6916_v20  ;;  %6638 = vmatpush3.bf16.msra.mxu0 %v6917_v21 }
 0xa15   :  { %6587 = vmatprep.subr.bf16.mxu1 %v7197_v38  ;;  %6639 = vmatprep.subr.bf16.mxu0 %v7197_v38 }
 0xa18   :  { %6588 = vmatpush3.bf16.msra.mxu1 %v6918_v22  ;;  %6640 = vmatpush3.bf16.msra.mxu0 %v6919_v23 }
 0xa19   :  { %6593 = vmatprep.subr.bf16.mxu1 %v7197_v38  ;;  %6665 = vmatprep.subr.bf16.mxu0 %v7197_v38 }
 0xac3   :  { %v2929_v24 = vpop.f32.mrf.mxu1  ;;  %v8254_v25 = vpop.f32.mrf.mxu0 }
 0xac4   :  { %v2935_v63 = vpack.c.bf16 %v2929_v24, %v2929_v24  ;;  %v3179_v0 = vpack.c.bf16 %v8254_v25, %v8254_v25 }
 0xac5   :  { %v6571_v26 = vpop.f32.mrf.mxu1  ;;  %v6611_v28 = vpop.f32.mrf.mxu0 }
 0xac7   :  { %v2932_v29 = vpop.f32.mrf.mxu1  ;;  %v3176_v30 = vpop.f32.mrf.mxu0 }
 0xac9   :  { %v6572_v31 = vpop.f32.mrf.mxu1  ;;  %v6612_v32 = vpop.f32.mrf.mxu0 }
 0xacb   :  { %v2983_v34 = vpop.f32.mrf.mxu1  ;;  %v3296_v35 = vpop.f32.mrf.mxu0 }
 0xacc   :  { %v2989_v41 = vpack.c.bf16 %v2983_v34, %v2983_v34  ;;  %v3302_v42 = vpack.c.bf16 %v3296_v35, %v3296_v35  ;;  %v5950_v35 = vld [vmem:[%s9036_s6 + $0x18] sm:$0xf] }
 0xacd   :  { %v6579_v46 = vpop.f32.mrf.mxu1  ;;  %v6631_v49 = vpop.f32.mrf.mxu0 }
 0xace   :  { %6590 = vmatmul.mubr.msk.bf16.vlgmr.msra.gmra.mxu1 %vm3023_vm5, %v2989_v41  ;;  %6642 = vmatmul.mubr.msk.bf16.vlgmr.msra.gmra.mxu0 %vm3023_vm5, %v3302_v42  ;;  %v6938_v41 = vld [vmem:[%s9034_s7 + $0xd0] sm:$0xff]   ;;  %v6940_v46 = vld [vmem:[%s9034_s7 + $0xc8] sm:$0xff]  }
 0xacf   :  { %6594 = vmatpush3.bf16.msra.mxu1 %v6920_v40  ;;  %6666 = vmatpush3.bf16.msra.mxu0 %v8178_v61  ;;  %v2986_v44 = vpop.f32.mrf.mxu1  ;;  %v3299_v37 = vpop.f32.mrf.mxu0  ;;  %v6936_v40 = vld [vmem:[%s9034_s7 + $0xd8] sm:$0xff]   ;;  %v6939_v42 = vld [vmem:[%s9034_s7 + $0xf0] sm:$0xff]   ;;  %v6941_v49 = vld [vmem:[%s9034_s7 + $0xe8] sm:$0xff]  }
 0xad0   :  { %6595 = vmatprep.subr.bf16.mxu1 %v7197_v38  ;;  %6667 = vmatprep.subr.bf16.mxu0 %v7197_v38  ;;  %v6942_v44 = vld [vmem:[%s9034_s7 + $0xc0] sm:$0xff]  }
 0xad1   :  { %v6580_v54 = vpop.f32.mrf.mxu1  ;;  %6669 = vmatprep.mubr.msk.bf16.mxu0 %vm7198_vm3, %v7197_v38  ;;  %6601 = vmatprep.mubr.msk.bf16.mxu1 %vm7198_vm3, %v7197_v38  ;;  %v6632_v51 = vpop.f32.mrf.mxu0 }
 0xad3   :  { %6596 = vmatpush3.bf16.msra.mxu1 %v6921_v48  ;;  %6668 = vmatpush3.bf16.msra.mxu0 %v8184_v33  ;;  %v6943_v48 = vld [vmem:[%s9034_s7 + $0xe0] sm:$0xff]  }
 0xad4   :  { %6597 = vmatprep.subr.bf16.mxu1 %v7197_v38  ;;  %6673 = vmatprep.subr.bf16.mxu0 %v7197_v38 }
 0xad6   :  { %6670 = vmatmul.mubr.msk.bf16.vlgmr.msra.gmra.mxu0 %vm2888_vm4, %v5935_v43 }
 0xad7   :  { %6598 = vmatpush3.bf16.msra.mxu1 %v6922_v52  ;;  %6674 = vmatpush3.bf16.msra.mxu0 %v6928_v57 }
 0xad8   :  { %6599 = vmatprep.subr.bf16.mxu1 %v7197_v38  ;;  %6675 = vmatprep.subr.bf16.mxu0 %v7197_v38 }
 0xad9   :  { %6681 = vmatprep.mubr.msk.bf16.mxu0 %vm7198_vm3, %v7197_v38 }
 0xadb   :  { %6600 = vmatpush3.bf16.msra.mxu1 %v6923_v55  ;;  %6676 = vmatpush3.bf16.msra.mxu0 %v6929_v47 }
 0xadc   :  { %6613 = vmatprep.subr.bf16.mxu1 %v7197_v38  ;;  %6677 = vmatprep.subr.bf16.mxu0 %v7197_v38 }
 0xade   :  { %6602 = vmatmul.mubr.msk.bf16.vlgmr.msra.gmra.mxu1 %vm3023_vm5, %v2935_v63 }
 0xadf   :  { %6614 = vmatpush3.bf16.msra.mxu1 %v6924_v53  ;;  %6621 = vmatprep.mubr.msk.bf16.mxu1 %vm7198_vm3, %v7197_v38 }
 0xae0   :  { %6615 = vmatprep.subr.bf16.mxu1 %v7197_v38  ;;  %6678 = vmatpush3.bf16.msra.mxu0 %v6930_v1 }
 0xae1   :  { %6679 = vmatprep.subr.bf16.mxu0 %v7197_v38 }
 0xae3   :  { %6616 = vmatpush3.bf16.msra.mxu1 %v6925_v62 }
 0xae4   :  { %6617 = vmatprep.subr.bf16.mxu1 %v7197_v38  ;;  %6680 = vmatpush3.bf16.msra.mxu0 %v6931_v2 }
 0xae5   :  { %6705 = vmatprep.subr.bf16.mxu0 %v7197_v38 }
 0xae7   :  { %6618 = vmatpush3.bf16.msra.mxu1 %v6926_v4 }
 0xae8   :  { %6619 = vmatprep.subr.bf16.mxu1 %v7197_v38 }
 0xaeb   :  { %6620 = vmatpush3.bf16.msra.mxu1 %v6927_v45 }
 0xaec   :  { %6645 = vmatprep.subr.bf16.mxu1 %v7197_v38 }
 0xaee   :  { %6622 = vmatmul.mubr.msk.bf16.vlgmr.msra.gmra.mxu1 %vm3023_vm5, %v3179_v0 }
 0xaef   :  { %6646 = vmatpush3.bf16.msra.mxu1 %v8178_v61  ;;  %6649 = vmatprep.mubr.msk.bf16.mxu1 %vm7198_vm3, %v7197_v38 }
 0xaf0   :  { %6647 = vmatprep.subr.bf16.mxu1 %v7197_v38 }
 0xaf3   :  { %6648 = vmatpush3.bf16.msra.mxu1 %v8184_v33 }
 0xaf4   :  { %6653 = vmatprep.subr.bf16.mxu1 %v7197_v38 }
 0xaf6   :  { %6650 = vmatmul.mubr.msk.bf16.vlgmr.msra.gmra.mxu1 %vm2888_vm4, %v5920_v50 }
 0xaf7   :  { %6661 = vmatprep.mubr.msk.bf16.mxu1 %vm7198_vm3, %v7197_v38  ;;  %6654 = vmatpush3.bf16.msra.mxu1 %v6932_v3 }
 0xaf8   :  { %6655 = vmatprep.subr.bf16.mxu1 %v7197_v38 }
 0xafb   :  { %6656 = vmatpush3.bf16.msra.mxu1 %v6933_v6 }
 0xafc   :  { %6657 = vmatprep.subr.bf16.mxu1 %v7197_v38 }
 0xaff   :  { %6658 = vmatpush3.bf16.msra.mxu1 %v6934_v7 }
 0xb00   :  { %6659 = vmatprep.subr.bf16.mxu1 %v7197_v38 }
 0xb03   :  { %6660 = vmatpush3.bf16.msra.mxu1 %v6935_v12  ;;  %v5980_v12 = vld [vmem:[%s9036_s6 + $0x20] sm:$0xf] }
 0xb04   :  { %6685 = vmatprep.subr.bf16.mxu1 %v7197_v38 }
 0xb8e   :  { %v3061_v13 = vpop.f32.mrf.mxu1  ;;  %v3373_v10 = vpop.f32.mrf.mxu0 }
 0xb90   :  { %v6591_v11 = vpop.f32.mrf.mxu1  ;;  %v6643_v15 = vpop.f32.mrf.mxu0 }
 0xb91   :  { %v6948_v11 = vld [vmem:[%s9037_s9 + $0x60] ss:$16 sps:$4 sm:$0xff]   ;;  %v6950_v15 = vld [vmem:[%s9037_s9 + $0x64] ss:$16 sps:$4 sm:$0xff]  }
 0xb92   :  { %v3064_v16 = vpop.f32.mrf.mxu1  ;;  %v3376_v60 = vpop.f32.mrf.mxu0 }
 0xb93   :  { %v6953_v16 = vld [vmem:[%s9037_s9 + $0x6c] ss:$16 sps:$4 sm:$0xff]   ;;  %v6954_v60 = vld [vmem:[%s9037_s9 + $0x40] ss:$16 sps:$4 sm:$0xff]  }
 0xb94   :  { %v6592_v9 = vpop.f32.mrf.mxu1  ;;  %v6644_v14 = vpop.f32.mrf.mxu0 }
 0xb96   :  { %v3542_v19 = vpop.f32.mrf.mxu0 }
 0xb97   :  { %v3548_v27 = vpack.c.bf16 %v3542_v19, %v3542_v19 }
 0xb98   :  { %v6671_v36 = vpop.f32.mrf.mxu0 }
 0xb99   :  { %6682 = vmatmul.mubr.msk.bf16.vlgmr.msra.gmra.mxu0 %vm3023_vm5, %v3548_v27 }
 0xb9a   :  { %6706 = vmatpush3.bf16.msra.mxu0 %v8178_v61  ;;  %6709 = vmatprep.mubr.msk.bf16.mxu0 %vm7198_vm3, %v7197_v38  ;;  %v3545_v56 = vpop.f32.mrf.mxu0 }
 0xb9b   :  { %6707 = vmatprep.subr.bf16.mxu0 %v7197_v38 }
 0xb9c   :  { %v6672_v58 = vpop.f32.mrf.mxu0 }
 0xb9e   :  { %v3128_v59 = vpop.f32.mrf.mxu1  ;;  %6708 = vmatpush3.bf16.msra.mxu0 %v8184_v33 }
 0xb9f   :  { %v3129_v17 = vadd.f32 %v3128_v59, %v3061_v13  ;;  %6713 = vmatprep.subr.bf16.mxu0 %v7197_v38  ;;  %v6944_v13 = vld [vmem:[%s9034_s7 + $0x118] sm:$0xff]  }
 0xba0   :  { %v6603_v18 = vpop.f32.mrf.mxu1 }
 0xba1   :  { %6710 = vmatmul.mubr.msk.bf16.vlgmr.msra.gmra.mxu0 %vm2888_vm4, %v5965_v5  ;;  %v6951_v18 = vld [vmem:[%s9037_s9 + $0x68] ss:$16 sps:$4 sm:$0xff]  }
 0xba2   :  { %v3131_v20 = vpop.f32.mrf.mxu1  ;;  %6714 = vmatpush3.bf16.msra.mxu0 %v6937_v8  ;;  %6721 = vmatprep.mubr.msk.bf16.mxu0 %vm7198_vm3, %v7197_v38 }
 0xba3   :  { %6715 = vmatprep.subr.bf16.mxu0 %v7197_v38 }
 0xba4   :  { %v6604_v21 = vpop.f32.mrf.mxu1 }
 0xba5   :  { %v6959_v21 = vld [vmem:[%s9037_s9 + $0x4c] ss:$16 sps:$4 sm:$0xff]  }
 0xba6   :  { %6716 = vmatpush3.bf16.msra.mxu0 %v6939_v42  ;;  %v5995_v42 = vld [vmem:[%s9039_s8] ss:$0 sm:$0xff] }
 0xba7   :  { %6717 = vmatprep.subr.bf16.mxu0 %v7197_v38 }
 0xbaa   :  { %6718 = vmatpush3.bf16.msra.mxu0 %v6941_v49 }
 0xbab   :  { %6719 = vmatprep.subr.bf16.mxu0 %v7197_v38 }
 0xbae   :  { %v3250_v22 = vpop.f32.mrf.mxu1  ;;  %6720 = vmatpush3.bf16.msra.mxu0 %v6943_v48 }
 0xbaf   :  { %v3256_v23 = vadd.f32 %v3250_v22, %v3129_v17  ;;  %4135 = vmatprep.subr.bf16.mxu0 %v6950_v15  ;;  %v7010_v15 = vld [vmem:[%s9038_s11 + $0x24] ss:$16 sps:$4 sm:$0xff]  }
 0xbb0   :  { %v6623_v24 = vpop.f32.mrf.mxu1 }
 0xbb1   :  { %v3379_v25 = vadd.f32 %v3373_v10, %v3256_v23  ;;  %v6947_v10 = vld [vmem:[%s9034_s7 + $0x100] sm:$0xff]   ;;  %v6957_v24 = vld [vmem:[%s9037_s9 + $0x48] ss:$16 sps:$4 sm:$0xff]  }
 0xbb2   :  { %v3253_v26 = vpop.f32.mrf.mxu1 }
 0xbb3   :  { %v6962_v26 = vld [vmem:[%s9037_s9 + $0x24] ss:$16 sps:$4 sm:$0xff]  }
 0xbb4   :  { %v6624_v28 = vpop.f32.mrf.mxu1 }
 0xbb5   :  { %v6965_v28 = vld [vmem:[%s9037_s9 + $0x2c] ss:$16 sps:$4 sm:$0xff]  }
 0xbb6   :  { %v3419_v29 = vpop.f32.mrf.mxu1 }
 0xbb7   :  { %v3425_v30 = vpack.c.bf16 %v3419_v29, %v3419_v29  ;;  %v6960_v29 = vld [vmem:[%s9037_s9 + $0x20] ss:$16 sps:$4 sm:$0xff]  }
 0xbb8   :  { %v6651_v31 = vpop.f32.mrf.mxu1 }
 0xbb9   :  { %6662 = vmatmul.mubr.msk.bf16.vlgmr.msra.gmra.mxu1 %vm3023_vm5, %v3425_v30  ;;  %v6963_v30 = vld [vmem:[%s9037_s9 + $0x28] ss:$16 sps:$4 sm:$0xff]   ;;  %v6971_v31 = vld [vmem:[%s9037_s9 + $0xc] ss:$16 sps:$4 sm:$0xff]  }
 0xbba   :  { %6686 = vmatpush3.bf16.msra.mxu1 %v8178_v61  ;;  %v3422_v32 = vpop.f32.mrf.mxu1  ;;  %6689 = vmatprep.mubr.msk.bf16.mxu1 %vm7198_vm3, %v7197_v38 }
 0xbbb   :  { %6687 = vmatprep.subr.bf16.mxu1 %v7197_v38  ;;  %v6966_v32 = vld [vmem:[%s9037_s9] ss:$16 sps:$4 sm:$0xff]  }
 0xbbc   :  { %v6652_v34 = vpop.f32.mrf.mxu1 }
 0xbbd   :  { %v6969_v34 = vld [vmem:[%s9037_s9 + $0x8] ss:$16 sps:$4 sm:$0xff]  }
 0xbbe   :  { %6688 = vmatpush3.bf16.msra.mxu1 %v8184_v33 }
 0xbbf   :  { %6693 = vmatprep.subr.bf16.mxu1 %v7197_v38 }
 0xbc1   :  { %6690 = vmatmul.mubr.msk.bf16.vlgmr.msra.gmra.mxu1 %vm2888_vm4, %v5950_v35  ;;  %v6974_v35 = vld [vmem:[%s9038_s11 + $0xe4] ss:$16 sps:$4 sm:$0xff]  }
 0xbc2   :  { %6694 = vmatpush3.bf16.msra.mxu1 %v6936_v40  ;;  %6701 = vmatprep.mubr.msk.bf16.mxu1 %vm7198_vm3, %v7197_v38  ;;  %v6977_v40 = vld [vmem:[%s9038_s11 + $0x2e4] ss:$16 sps:$4 sm:$0xff]  }
 0xbc3   :  { %6695 = vmatprep.subr.bf16.mxu1 %v7197_v38 }
 0xbc6   :  { %6696 = vmatpush3.bf16.msra.mxu1 %v6938_v41 }
 0xbc7   :  { %6697 = vmatprep.subr.bf16.mxu1 %v7197_v38 }
 0xbca   :  { %6698 = vmatpush3.bf16.msra.mxu1 %v6940_v46 }
 0xbcb   :  { %6699 = vmatprep.subr.bf16.mxu1 %v7197_v38 }
 0xbce   :  { %6700 = vmatpush3.bf16.msra.mxu1 %v6942_v44 }
 0xbcf   :  { %6725 = vmatprep.subr.bf16.mxu1 %v7197_v38 }
 0xc59   :  { %v3619_v37 = vpop.f32.mrf.mxu0 }
 0xc5b   :  { %v6683_v54 = vpop.f32.mrf.mxu0 }
 0xc5d   :  { %v3622_v51 = vpop.f32.mrf.mxu0 }
 0xc5f   :  { %v6684_v52 = vpop.f32.mrf.mxu0 }
 0xc60   :  { %v6972_v52 = vld [vmem:[%s9038_s11 + $0xe0] ss:$16 sps:$4 sm:$0xff]  }
 0xc61   :  { %v3788_v43 = vpop.f32.mrf.mxu0 }
 0xc62   :  { %v3794_v57 = vpack.c.bf16 %v3788_v43, %v3788_v43  ;;  %v6975_v43 = vld [vmem:[%s9038_s11 + $0x2e0] ss:$16 sps:$4 sm:$0xff]  }
 0xc63   :  { %v6711_v55 = vpop.f32.mrf.mxu0 }
 0xc64   :  { %6722 = vmatmul.mubr.msk.bf16.vlgmr.msra.gmra.mxu0 %vm3023_vm5, %v3794_v57  ;;  %v6980_v55 = vld [vmem:[%s9038_s11 + $0xc4] ss:$16 sps:$4 sm:$0xff]  }
 0xc65   :  { %v3791_v47 = vpop.f32.mrf.mxu0  ;;  %4159 = vmatprep.mubr.bf16.mxu0 %v7196_v39  ;;  %4136 = vmatpush1.bf16.msra.mxu0 %v6948_v11  ;;  %v7005_v11 = vld [vmem:[%s9038_s11 + $0x240] ss:$16 sps:$4 sm:$0xff]  }
 0xc66   :  { %v6983_v47 = vld [vmem:[%s9038_s11 + $0x2c4] ss:$16 sps:$4 sm:$0xff]  }
 0xc67   :  { %v6712_v53 = vpop.f32.mrf.mxu0 }
 0xc68   :  { %v6978_v53 = vld [vmem:[%s9038_s11 + $0xc0] ss:$16 sps:$4 sm:$0xff]  }
 0xc79   :  { %v3496_v63 = vpop.f32.mrf.mxu1 }
 0xc7a   :  { %v3502_v62 = vadd.f32 %v3496_v63, %v3379_v25  ;;  %v6981_v63 = vld [vmem:[%s9038_s11 + $0x2c0] ss:$16 sps:$4 sm:$0xff]  }
 0xc7b   :  { %v6663_v4 = vpop.f32.mrf.mxu1 }
 0xc7c   :  { %v3625_v45 = vadd.f32 %v3619_v37, %v3502_v62  ;;  %v6986_v62 = vld [vmem:[%s9038_s11 + $0xa4] ss:$16 sps:$4 sm:$0xff]  }
 0xc7d   :  { %v3499_v0 = vpop.f32.mrf.mxu1  ;;  %v6989_v4 = vld [vmem:[%s9038_s11 + $0x2a4] ss:$16 sps:$4 sm:$0xff]  }
 0xc7e   :  { %v6987_v0 = vld [vmem:[%s9038_s11 + $0x2a0] ss:$16 sps:$4 sm:$0xff]  }
 0xc7f   :  { %v6664_v50 = vpop.f32.mrf.mxu1 }
 0xc80   :  { %v6992_v50 = vld [vmem:[%s9038_s11 + $0x84] ss:$16 sps:$4 sm:$0xff]  }
 0xc81   :  { %v3665_v1 = vpop.f32.mrf.mxu1 }
 0xc82   :  { %v3671_v2 = vpack.c.bf16 %v3665_v1, %v3665_v1  ;;  %v6995_v1 = vld [vmem:[%s9038_s11 + $0x284] ss:$16 sps:$4 sm:$0xff]  }
 0xc83   :  { %v6691_v3 = vpop.f32.mrf.mxu1 }
 0xc84   :  { %6702 = vmatmul.mubr.msk.bf16.vlgmr.msra.gmra.mxu1 %vm3023_vm5, %v3671_v2  ;;  %v6990_v2 = vld [vmem:[%s9038_s11 + $0x80] ss:$16 sps:$4 sm:$0xff]  }
 0xc85   :  { %6726 = vmatpush3.bf16.msra.mxu1 %v8178_v61  ;;  %v3668_v6 = vpop.f32.mrf.mxu1  ;;  %6729 = vmatprep.mubr.msk.bf16.mxu1 %vm7198_vm3, %v7197_v38  ;;  %v6945_v61 = vld [vmem:[%s9034_s7 + $0x110] sm:$0xff]  }
 0xc86   :  { %6727 = vmatprep.subr.bf16.mxu1 %v7197_v38  ;;  %v6993_v3 = vld [vmem:[%s9038_s11 + $0x280] ss:$16 sps:$4 sm:$0xff]   ;;  %v6998_v6 = vld [vmem:[%s9038_s11 + $0x64] ss:$16 sps:$4 sm:$0xff]  }
 0xc87   :  { %v6692_v7 = vpop.f32.mrf.mxu1 }
 0xc88   :  { %v7001_v7 = vld [vmem:[%s9038_s11 + $0x264] ss:$16 sps:$4 sm:$0xff]  }
 0xc89   :  { %6728 = vmatpush3.bf16.msra.mxu1 %v8184_v33  ;;  %v6946_v33 = vld [vmem:[%s9034_s7 + $0x108] sm:$0xff]  }
 0xc8a   :  { %6733 = vmatprep.subr.bf16.mxu1 %v7197_v38 }
 0xc8c   :  { %6730 = vmatmul.mubr.msk.bf16.vlgmr.msra.gmra.mxu1 %vm2888_vm4, %v5980_v12  ;;  %v6996_v12 = vld [vmem:[%s9038_s11 + $0x60] ss:$16 sps:$4 sm:$0xff]  }
 0xc8d   :  { %6734 = vmatpush3.bf16.msra.mxu1 %v6944_v13  ;;  %6741 = vmatprep.mubr.msk.bf16.mxu1 %vm7198_vm3, %v7197_v38  ;;  %v6999_v13 = vld [vmem:[%s9038_s11 + $0x260] ss:$16 sps:$4 sm:$0xff]  }
 0xc8e   :  { %6735 = vmatprep.subr.bf16.mxu1 %v7197_v38 }
 0xc91   :  { %6736 = vmatpush3.bf16.msra.mxu1 %v6945_v61  ;;  %v7004_v61 = vld [vmem:[%s9038_s11 + $0x44] ss:$16 sps:$4 sm:$0xff]  }
 0xc92   :  { %6737 = vmatprep.subr.bf16.mxu1 %v7197_v38 }
 0xc95   :  { %6738 = vmatpush3.bf16.msra.mxu1 %v6946_v33  ;;  %v7007_v33 = vld [vmem:[%s9038_s11 + $0x244] ss:$16 sps:$4 sm:$0xff]  }
 0xc96   :  { %6739 = vmatprep.subr.bf16.mxu1 %v7197_v38  ;;  %v6956_v38 = vld [vmem:[%s9037_s9 + $0x44] ss:$16 sps:$4 sm:$0xff]  }
 0xc97   :  { %4137 = vmatprep.subr.bf16.mxu0 %v6956_v38  ;;  %v7008_v38 = vld [vmem:[%s9038_s11 + $0x20] ss:$16 sps:$4 sm:$0xff]  }
 0xc98   :  { %4138 = vmatpush1.bf16.msra.mxu0 %v6954_v60  ;;  %v7011_v60 = vld [vmem:[%s9038_s11 + $0x220] ss:$16 sps:$4 sm:$0xff]  }
 0xc99   :  { %6740 = vmatpush3.bf16.msra.mxu1 %v6947_v10  ;;  %4139 = vmatprep.subr.bf16.mxu0 %v6962_v26  ;;  %v7002_v10 = vld [vmem:[%s9038_s11 + $0x40] ss:$16 sps:$4 sm:$0xff]  }
 0xc9a   :  { %4176 = vmatprep.subr.bf16.mxu1 %v6953_v16  ;;  %v7013_v16 = vld [vmem:[%s9038_s11 + $0x224] ss:$16 sps:$4 sm:$0xff]   ;;  %v7038_v26 = vld [vmem:[%s9038_s11 + $0x180] ss:$16 sps:$4 sm:$0xff]  }
 0xc9c   :  { %4140 = vmatpush1.bf16.msra.mxu0 %v6960_v29  ;;  %v7046_v29 = vld [vmem:[%s9038_s11 + $0x164] ss:$16 sps:$4 sm:$0xff]  }
 0xd24   :  { %v3865_v9 = vpop.f32.mrf.mxu0 }
 0xd26   :  { %v6723_v14 = vpop.f32.mrf.mxu0 }
 0xd27   :  { %v7019_v14 = vld [vmem:[%s9038_s11 + $0x204] ss:$16 sps:$4 sm:$0xff]  }
 0xd28   :  { %v3868_v19 = vpop.f32.mrf.mxu0 }
 0xd29   :  { %v7014_v19 = vld [vmem:[%s9038_s11] ss:$16 sps:$4 sm:$0xff]  }
 0xd2a   :  { %v6724_v27 = vpop.f32.mrf.mxu0 }
 0xd2b   :  { %v7017_v27 = vld [vmem:[%s9038_s11 + $0x200] ss:$16 sps:$4 sm:$0xff]  }
 0xd44   :  { %v3742_v36 = vpop.f32.mrf.mxu1 }
 0xd45   :  { %v3748_v56 = vadd.f32 %v3742_v36, %v3625_v45  ;;  %v6984_v45 = vld [vmem:[%s9038_s11 + $0xa0] ss:$16 sps:$4 sm:$0xff]   ;;  %v7022_v36 = vld [vmem:[%s9038_s11 + $0x1e4] ss:$16 sps:$4 sm:$0xff]  }
 0xd46   :  { %v6703_v58 = vpop.f32.mrf.mxu1 }
 0xd47   :  { %v3871_v59 = vadd.f32 %v3865_v9, %v3748_v56  ;;  %v7016_v9 = vld [vmem:[%s9038_s11 + $0x4] ss:$16 sps:$4 sm:$0xff]   ;;  %v7020_v58 = vld [vmem:[%s9038_s11 + $0x1e0] ss:$16 sps:$4 sm:$0xff]  }
 0xd48   :  { %v3745_v5 = vpop.f32.mrf.mxu1  ;;  %v7025_v56 = vld [vmem:[%s9038_s11 + $0x3e4] ss:$16 sps:$4 sm:$0xff]  }
 0xd49   :  { %v7028_v5 = vld [vmem:[%s9038_s11 + $0x1c4] ss:$16 sps:$4 sm:$0xff]  }
 0xd4a   :  { %v6704_v8 = vpop.f32.mrf.mxu1 }
 0xd4b   :  { %v7031_v8 = vld [vmem:[%s9038_s11 + $0x3c4] ss:$16 sps:$4 sm:$0xff]  }
 0xd4c   :  { %v3911_v17 = vpop.f32.mrf.mxu1 }
 0xd4d   :  { %v3917_v20 = vpack.c.bf16 %v3911_v17, %v3911_v17  ;;  %v7026_v17 = vld [vmem:[%s9038_s11 + $0x1c0] ss:$16 sps:$4 sm:$0xff]  }
 0xd4e   :  { %v6731_v22 = vpop.f32.mrf.mxu1 }
 0xd4f   :  { %6742 = vmatmul.mubr.msk.bf16.vlgmr.msra.gmra.mxu1 %vm3023_vm5, %v3917_v20  ;;  %v7034_v20 = vld [vmem:[%s9038_s11 + $0x1a4] ss:$16 sps:$4 sm:$0xff]   ;;  %v7032_v22 = vld [vmem:[%s9038_s11 + $0x1a0] ss:$16 sps:$4 sm:$0xff]  }
 0xd50   :  { %v3914_v23 = vpop.f32.mrf.mxu1  ;;  %4177 = vmatpush1.bf16.msra.mxu1 %v6951_v18  ;;  %4200 = vmatprep.mubr.bf16.mxu1 %v7196_v39  ;;  %v6968_v39 = vld [vmem:[%s9037_s9 + $0x4] ss:$16 sps:$4 sm:$0xff]   ;;  %v7029_v18 = vld [vmem:[%s9038_s11 + $0x3c0] ss:$16 sps:$4 sm:$0xff]  }
 0xd51   :  { %4178 = vmatprep.subr.bf16.mxu1 %v6959_v21  ;;  %4141 = vmatprep.subr.bf16.mxu0 %v6968_v39  ;;  %v7037_v21 = vld [vmem:[%s9038_s11 + $0x3a4] ss:$16 sps:$4 sm:$0xff]   ;;  %v7035_v23 = vld [vmem:[%s9038_s11 + $0x3a0] ss:$16 sps:$4 sm:$0xff]  }
 0xd52   :  { %v6732_v25 = vpop.f32.mrf.mxu1  ;;  %4142 = vmatpush1.bf16.msra.mxu0 %v6966_v32  ;;  %v7044_v39 = vld [vmem:[%s9038_s11 + $0x160] ss:$16 sps:$4 sm:$0xff]   ;;  %v7052_v32 = vld [vmem:[%s9038_s11 + $0x144] ss:$16 sps:$4 sm:$0xff]  }
 0xd53   :  { %5011 = vmatprep.subr.bf16.mxu0 %v6974_v35  ;;  %v7043_v25 = vld [vmem:[%s9038_s11 + $0x384] ss:$16 sps:$4 sm:$0xff]   ;;  %v7050_v35 = vld [vmem:[%s9038_s11 + $0x140] ss:$16 sps:$4 sm:$0xff]  }
 0xd54   :  { %4179 = vmatpush1.bf16.msra.mxu1 %v6957_v24  ;;  %v7040_v24 = vld [vmem:[%s9038_s11 + $0x184] ss:$16 sps:$4 sm:$0xff]  }
 0xd55   :  { %4180 = vmatprep.subr.bf16.mxu1 %v6965_v28  ;;  %v7041_v28 = vld [vmem:[%s9038_s11 + $0x380] ss:$16 sps:$4 sm:$0xff]  }
 0xd58   :  { %4181 = vmatpush1.bf16.msra.mxu1 %v6963_v30  ;;  %v7049_v30 = vld [vmem:[%s9038_s11 + $0x364] ss:$16 sps:$4 sm:$0xff]  }
 0xd59   :  { %4182 = vmatprep.subr.bf16.mxu1 %v6971_v31  ;;  %v7047_v31 = vld [vmem:[%s9038_s11 + $0x360] ss:$16 sps:$4 sm:$0xff]  }
 0xd5c   :  { %4183 = vmatpush1.bf16.msra.mxu1 %v6969_v34  ;;  %v7055_v34 = vld [vmem:[%s9038_s11 + $0x344] ss:$16 sps:$4 sm:$0xff]  }
 0xd5d   :  { %5052 = vmatprep.subr.bf16.mxu1 %v6977_v40  ;;  %v7053_v40 = vld [vmem:[%s9038_s11 + $0x340] ss:$16 sps:$4 sm:$0xff]  }
 0xe0f   :  { %v3988_v41 = vpop.f32.mrf.mxu1 }
 0xe10   :  { %v3994_v46 = vadd.f32 %v3988_v41, %v3871_v59  ;;  %v7023_v59 = vld [vmem:[%s9038_s11 + $0x3e0] ss:$16 sps:$4 sm:$0xff]   ;;  %v7058_v41 = vld [vmem:[%s9038_s11 + $0x124] ss:$16 sps:$4 sm:$0xff]  }
 0xe11   :  { %v6743_v49 = vpop.f32.mrf.mxu1 }
 0xe12   :  { %v4002_v44 = vadd.f32 %v5995_v42, %v3994_v46  ;;  %v7061_v42 = vld [vmem:[%s9038_s11 + $0x324] ss:$16 sps:$4 sm:$0xff]   ;;  %v7056_v46 = vld [vmem:[%s9038_s11 + $0x120] ss:$16 sps:$4 sm:$0xff]  }
 0xe13   :  { %v3991_v48 = vpop.f32.mrf.mxu1  ;;  %v7059_v49 = vld [vmem:[%s9038_s11 + $0x320] ss:$16 sps:$4 sm:$0xff]  }
 0xe14   :  { %v4003_v37 = vmax.f32 %v4002_v44, 0.0  ;;  %v7064_v44 = vld [vmem:[%s9038_s11 + $0x104] ss:$16 sps:$4 sm:$0xff]  }
 0xe15   :  { %v6744_v54 = vpop.f32.mrf.mxu1  ;;  %v7067_v48 = vld [vmem:[%s9038_s11 + $0x304] ss:$16 sps:$4 sm:$0xff]  }
 0xe16   :  { %v4004_v51 = vmin.f32 %v4003_v37, 6.0  ;;  %v7062_v37 = vld [vmem:[%s9038_s11 + $0x100] ss:$16 sps:$4 sm:$0xff]  }
 0xe17   :  { %v7065_v54 = vld [vmem:[%s9038_s11 + $0x300] ss:$16 sps:$4 sm:$0xff]  }
 0xe18   :  { %v4005_v57 = vpack.c.bf16 %v4004_v51, %v4004_v51  ;;  %v7070_v51 = vld [vmem:[%s9038_s11 + $0xec] ss:$16 sps:$4 sm:$0xff]  }
 0xe1a   :  { %6012 = vmatmul.mubr.msk.bf16.vlgmr.msra.gmra.mxu0 %vm3023_vm5, %v4005_v57  ;;  %6013 = vmatmul.mubr.msk.bf16.vlgmr.msra.gmra.mxu1 %vm3023_vm5, %v4005_v57 }
 0xe1b   :  { %5012 = vmatpush1.bf16.msra.mxu0 %v6972_v52  ;;  %5053 = vmatpush1.bf16.msra.mxu1 %v6975_v43  ;;  %v7073_v52 = vld [vmem:[%s9038_s11 + $0x2ec] ss:$16 sps:$4 sm:$0xff]   ;;  %v4024_v43 = vlaneseq }
 0xe1c   :  { %5013 = vmatprep.subr.bf16.mxu0 %v6980_v55  ;;  %5054 = vmatprep.subr.bf16.mxu1 %v6983_v47 }
 0xe1d   :  { %v8695_v57 = vshrl.u32 %v4024_v43, 7 }
 0xe1f   :  { %5014 = vmatpush1.bf16.msra.mxu0 %v6978_v53  ;;  %5055 = vmatpush1.bf16.msra.mxu1 %v6981_v63  ;;  %v4026_v55 = vsub.s32 0, %v8695_v57  ;;  %v4034_v47 = vsub.s32 2, %v8695_v57  ;;  %v4022_v53 = vld [vmem:[%s9041_s10] sm:$0xf]  ;;  %v4030_v63 = vsub.s32 1, %v8695_v57  ;;  %vm5534_vm6 = vcmp.lt.s32.totalorder %v8695_v57, 2 }
 0xe20   :  { %5015 = vmatprep.subr.bf16.mxu0 %v6986_v62  ;;  %5056 = vmatprep.subr.bf16.mxu1 %v6989_v4  ;;  %v4038_v62 = vsub.s32 3, %v8695_v57 }
 0xe21   :  { %v4027_v4 = vrot.slane %v4022_v53, %v4026_v55 }
 0xe23   :  { %5016 = vmatpush1.bf16.msra.mxu0 %v6984_v45  ;;  %5057 = vmatpush1.bf16.msra.mxu1 %v6987_v0  ;;  %v4035_v45 = vrot.slane %v4022_v53, %v4034_v47  ;;  %v4031_v0 = vrot.slane %v4022_v53, %v4030_v63 }
 0xe24   :  { %5017 = vmatprep.subr.bf16.mxu0 %v6992_v50  ;;  %5058 = vmatprep.subr.bf16.mxu1 %v6995_v1  ;;  %v4039_v50 = vrot.slane %v4022_v53, %v4038_v62  ;;  %v7113_v53 = vld [vmem:[%s9038_s11 + $0x208] ss:$16 sps:$4 sm:$0xff]  }
 0xe27   :  { %5018 = vmatpush1.bf16.msra.mxu0 %v6990_v2  ;;  %5059 = vmatpush1.bf16.msra.mxu1 %v6993_v3 }
 0xe28   :  { %5019 = vmatprep.subr.bf16.mxu0 %v6998_v6  ;;  %5060 = vmatprep.subr.bf16.mxu1 %v7001_v7 }
 0xe2b   :  { %5020 = vmatpush1.bf16.msra.mxu0 %v6996_v12  ;;  %5061 = vmatpush1.bf16.msra.mxu1 %v6999_v13 }
 0xe2c   :  { %5021 = vmatprep.subr.bf16.mxu0 %v7004_v61  ;;  %5062 = vmatprep.subr.bf16.mxu1 %v7007_v33 }
 0xe2f   :  { %5022 = vmatpush1.bf16.msra.mxu0 %v7002_v10  ;;  %5063 = vmatpush1.bf16.msra.mxu1 %v7005_v11 }
 0xe30   :  { %5023 = vmatprep.subr.bf16.mxu0 %v7010_v15  ;;  %5064 = vmatprep.subr.bf16.mxu1 %v7013_v16 }
 0xe33   :  { %5024 = vmatpush1.bf16.msra.mxu0 %v7008_v38  ;;  %5065 = vmatpush1.bf16.msra.mxu1 %v7011_v60 }
 0xe34   :  { %5025 = vmatprep.subr.bf16.mxu0 %v7016_v9  ;;  %5066 = vmatprep.subr.bf16.mxu1 %v7019_v14 }
 0xe37   :  { %5026 = vmatpush1.bf16.msra.mxu0 %v7014_v19  ;;  %5067 = vmatpush1.bf16.msra.mxu1 %v7017_v27 }
 0xe38   :  { %5027 = vmatprep.subr.bf16.mxu0 %v7022_v36  ;;  %5068 = vmatprep.subr.bf16.mxu1 %v7025_v56 }
 0xe3b   :  { %5028 = vmatpush2.bf16.msra.mxu0 %v7020_v58  ;;  %5069 = vmatpush2.bf16.msra.mxu1 %v7023_v59  ;;  %v7068_v59 = vld [vmem:[%s9038_s11 + $0xe8] ss:$16 sps:$4 sm:$0xff]  }
 0xe3c   :  { %5029 = vmatprep.subr.bf16.mxu0 %v7028_v5  ;;  %5070 = vmatprep.subr.bf16.mxu1 %v7031_v8  ;;  %v7071_v5 = vld [vmem:[%s9038_s11 + $0x2e8] ss:$16 sps:$4 sm:$0xff]  }
 0xe3f   :  { %5030 = vmatpush2.bf16.msra.mxu0 %v7026_v17  ;;  %5071 = vmatpush2.bf16.msra.mxu1 %v7029_v18  ;;  %v7076_v18 = vld [vmem:[%s9038_s11 + $0xcc] ss:$16 sps:$4 sm:$0xff]  }
 0xe40   :  { %5031 = vmatprep.subr.bf16.mxu0 %v7034_v20  ;;  %5072 = vmatprep.subr.bf16.mxu1 %v7037_v21  ;;  %v7079_v20 = vld [vmem:[%s9038_s11 + $0x2cc] ss:$16 sps:$4 sm:$0xff]   ;;  %v7074_v21 = vld [vmem:[%s9038_s11 + $0xc8] ss:$16 sps:$4 sm:$0xff]  }
 0xe43   :  { %5032 = vmatpush2.bf16.msra.mxu0 %v7032_v22  ;;  %5073 = vmatpush2.bf16.msra.mxu1 %v7035_v23  ;;  %v7077_v22 = vld [vmem:[%s9038_s11 + $0x2c8] ss:$16 sps:$4 sm:$0xff]   ;;  %v7082_v23 = vld [vmem:[%s9038_s11 + $0xac] ss:$16 sps:$4 sm:$0xff]  }
 0xe44   :  { %5033 = vmatprep.subr.bf16.mxu0 %v7040_v24  ;;  %5074 = vmatprep.subr.bf16.mxu1 %v7043_v25  ;;  %v7085_v24 = vld [vmem:[%s9038_s11 + $0x2ac] ss:$16 sps:$4 sm:$0xff]   ;;  %v7080_v25 = vld [vmem:[%s9038_s11 + $0xa8] ss:$16 sps:$4 sm:$0xff]  }
 0xe47   :  { %5034 = vmatpush2.bf16.msra.mxu0 %v7038_v26  ;;  %5075 = vmatpush2.bf16.msra.mxu1 %v7041_v28  ;;  %v7083_v26 = vld [vmem:[%s9038_s11 + $0x2a8] ss:$16 sps:$4 sm:$0xff]   ;;  %v7088_v28 = vld [vmem:[%s9038_s11 + $0x8c] ss:$16 sps:$4 sm:$0xff]  }
 0xe48   :  { %5035 = vmatprep.subr.bf16.mxu0 %v7046_v29  ;;  %5076 = vmatprep.subr.bf16.mxu1 %v7049_v30  ;;  %v7091_v29 = vld [vmem:[%s9038_s11 + $0x28c] ss:$16 sps:$4 sm:$0xff]   ;;  %v7086_v30 = vld [vmem:[%s9038_s11 + $0x88] ss:$16 sps:$4 sm:$0xff]  }
 0xe4b   :  { %5036 = vmatpush2.bf16.msra.mxu0 %v7044_v39  ;;  %5077 = vmatpush2.bf16.msra.mxu1 %v7047_v31  ;;  %v7089_v39 = vld [vmem:[%s9038_s11 + $0x288] ss:$16 sps:$4 sm:$0xff]   ;;  %v7094_v31 = vld [vmem:[%s9038_s11 + $0x6c] ss:$16 sps:$4 sm:$0xff]  }
 0xe4c   :  { %5037 = vmatprep.subr.bf16.mxu0 %v7052_v32  ;;  %5078 = vmatprep.subr.bf16.mxu1 %v7055_v34  ;;  %v7097_v32 = vld [vmem:[%s9038_s11 + $0x26c] ss:$16 sps:$4 sm:$0xff]   ;;  %v7092_v34 = vld [vmem:[%s9038_s11 + $0x68] ss:$16 sps:$4 sm:$0xff]  }
 0xe4f   :  { %5038 = vmatpush2.bf16.msra.mxu0 %v7050_v35  ;;  %5079 = vmatpush2.bf16.msra.mxu1 %v7053_v40  ;;  %v7095_v35 = vld [vmem:[%s9038_s11 + $0x268] ss:$16 sps:$4 sm:$0xff]   ;;  %v7100_v40 = vld [vmem:[%s9038_s11 + $0x4c] ss:$16 sps:$4 sm:$0xff]  }
 0xe50   :  { %5039 = vmatprep.subr.bf16.mxu0 %v7058_v41  ;;  %5080 = vmatprep.subr.bf16.mxu1 %v7061_v42  ;;  %v7103_v41 = vld [vmem:[%s9038_s11 + $0x24c] ss:$16 sps:$4 sm:$0xff]   ;;  %v7098_v42 = vld [vmem:[%s9038_s11 + $0x48] ss:$16 sps:$4 sm:$0xff]  }
 0xe53   :  { %5040 = vmatpush2.bf16.msra.mxu0 %v7056_v46  ;;  %5081 = vmatpush2.bf16.msra.mxu1 %v7059_v49  ;;  %v7101_v46 = vld [vmem:[%s9038_s11 + $0x248] ss:$16 sps:$4 sm:$0xff]   ;;  %v7106_v49 = vld [vmem:[%s9038_s11 + $0x2c] ss:$16 sps:$4 sm:$0xff]  }
 0xe54   :  { %5041 = vmatprep.subr.bf16.mxu0 %v7064_v44  ;;  %5082 = vmatprep.subr.bf16.mxu1 %v7067_v48  ;;  %v7109_v44 = vld [vmem:[%s9038_s11 + $0x22c] ss:$16 sps:$4 sm:$0xff]   ;;  %v7104_v48 = vld [vmem:[%s9038_s11 + $0x28] ss:$16 sps:$4 sm:$0xff]  }
 0xe57   :  { %5042 = vmatpush2.bf16.msra.mxu0 %v7062_v37  ;;  %5083 = vmatpush2.bf16.msra.mxu1 %v7065_v54  ;;  %v7107_v37 = vld [vmem:[%s9038_s11 + $0x228] ss:$16 sps:$4 sm:$0xff]   ;;  %v7112_v54 = vld [vmem:[%s9038_s11 + $0xc] ss:$16 sps:$4 sm:$0xff]  }
 0xe58   :  { %5093 = vmatprep.subr.bf16.mxu0 %v7070_v51  ;;  %5134 = vmatprep.subr.bf16.mxu1 %v7073_v52  ;;  %v7115_v51 = vld [vmem:[%s9038_s11 + $0x20c] ss:$16 sps:$4 sm:$0xff]   ;;  %v7110_v52 = vld [vmem:[%s9038_s11 + $0x8] ss:$16 sps:$4 sm:$0xff]  }
 0xeda   :  { %v4161_v1 = vpop.f32.mrf.mxu0  ;;  %v4202_v2 = vpop.f32.mrf.mxu1 }
 0xedb   :  { %v4162_v3 = vadd.f32 %v4161_v1, %v4027_v4  ;;  %v4203_v6 = vadd.f32 %v4202_v2, %v4035_v45  ;;  %v7118_v4 = vld [vmem:[%s9038_s11 + $0x1ec] ss:$16 sps:$4 sm:$0xff]  }
 0xedc   :  { %v4163_v7 = vpop.f32.mrf.mxu0  ;;  %v4204_v12 = vpop.f32.mrf.mxu1  ;;  %v7121_v45 = vld [vmem:[%s9038_s11 + $0x3ec] ss:$16 sps:$4 sm:$0xff]  }
 0xedd   :  { %v4209_v13 = vmax.f32 %v4162_v3, 0.0  ;;  %v4211_v61 = vmax.f32 %v4203_v6, 0.0  ;;  %v4164_v33 = vadd.f32 %v4163_v7, %v4031_v0  ;;  %v4205_v10 = vadd.f32 %v4204_v12, %v4039_v50  ;;  %v7116_v0 = vld [vmem:[%s9038_s11 + $0x1e8] ss:$16 sps:$4 sm:$0xff]   ;;  %v7124_v1 = vld [vmem:[%s9038_s11 + $0x1cc] ss:$16 sps:$4 sm:$0xff]  }
 0xede   :  { %v4165_v11 = vpop.f32.mrf.mxu0  ;;  %v4206_v15 = vpop.f32.mrf.mxu1  ;;  %v7119_v50 = vld [vmem:[%s9038_s11 + $0x3e8] ss:$16 sps:$4 sm:$0xff]   ;;  %v7127_v2 = vld [vmem:[%s9038_s11 + $0x3cc] ss:$16 sps:$4 sm:$0xff]  }
 0xedf   :  { %v4210_v16 = vmax.f32 %v4164_v33, 0.0  ;;  %v4212_v38 = vmax.f32 %v4205_v10, 0.0  ;;  %v4213_v60 = vmin.f32 %v4209_v13, 6.0  ;;  %v4215_v9 = vmin.f32 %v4211_v61, 6.0  ;;  %v7122_v3 = vld [vmem:[%s9038_s11 + $0x1c8] ss:$16 sps:$4 sm:$0xff]  }
 0xee0   :  { %v4166_v14 = vpop.f32.mrf.mxu0  ;;  %v4207_v19 = vpop.f32.mrf.mxu1  ;;  %v7125_v6 = vld [vmem:[%s9038_s11 + $0x3c8] ss:$16 sps:$4 sm:$0xff]   ;;  %v7130_v7 = vld [vmem:[%s9038_s11 + $0x1ac] ss:$16 sps:$4 sm:$0xff]  }
 0xee1   :  { %v4214_v27 = vmin.f32 %v4210_v16, 6.0  ;;  %v4216_v36 = vmin.f32 %v4212_v38, 6.0  ;;  %v8718_v8 = vpack.c.bf16 %v4213_v60, %v4213_v60  ;;  %v8720_v17 = vpack.c.bf16 %v4215_v9, %v4215_v9  ;;  %v7133_v12 = vld [vmem:[%s9038_s11 + $0x3ac] ss:$16 sps:$4 sm:$0xff]   ;;  %v7128_v13 = vld [vmem:[%s9038_s11 + $0x1a8] ss:$16 sps:$4 sm:$0xff]  }
 0xee2   :  { %v7131_v61 = vld [vmem:[%s9038_s11 + $0x3a8] ss:$16 sps:$4 sm:$0xff]   ;;  %v7136_v33 = vld [vmem:[%s9038_s11 + $0x18c] ss:$16 sps:$4 sm:$0xff]  }
 0xee3   :  { %v4218_v56 = vpack.c.bf16 %v4214_v27, %v4214_v27  ;;  %v4220_v58 = vpack.c.bf16 %v4216_v36, %v4216_v36  ;;  %v7139_v10 = vld [vmem:[%s9038_s11 + $0x38c] ss:$16 sps:$4 sm:$0xff]   ;;  %v7134_v11 = vld [vmem:[%s9038_s11 + $0x188] ss:$16 sps:$4 sm:$0xff]  }
 0xee4   :  { %v7137_v15 = vld [vmem:[%s9038_s11 + $0x388] ss:$16 sps:$4 sm:$0xff]   ;;  %v7142_v16 = vld [vmem:[%s9038_s11 + $0x16c] ss:$16 sps:$4 sm:$0xff]  }
 0xee5   :  { %5043 = vmatprep.mubr.bf16.mxu0 %v4218_v56  ;;  %5084 = vmatprep.mubr.bf16.mxu1 %v4220_v58  ;;  %v7145_v38 = vld [vmem:[%s9038_s11 + $0x36c] ss:$16 sps:$4 sm:$0xff]   ;;  %v7140_v60 = vld [vmem:[%s9038_s11 + $0x168] ss:$16 sps:$4 sm:$0xff]  }
 0xee6   :  { %5044 = vmatmul.mubr.bf16.vlgmr.msra.gmra.mxu0 %v8718_v8  ;;  %5085 = vmatmul.mubr.bf16.vlgmr.msra.gmra.mxu1 %v8720_v17  ;;  %v7143_v9 = vld [vmem:[%s9038_s11 + $0x368] ss:$16 sps:$4 sm:$0xff]   ;;  %v7148_v14 = vld [vmem:[%s9038_s11 + $0x14c] ss:$16 sps:$4 sm:$0xff]  }
 0xee7   :  { %5094 = vmatpush1.bf16.msra.mxu0 %v7068_v59  ;;  %5135 = vmatpush1.bf16.msra.mxu1 %v7071_v5  ;;  %v7151_v19 = vld [vmem:[%s9038_s11 + $0x34c] ss:$16 sps:$4 sm:$0xff]   ;;  %v7146_v27 = vld [vmem:[%s9038_s11 + $0x148] ss:$16 sps:$4 sm:$0xff]  }
 0xee8   :  { %5125 = vmatprep.mubr.bf16.mxu0 %v4218_v56  ;;  %5166 = vmatprep.mubr.bf16.mxu1 %v4220_v58  ;;  %v7149_v36 = vld [vmem:[%s9038_s11 + $0x348] ss:$16 sps:$4 sm:$0xff]   ;;  %v7154_v56 = vld [vmem:[%s9038_s11 + $0x12c] ss:$16 sps:$4 sm:$0xff]  }
 0xee9   :  { %5095 = vmatprep.subr.bf16.mxu0 %v7076_v18  ;;  %5136 = vmatprep.subr.bf16.mxu1 %v7079_v20  ;;  %v7157_v58 = vld [vmem:[%s9038_s11 + $0x32c] ss:$16 sps:$4 sm:$0xff]   ;;  %v7152_v59 = vld [vmem:[%s9038_s11 + $0x128] ss:$16 sps:$4 sm:$0xff]  }
 0xeea   :  { %v7155_v5 = vld [vmem:[%s9038_s11 + $0x328] ss:$16 sps:$4 sm:$0xff]   ;;  %v7160_v18 = vld [vmem:[%s9038_s11 + $0x10c] ss:$16 sps:$4 sm:$0xff]  }
 0xeeb   :  { %5096 = vmatpush1.bf16.msra.mxu0 %v7074_v21  ;;  %5137 = vmatpush1.bf16.msra.mxu1 %v7077_v22  ;;  %v7163_v20 = vld [vmem:[%s9038_s11 + $0x30c] ss:$16 sps:$4 sm:$0xff]   ;;  %v7158_v21 = vld [vmem:[%s9038_s11 + $0x108] ss:$16 sps:$4 sm:$0xff]  }
 0xeec   :  { %5097 = vmatprep.subr.bf16.mxu0 %v7082_v23  ;;  %5138 = vmatprep.subr.bf16.mxu1 %v7085_v24  ;;  %v7161_v22 = vld [vmem:[%s9038_s11 + $0x308] ss:$16 sps:$4 sm:$0xff]  }
 0xeed   :  { %v7164_v23 = vld [vmem:[%s9040_s13 + $0x78] sm:$0xff]  }
 0xeee   :  { %v7165_v24 = vld [vmem:[%s9040_s13 + $0x38] sm:$0xff]  }
 0xeef   :  { %5098 = vmatpush1.bf16.msra.mxu0 %v7080_v25  ;;  %5139 = vmatpush1.bf16.msra.mxu1 %v7083_v26  ;;  %v7166_v25 = vld [vmem:[%s9040_s13 + $0x70] sm:$0xff]  }
 0xef0   :  { %5099 = vmatprep.subr.bf16.mxu0 %v7088_v28  ;;  %5140 = vmatprep.subr.bf16.mxu1 %v7091_v29  ;;  %v7167_v26 = vld [vmem:[%s9040_s13 + $0x30] sm:$0xff]   ;;  %v7168_v28 = vld [vmem:[%s9040_s13 + $0x68] sm:$0xff]  }
 0xef1   :  { %v7169_v29 = vld [vmem:[%s9040_s13 + $0x28] sm:$0xff]  }
 0xef3   :  { %5100 = vmatpush1.bf16.msra.mxu0 %v7086_v30  ;;  %5141 = vmatpush1.bf16.msra.mxu1 %v7089_v39  ;;  %v7172_v30 = vld [vmem:[%s9040_s13 + $0x58] sm:$0xff]  }
 0xef4   :  { %5101 = vmatprep.subr.bf16.mxu0 %v7094_v31  ;;  %5142 = vmatprep.subr.bf16.mxu1 %v7097_v32  ;;  %v7173_v39 = vld [vmem:[%s9040_s13 + $0x18] sm:$0xff]   ;;  %v7174_v31 = vld [vmem:[%s9040_s13 + $0x50] sm:$0xff]  }
 0xef5   :  { %v7180_v32 = vld [vmem:[%s9040_s13 + $0xf8] sm:$0xff]  }
 0xef7   :  { %5102 = vmatpush1.bf16.msra.mxu0 %v7092_v34  ;;  %5143 = vmatpush1.bf16.msra.mxu1 %v7095_v35  ;;  %v7181_v34 = vld [vmem:[%s9040_s13 + $0xb8] sm:$0xff]   ;;  %v7182_v35 = vld [vmem:[%s9040_s13 + $0xf0] sm:$0xff]  }
 0xef8   :  { %5103 = vmatprep.subr.bf16.mxu0 %v7100_v40  ;;  %5144 = vmatprep.subr.bf16.mxu1 %v7103_v41  ;;  %v7175_v40 = vld [vmem:[%s9040_s13 + $0x10] sm:$0xff]  }
 0xef9   :  { %v7183_v41 = vld [vmem:[%s9040_s13 + $0xb0] sm:$0xff]  }
 0xefb   :  { %5104 = vmatpush1.bf16.msra.mxu0 %v7098_v42  ;;  %5145 = vmatpush1.bf16.msra.mxu1 %v7101_v46  ;;  %v7176_v42 = vld [vmem:[%s9040_s13 + $0x48] sm:$0xff]  }
 0xefc   :  { %5105 = vmatprep.subr.bf16.mxu0 %v7106_v49  ;;  %5146 = vmatprep.subr.bf16.mxu1 %v7109_v44  ;;  %v7184_v46 = vld [vmem:[%s9040_s13 + $0xe8] sm:$0xff]  }
 0xefd   :  { %v7177_v49 = vld [vmem:[%s9040_s13 + $0x8] sm:$0xff]  }
 0xefe   :  { %v7185_v44 = vld [vmem:[%s9040_s13 + $0xa8] sm:$0xff]  }
 0xeff   :  { %5106 = vmatpush1.bf16.msra.mxu0 %v7104_v48  ;;  %5147 = vmatpush1.bf16.msra.mxu1 %v7107_v37  ;;  %v7178_v48 = vld [vmem:[%s9040_s13 + $0x40] sm:$0xff]  }
 0xf00   :  { %5107 = vmatprep.subr.bf16.mxu0 %v7112_v54  ;;  %5148 = vmatprep.subr.bf16.mxu1 %v7115_v51  ;;  %v7186_v37 = vld [vmem:[%s9040_s13 + $0xe0] sm:$0xff]  }
 0xf01   :  { %v7179_v54 = vld [vmem:[%s9040_s13] sm:$0xff]  }
 0xf02   :  { %v7187_v51 = vld [vmem:[%s9040_s13 + $0xa0] sm:$0xff]  }
 0xf03   :  { %5108 = vmatpush1.bf16.msra.mxu0 %v7110_v52  ;;  %5149 = vmatpush1.bf16.msra.mxu1 %v7113_v53  ;;  %v7188_v52 = vld [vmem:[%s9040_s13 + $0xd8] sm:$0xff]  }
 0xf04   :  { %5109 = vmatprep.subr.bf16.mxu0 %v7118_v4  ;;  %5150 = vmatprep.subr.bf16.mxu1 %v7121_v45  ;;  %v7189_v53 = vld [vmem:[%s9040_s13 + $0x98] sm:$0xff]   ;;  %v7190_v4 = vld [vmem:[%s9040_s13 + $0xd0] sm:$0xff]  }
 0xf05   :  { %v7191_v45 = vld [vmem:[%s9040_s13 + $0x90] sm:$0xff]  }
 0xf07   :  { %5110 = vmatpush2.bf16.msra.mxu0 %v7116_v0  ;;  %5151 = vmatpush2.bf16.msra.mxu1 %v7119_v50  ;;  %v7192_v0 = vld [vmem:[%s9040_s13 + $0xc8] sm:$0xff]  }
 0xf08   :  { %5111 = vmatprep.subr.bf16.mxu0 %v7124_v1  ;;  %5152 = vmatprep.subr.bf16.mxu1 %v7127_v2  ;;  %v7193_v50 = vld [vmem:[%s9040_s13 + $0x88] sm:$0xff]   ;;  %v7194_v1 = vld [vmem:[%s9040_s13 + $0xc0] sm:$0xff]  }
 0xf09   :  { %v7195_v2 = vld [vmem:[%s9040_s13 + $0x80] sm:$0xff]  }
 0xf0b   :  { %5112 = vmatpush2.bf16.msra.mxu0 %v7122_v3  ;;  %5153 = vmatpush2.bf16.msra.mxu1 %v7125_v6  ;;  %v4349_v3 = vld [vmem:[%s9042_s12] sm:$0xf] }
 0xf0c   :  { %5113 = vmatprep.subr.bf16.mxu0 %v7130_v7  ;;  %5154 = vmatprep.subr.bf16.mxu1 %v7133_v12  ;;  %v4354_v6 = vrot.slane %v4349_v3, %v4026_v55  ;;  %v4358_v7 = vrot.slane %v4349_v3, %v4030_v63  ;;  %v4362_v63 = vrot.slane %v4349_v3, %v4034_v47 }
 0xf0f   :  { %5114 = vmatpush2.bf16.msra.mxu0 %v7128_v13  ;;  %5155 = vmatpush2.bf16.msra.mxu1 %v7131_v61 }
 0xf10   :  { %5115 = vmatprep.subr.bf16.mxu0 %v7136_v33  ;;  %5156 = vmatprep.subr.bf16.mxu1 %v7139_v10 }
 0xf13   :  { %5116 = vmatpush2.bf16.msra.mxu0 %v7134_v11  ;;  %5157 = vmatpush2.bf16.msra.mxu1 %v7137_v15 }
 0xf14   :  { %5117 = vmatprep.subr.bf16.mxu0 %v7142_v16  ;;  %5158 = vmatprep.subr.bf16.mxu1 %v7145_v38 }
 0xf17   :  { %5118 = vmatpush2.bf16.msra.mxu0 %v7140_v60  ;;  %5159 = vmatpush2.bf16.msra.mxu1 %v7143_v9 }
 0xf18   :  { %5119 = vmatprep.subr.bf16.mxu0 %v7148_v14  ;;  %5160 = vmatprep.subr.bf16.mxu1 %v7151_v19 }
 0xf1b   :  { %5120 = vmatpush2.bf16.msra.mxu0 %v7146_v27  ;;  %5161 = vmatpush2.bf16.msra.mxu1 %v7149_v36 }
 0xf1c   :  { %5121 = vmatprep.subr.bf16.mxu0 %v7154_v56  ;;  %5162 = vmatprep.subr.bf16.mxu1 %v7157_v58 }
 0xf1f   :  { %5122 = vmatpush2.bf16.msra.mxu0 %v7152_v59  ;;  %5163 = vmatpush2.bf16.msra.mxu1 %v7155_v5  ;;  %v4366_v59 = vrot.slane %v4349_v3, %v4038_v62  ;;  %v7199_v62 = vmov 5  }
 0xf20   :  { %5123 = vmatprep.subr.bf16.mxu0 %v7160_v18  ;;  %5164 = vmatprep.subr.bf16.mxu1 %v7163_v20 }
 0xf21   :  { %6751 = vset.pattern.permute.xlu0 %v7199_v62 }
 0xf23   :  { %5124 = vmatpush2.bf16.msra.mxu0 %v7158_v21  ;;  %5165 = vmatpush2.bf16.msra.mxu1 %v7161_v22 }
 0xf24   :  { %6393 = vmatprep.subr.bf16.mxu0 %v7164_v23  ;;  %6415 = vmatprep.subr.bf16.mxu1 %v7180_v32 }
 0xf26   :  { %5126 = vmatmul.mubr.bf16.vlgmr.msra.gmra.mxu0 %v8718_v8  ;;  %5167 = vmatmul.mubr.bf16.vlgmr.msra.gmra.mxu1 %v8720_v17  ;;  %v7170_v8 = vld [vmem:[%s9040_s13 + $0x60] sm:$0xff]  }
 0xf27   :  { %6394 = vmatpush3.bf16.msra.mxu0 %v7165_v24  ;;  %v7171_v17 = vld [vmem:[%s9040_s13 + $0x20] sm:$0xff]   ;;  %6416 = vmatpush3.bf16.msra.mxu1 %v7181_v34 }
 0xf28   :  { %6395 = vmatprep.subr.bf16.mxu0 %v7166_v25  ;;  %6417 = vmatprep.subr.bf16.mxu1 %v7182_v35 }
 0xf2b   :  { %6396 = vmatpush3.bf16.msra.mxu0 %v7167_v26  ;;  %6418 = vmatpush3.bf16.msra.mxu1 %v7183_v41 }
 0xf2c   :  { %6397 = vmatprep.subr.bf16.mxu0 %v7168_v28  ;;  %6419 = vmatprep.subr.bf16.mxu1 %v7184_v46 }
 0xf2f   :  { %6398 = vmatpush3.bf16.msra.mxu0 %v7169_v29  ;;  %6420 = vmatpush3.bf16.msra.mxu1 %v7185_v44 }
 0xf30   :  { %6399 = vmatprep.subr.bf16.mxu0 %v7170_v8  ;;  %6421 = vmatprep.subr.bf16.mxu1 %v7186_v37 }
 0xf33   :  { %6400 = vmatpush3.bf16.msra.mxu0 %v7171_v17  ;;  %6422 = vmatpush3.bf16.msra.mxu1 %v7187_v51 }
 0xf34   :  { %6401 = vmatprep.subr.bf16.mxu0 %v7172_v30  ;;  %6423 = vmatprep.subr.bf16.mxu1 %v7188_v52 }
 0xf37   :  { %6402 = vmatpush3.bf16.msra.mxu0 %v7173_v39  ;;  %6424 = vmatpush3.bf16.msra.mxu1 %v7189_v53 }
 0xf38   :  { %6403 = vmatprep.subr.bf16.mxu0 %v7174_v31  ;;  %6425 = vmatprep.subr.bf16.mxu1 %v7190_v4 }
 0xf3b   :  { %6404 = vmatpush3.bf16.msra.mxu0 %v7175_v40  ;;  %6426 = vmatpush3.bf16.msra.mxu1 %v7191_v45 }
 0xf3c   :  { %6405 = vmatprep.subr.bf16.mxu0 %v7176_v42  ;;  %6427 = vmatprep.subr.bf16.mxu1 %v7192_v0  ;;  %v5533_v42 = vand.u32 127, %v4024_v43 }
 0xf3e   :  { %vm5535_vm7 = vcmp.lt.s32.totalorder %v5533_v42, 5 }
 0xf3f   :  { %6406 = vmatpush3.bf16.msra.mxu0 %v7177_v49  ;;  %6428 = vmatpush3.bf16.msra.mxu1 %v7193_v50  ;;  %v6142_v49 = vld [vmem:[%s9043_s14] ss:$0 sm:$0xff]  ;;  %vm9018_vm8 = vmand %vm5534_vm6, %vm5535_vm7 }
 0xf40   :  { %6407 = vmatprep.subr.bf16.mxu0 %v7178_v48  ;;  %6429 = vmatprep.subr.bf16.mxu1 %v7194_v1 }
 0xf43   :  { %6408 = vmatpush3.bf16.msra.mxu0 %v7179_v54  ;;  %6430 = vmatpush3.bf16.msra.mxu1 %v7195_v2 }
 0xfa6   :  { %v5045_v12 = vpop.f32.mrf.mxu0  ;;  %v5086_v13 = vpop.f32.mrf.mxu1 }
 0xfa7   :  { %v5046_v61 = vadd.f32 %v5045_v12, %v4354_v6 }
 0xfa8   :  { %v5047_v33 = vpop.f32.mrf.mxu0  ;;  %v5088_v10 = vpop.f32.mrf.mxu1 }
 0xfa9   :  { %v5087_v11 = vadd.f32 %v5086_v13, %v5046_v61  ;;  %v5048_v15 = vadd.f32 %v5047_v33, %v4358_v7 }
 0xfaa   :  { %v5049_v16 = vpop.f32.mrf.mxu0  ;;  %v5090_v38 = vpop.f32.mrf.mxu1 }
 0xfab   :  { %v5175_v60 = vmax.f32 %v5087_v11, 0.0  ;;  %v5089_v9 = vadd.f32 %v5088_v10, %v5048_v15 }
 0xfac   :  { %v5050_v14 = vpop.f32.mrf.mxu0  ;;  %v5091_v19 = vpop.f32.mrf.mxu1 }
 0xfad   :  { %v5176_v27 = vmax.f32 %v5089_v9, 0.0  ;;  %v5179_v36 = vmin.f32 %v5175_v60, 6.0 }
 0xfaf   :  { %v5180_v56 = vmin.f32 %v5176_v27, 6.0  ;;  %v5183_v58 = vpack.c.bf16 %v5179_v36, %v5179_v36 }
 0xfb1   :  { %v5184_v55 = vpack.c.bf16 %v5180_v56, %v5180_v56 }
 0xfb3   :  { %5482 = vmatprep.mubr.bf16.mxu0 %v5184_v55 }
 0xfb4   :  { %5483 = vmatmul.mubr.bf16.vlgmr.msra.gmra.mxu0 %v5183_v58 }
 0xfe6   :  { %v5127_v5 = vpop.f32.mrf.mxu0  ;;  %v5168_v18 = vpop.f32.mrf.mxu1 }
 0xfe7   :  { %v5128_v20 = vadd.f32 %v5127_v5, %v4362_v63 }
 0xfe8   :  { %v5129_v21 = vpop.f32.mrf.mxu0  ;;  %v5170_v22 = vpop.f32.mrf.mxu1 }
 0xfe9   :  { %v5169_v23 = vadd.f32 %v5168_v18, %v5128_v20  ;;  %v5130_v24 = vadd.f32 %v5129_v21, %v4366_v59 }
 0xfea   :  { %v5131_v25 = vpop.f32.mrf.mxu0  ;;  %v5172_v26 = vpop.f32.mrf.mxu1 }
 0xfeb   :  { %v5177_v28 = vmax.f32 %v5169_v23, 0.0  ;;  %v5171_v29 = vadd.f32 %v5170_v22, %v5130_v24 }
 0xfec   :  { %v5132_v8 = vpop.f32.mrf.mxu0  ;;  %v5173_v17 = vpop.f32.mrf.mxu1 }
 0xfed   :  { %v5178_v30 = vmax.f32 %v5171_v29, 0.0  ;;  %v5181_v39 = vmin.f32 %v5177_v28, 6.0 }
 0xfef   :  { %v5182_v31 = vmin.f32 %v5178_v30, 6.0  ;;  %v5185_v32 = vpack.c.bf16 %v5181_v39, %v5181_v39 }
 0xff1   :  { %v5186_v47 = vpack.c.bf16 %v5182_v31, %v5182_v31 }
 0xff3   :  { %5522 = vmatprep.mubr.bf16.mxu1 %v5186_v47 }
 0xff4   :  { %5523 = vmatmul.mubr.bf16.vlgmr.msra.gmra.mxu1 %v5185_v32 }
0x1074   :  { %v6409_v34 = vpop.f32.mrf.mxu0 }
0x1076   :  { %v6410_v35 = vpop.f32.mrf.mxu0 }
0x1077   :  { %v6411_v46 = vadd.f32 %v6410_v35, %v6409_v34 }
0x1078   :  { %v6412_v40 = vpop.f32.mrf.mxu0 }
0x1079   :  { %v5485_v37 = vadd.f32 %v6411_v46, %v6142_v49 }
0x107a   :  { %v6413_v41 = vpop.f32.mrf.mxu0 }
0x10b4   :  { %v6431_v44 = vpop.f32.mrf.mxu1 }
0x10b6   :  { %v6432_v48 = vpop.f32.mrf.mxu1 }
0x10b7   :  { %v6433_v54 = vadd.f32 %v6432_v48, %v6431_v44 }
0x10b8   :  { %v6434_v51 = vpop.f32.mrf.mxu1 }
0x10b9   :  { %v5525_v53 = vadd.f32 %v6433_v54, %v5485_v37 }
0x10ba   :  { %v6435_v4 = vpop.f32.mrf.mxu1 }
0x10bb   :  { %v5537_v43 = vsel %vm9018_vm8, %v5525_v53, 0.0 }
0x10bc   :  { %5538 = vadd.xlane.f32.xlu0 %v5537_v43 }
0x10d2   :  { %5554 = vperm.xlu0 %6751, %v5525_v53  }
0x1145   :  { %v5539_v45 = vpop.xlane.xlu0 %5538 }
0x1146   :  { %v5540_v0 = vrot.slane %v5539_v45, 4 }
0x1148   :  { %v5541_v50 = vadd.f32 %v5540_v0, %v5539_v45 }
0x114a   :  { %v5542_v57 = vrot.slane %v5541_v50, 2 }
0x114c   :  { %v5543_v1 = vadd.f32 %v5542_v57, %v5541_v50 }
0x114d   :  { %v5555_v12 = vpop.permute.xlu0 %5554 }
0x114e   :  { %v5544_v2 = vrot.slane %v5543_v1, 1 }
0x1150   :  { %v5545_v3 = vadd.f32 %v5544_v2, %v5543_v1 }
0x1152   :  { %6745 = vpush %v5545_v3 }
0x1183   :  { %s6746_s14 = spop %6745 }
0x1184   :  { %s5549_s17 = smul.f32 0.1, %s6746_s14 }
0x1186   :  { %v5550_v6 = vstv %s5549_s17 }
0x1187   :  { %v5551_v7 = vsub.f32 %v5525_v53, %v5550_v6 }
0x1189   :  { %v5557_v13 = vadd.f32 %v5555_v12, %v5551_v7 }
0x118b   :  { %v5558_v61 = vsel %vm9018_vm8, %v5557_v13, 0.0 }
0x118c   :  { %5559 = vst [vmem:[%s9044_s15] sm:$0xff] %v5558_v61 }

</bundles_post_ra>
